<compile_context>
chip_gen: v6e
topology: v6e:2x2x1
jax: 0.10.0
libtpu: 0.0.40
codegen_flags: <defaults>
</compile_context>

<pallas_src>
import functools

import jax
import jax.numpy as jnp
from jax.experimental import pallas as pl
from jax.experimental.pallas import tpu as pltpu

NEG_SLOPE = 0.01
BN_EPS = 1e-5


def _lrelu(v):
    return jnp.where(v > 0, v, NEG_SLOPE * v)


def _vmem_limit_bytes():
    """~3/4 of physical VMEM, capped at 100 MiB (48 MiB on v7x, 96 MiB on v5e/v6e)."""
    try:
        cap = pltpu.get_tpu_info().vmem_capacity_bytes
    except Exception:  # conservative fallback if the query is unavailable
        cap = 64 * 1024 * 1024
    return int(min(100 * 1024 * 1024, (cap * 3) // 4))


def _chunk_rows(H, W, target_rows=256):
    """Largest divisor of H such that (rows * W) <= target_rows (>=1)."""
    cap = max(1, target_rows // max(W, 1))
    best = 1
    for d in range(1, H + 1):
        if H % d == 0 and d <= cap:
            best = d
    return best


def _conv3x3_stats_kernel(x_ref, w1_ref, y_ref, s_ref, bufs_ref, *, hc):
    """LReLU + 3x3 'same' conv for one sample + per-chunk BN1 stats.

    x_ref   : (1, H, W, C) fp32        input tile
    w1_ref  : (9, C, C)    mxu dtype   conv taps (kh*3+kw, cin, cout)
    y_ref   : (1, H*W, C)  inter dtype conv output tile
    s_ref   : (1, NCH, 2, C) fp32      per-chunk [sum, centered-M2]
    bufs_ref: (3, (H+2)*W, C) mxu dtype  W-pre-shifted, H-padded activations
    """
    _, H, W, C = x_ref.shape
    mxu = bufs_ref.dtype
    nch = H // hc
    m = hc * W

    # LeakyReLU once, cast once to the MXU dtype, build the three W-shifted
    # copies in registers (zero-padding commutes with LReLU since LReLU(0)=0).
    a = _lrelu(x_ref[0]).astype(mxu)                       # (H, W, C)
    zc = jnp.zeros((H, 1, C), mxu)
    left = jnp.concatenate([zc, a[:, :W - 1, :]], axis=1)  # a_pad[., j+0]
    right = jnp.concatenate([a[:, 1:, :], zc], axis=1)     # a_pad[., j+2]

    # Store the three buffers flattened over (row, col) so every conv tap is a
    # contiguous, W-aligned slice (no per-tap reshape/relayout).  Only the two
    # halo rows per buffer are zeroed each step (tiny).
    zrow = jnp.zeros((W, C), mxu)
    for dw, val in enumerate((left, a, right)):
        bufs_ref[dw, 0:W, :] = zrow
        bufs_ref[dw, W:(H + 1) * W, :] = val.reshape(H * W, C)
        bufs_ref[dw, (H + 1) * W:(H + 2) * W, :] = zrow

    # Chunked conv: 9 tap matmuls accumulate in a register-resident fp32 value,
    # each finished chunk is written to y_ref exactly once.
    for c in range(nch):
        h0 = c * hc
        acc = None
        for t in range(9):
            dh, dw = divmod(t, 3)
            tap = bufs_ref[dw, pl.ds((h0 + dh) * W, m), :]          # (m, C), mxu
            contrib = jnp.dot(tap, w1_ref[t], preferred_element_type=jnp.float32)
            acc = contrib if acc is None else acc + contrib
        y_ref[0, pl.ds(h0 * W, m), :] = acc.astype(y_ref.dtype)

        # Numerically-stable per-chunk stats: channel sum + centered 2nd moment.
        csum = jnp.sum(acc, axis=0, keepdims=True)                  # (1, C)
        cdiff = acc - csum * (1.0 / m)
        cm2 = jnp.sum(cdiff * cdiff, axis=0, keepdims=True)         # (1, C)
        s_ref[0, c, :, :] = jnp.concatenate([csum, cm2], axis=0)    # (2, C)


def _bn1_conv1x1_stats_kernel(y_ref, scale1_ref, shift1_ref, w2_ref, z_ref, s_ref):
    """Folded BN1 affine + LReLU + 1x1 conv for one tile + BN2 partial stats.

    y_ref         : (1, R, C) inter dtype  3x3-conv output tile
    scale1/shift1 : (1, C)    fp32         gamma*rsqrt(var+eps), beta - mean*scale
    w2_ref        : (C, C)    mxu dtype    1x1 conv weight
    z_ref         : (1, R, C) inter dtype  1x1-conv output tile
    s_ref         : (1, 2, C) fp32         per-tile [sum, centered-M2] of z
    """
    _, R, C = y_ref.shape
    yn = _lrelu(y_ref[0].astype(jnp.float32) * scale1_ref[...] + shift1_ref[...])
    z = jnp.dot(yn.astype(w2_ref.dtype), w2_ref[...],
                preferred_element_type=jnp.float32)
    z_ref[...] = z.reshape(1, R, C).astype(z_ref.dtype)
    zsum = jnp.sum(z, axis=0, keepdims=True)                        # (1, C)
    zdiff = z - zsum * (1.0 / R)
    zm2 = jnp.sum(zdiff * zdiff, axis=0, keepdims=True)             # (1, C)
    s_ref[0, :, :] = jnp.concatenate([zsum, zm2], axis=0)           # (2, C)


def _fold_bn(sum_g, m2_g, rows_per_group, gamma, beta):
    """Exact grouped-variance combine + BN fold into per-channel scale/shift.

    sum_g, m2_g: (G, C) per-group channel sums / centered second moments,
    every group has `rows_per_group` rows.  Biased variance (PyTorch training BN).
    """
    G = sum_g.shape[0]
    n = float(rows_per_group * G)
    mu_g = sum_g / float(rows_per_group)
    mu = jnp.sum(sum_g, axis=0) / n
    var = (jnp.sum(m2_g, axis=0)
           + float(rows_per_group) * jnp.sum((mu_g - mu) ** 2, axis=0)) / n
    var = jnp.maximum(var, 0.0)
    scale = gamma.reshape(-1) * jax.lax.rsqrt(var + BN_EPS)
    shift = beta.reshape(-1) - mu * scale
    return scale.reshape(1, -1), shift.reshape(1, -1)


@functools.partial(jax.jit, static_argnames=("mxu_dtype",))
def res_block_oord(x_nchw, params, *, mxu_dtype=jnp.bfloat16):
    """x_nchw: (B, C, H, W) float32 -> (B, C, H, W) float32.

    mxu_dtype: dtype of MXU operands *and* of the inter-pass intermediates
    (bfloat16 = production path on v5e/v6e/v7x; float32 = tight-check path).
    Element-wise math and BN statistics are always fp32.
    """
    w1, b1, g1, be1, w2, b2, g2, be2 = params
    del b1, b2  # conv biases cancel exactly inside the following BatchNorm

    x = jnp.transpose(x_nchw, (0, 2, 3, 1)).astype(jnp.float32)     # NHWC
    B, H, W, C = x.shape
    R = H * W
    inter_dtype = mxu_dtype                                          # y/z HBM dtype
    hc = _chunk_rows(H, W)                                           # H-rows per chunk
    nch = H // hc
    m = hc * W

    w1_taps = w1.reshape(9, C, C).astype(mxu_dtype)                  # tap-major weights
    w2_m = w2.astype(mxu_dtype)

    cparams = pltpu.CompilerParams(
        dimension_semantics=("parallel",),          # batch grid split across TCs
        vmem_limit_bytes=_vmem_limit_bytes(),
    )

    # ---- Pass 1: LReLU + Conv3x3, per-chunk BN1 stats ------------------------
    y, s1 = pl.pallas_call(
        functools.partial(_conv3x3_stats_kernel, hc=hc),
        grid=(B,),
        in_specs=[
            pl.BlockSpec((1, H, W, C), lambda b: (b, 0, 0, 0)),
            pl.BlockSpec((9, C, C), lambda b: (0, 0, 0)),
        ],
        out_specs=(
            pl.BlockSpec((1, R, C), lambda b: (b, 0, 0)),
            pl.BlockSpec((1, nch, 2, C), lambda b: (b, 0, 0, 0)),
        ),
        out_shape=(
            jax.ShapeDtypeStruct((B, R, C), inter_dtype),
            jax.ShapeDtypeStruct((B, nch, 2, C), jnp.float32),
        ),
        scratch_shapes=[pltpu.VMEM((3, (H + 2) * W, C), mxu_dtype)],
        compiler_params=cparams,
    )(x, w1_taps)

    s1f = s1.reshape(B * nch, 2, C)
    scale1, shift1 = _fold_bn(s1f[:, 0, :], s1f[:, 1, :], m, g1, be1)

    # ---- Pass 2: folded BN1 + LReLU + Conv1x1, BN2 partial stats -------------
    z, s2 = pl.pallas_call(
        _bn1_conv1x1_stats_kernel,
        grid=(B,),
        in_specs=[
            pl.BlockSpec((1, R, C), lambda b: (b, 0, 0)),
            pl.BlockSpec((1, C), lambda b: (0, 0)),
            pl.BlockSpec((1, C), lambda b: (0, 0)),
            pl.BlockSpec((C, C), lambda b: (0, 0)),
        ],
        out_specs=(
            pl.BlockSpec((1, R, C), lambda b: (b, 0, 0)),
            pl.BlockSpec((1, 2, C), lambda b: (b, 0, 0)),
        ),
        out_shape=(
            jax.ShapeDtypeStruct((B, R, C), inter_dtype),
            jax.ShapeDtypeStruct((B, 2, C), jnp.float32),
        ),
        compiler_params=cparams,
    )(y, scale1, shift1, w2_m)

    scale2, shift2 = _fold_bn(s2[:, 0, :], s2[:, 1, :], R, g2, be2)

    # ---- Pass 3 (plain JAX): folded BN2 + residual, fused with exit transpose.
    z_nhwc = z.astype(jnp.float32).reshape(B, H, W, C)
    out = x + z_nhwc * scale2.reshape(1, 1, 1, C) + shift2.reshape(1, 1, 1, C)
    return jnp.transpose(out, (0, 3, 1, 2))                          # back to NCHW


def init_params(key, dim):
    """Deterministic synthetic parameters matching the module's shapes."""
    k1, k2, k3, k4, k5, k6 = jax.random.split(key, 6)
    bound1 = 1.0 / jnp.sqrt(dim * 9.0)
    w1 = jax.random.uniform(k1, (3, 3, dim, dim), jnp.float32, -bound1, bound1)
    b1 = jax.random.uniform(k2, (1, dim), jnp.float32, -bound1, bound1)
    bound2 = 1.0 / jnp.sqrt(float(dim))
    w2 = jax.random.uniform(k3, (dim, dim), jnp.float32, -bound2, bound2)
    b2 = jax.random.uniform(k4, (1, dim), jnp.float32, -bound2, bound2)
    g1 = 1.0 + 0.1 * jax.random.normal(k5, (1, dim), jnp.float32)
    be1 = jnp.zeros((1, dim), jnp.float32)
    g2 = 1.0 + 0.1 * jax.random.normal(k6, (1, dim), jnp.float32)
    be2 = jnp.zeros((1, dim), jnp.float32)
    return (w1, b1, g1, be1, w2, b2, g2, be2)


def _reference(x_nchw, params):
    """Pure-JAX fp32 reference of the PyTorch forward pass (biases included)."""
    w1, b1, g1, be1, w2, b2, g2, be2 = params
    x = jnp.transpose(x_nchw, (0, 2, 3, 1)).astype(jnp.float32)
    a = jnp.where(x > 0, x, NEG_SLOPE * x)
    y = jax.lax.conv_general_dilated(
        a, w1, window_strides=(1, 1), padding="SAME",
        dimension_numbers=("NHWC", "HWIO", "NHWC")) + b1.reshape(1, 1, 1, -1)
    mu = jnp.mean(y, axis=(0, 1, 2), keepdims=True)
    var = jnp.mean((y - mu) ** 2, axis=(0, 1, 2), keepdims=True)
    y = (y - mu) / jnp.sqrt(var + BN_EPS) * g1.reshape(1, 1, 1, -1) + be1.reshape(1, 1, 1, -1)
    y = jnp.where(y > 0, y, NEG_SLOPE * y)
    z = jnp.einsum("bhwc,cd->bhwd", y, w2) + b2.reshape(1, 1, 1, -1)
    mu2 = jnp.mean(z, axis=(0, 1, 2), keepdims=True)
    var2 = jnp.mean((z - mu2) ** 2, axis=(0, 1, 2), keepdims=True)
    z = (z - mu2) / jnp.sqrt(var2 + BN_EPS) * g2.reshape(1, 1, 1, -1) + be2.reshape(1, 1, 1, -1)
    return jnp.transpose(x + z, (0, 3, 1, 2))


if __name__ == "__main__":
    B, C, H, W = 2, 4, 16, 16
    key = jax.random.PRNGKey(0)
    kx, kp = jax.random.split(key)
    x = jax.random.normal(kx, (B, C, H, W), jnp.float32)
    params = init_params(kp, C)

    ref = _reference(x, params)

    # fp32 MXU operands + fp32 intermediates: tight check vs the JAX reference.
    out = jax.block_until_ready(res_block_oord(x, params, mxu_dtype=jnp.float32))
    assert out.shape == (B, C, H, W)
    assert jnp.allclose(out, ref, rtol=1e-3, atol=1e-3), "fp32 kernel mismatch vs JAX reference"

    # bf16 MXU operands + bf16 intermediates (fp32 accumulation / stats):
    # production path on v5e / v6e / v7x.
    out_bf16 = jax.block_until_ready(res_block_oord(x, params, mxu_dtype=jnp.bfloat16))
    assert jnp.allclose(out_bf16, ref, rtol=5e-2, atol=5e-2), "bf16 kernel mismatch vs JAX reference"

    print("KERNEL_OK")
</pallas_src>

<mosaic_0001>
module attributes {stable_mosaic.version = 11 : i64} {
  func.func @_conv3x3_stats_kernel(%arg0: i32, %arg1: memref<1x16x16x4xf32, #tpu.memory_space<vmem>>, %arg2: memref<9x4x4xf32, #tpu.memory_space<vmem>>, %arg3: memref<1x256x4xf32, #tpu.memory_space<vmem>>, %arg4: memref<1x1x2x4xf32, #tpu.memory_space<vmem>>, %arg5: memref<3x288x4xf32, #tpu.memory_space<vmem>>) attributes {dimension_semantics = [#tpu.dimension_semantics<parallel>], iteration_bounds = array<i64: 2>, scalar_prefetch = 0 : i64, scratch_operands = 1 : i64, tpu.core_type = #tpu.core_type<tc>, window_params = [{transform_indices = @transform_0, window_bounds = array<i64: 1, 16, 16, 4>}, {pipeline_mode = #tpu.pipeline_mode<synchronous>, transform_indices = @transform_1, window_bounds = array<i64: 9, 4, 4>}, {transform_indices = @transform_2, window_bounds = array<i64: 1, 256, 4>}, {transform_indices = @transform_3, window_bounds = array<i64: 1, 1, 2, 4>}]} {
    %c0 = arith.constant 0 : index
    %c0_0 = arith.constant 0 : index
    %c0_1 = arith.constant 0 : index
    %c0_2 = arith.constant 0 : index
    %0 = vector.load %arg1[%c0, %c0_0, %c0_1, %c0_2] : memref<1x16x16x4xf32, #tpu.memory_space<vmem>>, vector<1x16x16x4xf32>
    %1 = vector.shape_cast %0 : vector<1x16x16x4xf32> to vector<16x16x4xf32>
    %cst = arith.constant 0.000000e+00 : f32
    %2 = vector.broadcast %cst : f32 to vector<16x16x4xf32>
    %3 = arith.cmpf ogt, %1, %2 : vector<16x16x4xf32>
    %cst_3 = arith.constant 0.00999999977 : f32
    %4 = vector.broadcast %cst_3 : f32 to vector<16x16x4xf32>
    %5 = arith.mulf %4, %1 : vector<16x16x4xf32>
    %6 = arith.select %3, %1, %5 : vector<16x16x4xi1>, vector<16x16x4xf32>
    %cst_4 = arith.constant 0.000000e+00 : f32
    %7 = vector.broadcast %cst_4 : f32 to vector<16x1x4xf32>
    %8 = vector.extract_strided_slice %6 {offsets = [0, 0, 0], sizes = [16, 15, 4], strides = [1, 1, 1]} : vector<16x16x4xf32> to vector<16x15x4xf32>
    %9 = tpu.concatenate %7, %8 in 1 : vector<16x1x4xf32>, vector<16x15x4xf32> -> vector<16x16x4xf32>
    %10 = vector.extract_strided_slice %6 {offsets = [0, 1, 0], sizes = [16, 15, 4], strides = [1, 1, 1]} : vector<16x16x4xf32> to vector<16x15x4xf32>
    %11 = tpu.concatenate %10, %7 in 1 : vector<16x15x4xf32>, vector<16x1x4xf32> -> vector<16x16x4xf32>
    %cst_5 = arith.constant 0.000000e+00 : f32
    %12 = vector.broadcast %cst_5 : f32 to vector<16x4xf32>
    %c0_6 = arith.constant 0 : index
    %c0_7 = arith.constant 0 : index
    %c0_8 = arith.constant 0 : index
    %13 = vector.load %arg5[%c0_6, %c0_7, %c0_8] : memref<3x288x4xf32, #tpu.memory_space<vmem>>, vector<1x16x4xf32>
    %14 = vector.shape_cast %13 : vector<1x16x4xf32> to vector<16x4xf32>
    %15 = vector.shape_cast %12 : vector<16x4xf32> to vector<1x16x4xf32>
    tpu.vector_store %arg5[%c0_6, %c0_7, %c0_8], %15 {strides = array<i32>} : memref<3x288x4xf32, #tpu.memory_space<vmem>>, vector<1x16x4xf32>,
    %16 = vector.shape_cast %9 : vector<16x16x4xf32> to vector<256x4xf32>
    %c0_9 = arith.constant 0 : index
    %c16 = arith.constant 16 : index
    %c0_10 = arith.constant 0 : index
    %17 = vector.load %arg5[%c0_9, %c16, %c0_10] : memref<3x288x4xf32, #tpu.memory_space<vmem>>, vector<1x256x4xf32>
    %18 = vector.shape_cast %17 : vector<1x256x4xf32> to vector<256x4xf32>
    %19 = vector.shape_cast %16 : vector<256x4xf32> to vector<1x256x4xf32>
    tpu.vector_store %arg5[%c0_9, %c16, %c0_10], %19 {strides = array<i32>} : memref<3x288x4xf32, #tpu.memory_space<vmem>>, vector<1x256x4xf32>,
    %c0_11 = arith.constant 0 : index
    %c272 = arith.constant 272 : index
    %c0_12 = arith.constant 0 : index
    %20 = vector.load %arg5[%c0_11, %c272, %c0_12] : memref<3x288x4xf32, #tpu.memory_space<vmem>>, vector<1x16x4xf32>
    %21 = vector.shape_cast %20 : vector<1x16x4xf32> to vector<16x4xf32>
    %22 = vector.shape_cast %12 : vector<16x4xf32> to vector<1x16x4xf32>
    tpu.vector_store %arg5[%c0_11, %c272, %c0_12], %22 {strides = array<i32>} : memref<3x288x4xf32, #tpu.memory_space<vmem>>, vector<1x16x4xf32>,
    %c1 = arith.constant 1 : index
    %c0_13 = arith.constant 0 : index
    %c0_14 = arith.constant 0 : index
    %23 = vector.load %arg5[%c1, %c0_13, %c0_14] : memref<3x288x4xf32, #tpu.memory_space<vmem>>, vector<1x16x4xf32>
    %24 = vector.shape_cast %23 : vector<1x16x4xf32> to vector<16x4xf32>
    %25 = vector.shape_cast %12 : vector<16x4xf32> to vector<1x16x4xf32>
    tpu.vector_store %arg5[%c1, %c0_13, %c0_14], %25 {strides = array<i32>} : memref<3x288x4xf32, #tpu.memory_space<vmem>>, vector<1x16x4xf32>,
    %26 = vector.shape_cast %6 : vector<16x16x4xf32> to vector<256x4xf32>
    %c1_15 = arith.constant 1 : index
    %c16_16 = arith.constant 16 : index
    %c0_17 = arith.constant 0 : index
    %27 = vector.load %arg5[%c1_15, %c16_16, %c0_17] : memref<3x288x4xf32, #tpu.memory_space<vmem>>, vector<1x256x4xf32>
    %28 = vector.shape_cast %27 : vector<1x256x4xf32> to vector<256x4xf32>
    %29 = vector.shape_cast %26 : vector<256x4xf32> to vector<1x256x4xf32>
    tpu.vector_store %arg5[%c1_15, %c16_16, %c0_17], %29 {strides = array<i32>} : memref<3x288x4xf32, #tpu.memory_space<vmem>>, vector<1x256x4xf32>,
    %c1_18 = arith.constant 1 : index
    %c272_19 = arith.constant 272 : index
    %c0_20 = arith.constant 0 : index
    %30 = vector.load %arg5[%c1_18, %c272_19, %c0_20] : memref<3x288x4xf32, #tpu.memory_space<vmem>>, vector<1x16x4xf32>
    %31 = vector.shape_cast %30 : vector<1x16x4xf32> to vector<16x4xf32>
    %32 = vector.shape_cast %12 : vector<16x4xf32> to vector<1x16x4xf32>
    tpu.vector_store %arg5[%c1_18, %c272_19, %c0_20], %32 {strides = array<i32>} : memref<3x288x4xf32, #tpu.memory_space<vmem>>, vector<1x16x4xf32>,
    %c2 = arith.constant 2 : index
    %c0_21 = arith.constant 0 : index
    %c0_22 = arith.constant 0 : index
    %33 = vector.load %arg5[%c2, %c0_21, %c0_22] : memref<3x288x4xf32, #tpu.memory_space<vmem>>, vector<1x16x4xf32>
    %34 = vector.shape_cast %33 : vector<1x16x4xf32> to vector<16x4xf32>
    %35 = vector.shape_cast %12 : vector<16x4xf32> to vector<1x16x4xf32>
    tpu.vector_store %arg5[%c2, %c0_21, %c0_22], %35 {strides = array<i32>} : memref<3x288x4xf32, #tpu.memory_space<vmem>>, vector<1x16x4xf32>,
    %36 = vector.shape_cast %11 : vector<16x16x4xf32> to vector<256x4xf32>
    %c2_23 = arith.constant 2 : index
    %c16_24 = arith.constant 16 : index
    %c0_25 = arith.constant 0 : index
    %37 = vector.load %arg5[%c2_23, %c16_24, %c0_25] : memref<3x288x4xf32, #tpu.memory_space<vmem>>, vector<1x256x4xf32>
    %38 = vector.shape_cast %37 : vector<1x256x4xf32> to vector<256x4xf32>
    %39 = vector.shape_cast %36 : vector<256x4xf32> to vector<1x256x4xf32>
    tpu.vector_store %arg5[%c2_23, %c16_24, %c0_25], %39 {strides = array<i32>} : memref<3x288x4xf32, #tpu.memory_space<vmem>>, vector<1x256x4xf32>,
    %c2_26 = arith.constant 2 : index
    %c272_27 = arith.constant 272 : index
    %c0_28 = arith.constant 0 : index
    %40 = vector.load %arg5[%c2_26, %c272_27, %c0_28] : memref<3x288x4xf32, #tpu.memory_space<vmem>>, vector<1x16x4xf32>
    %41 = vector.shape_cast %40 : vector<1x16x4xf32> to vector<16x4xf32>
    %42 = vector.shape_cast %12 : vector<16x4xf32> to vector<1x16x4xf32>
    tpu.vector_store %arg5[%c2_26, %c272_27, %c0_28], %42 {strides = array<i32>} : memref<3x288x4xf32, #tpu.memory_space<vmem>>, vector<1x16x4xf32>,
    %c0_29 = arith.constant 0 : index
    %c0_30 = arith.constant 0 : index
    %c0_31 = arith.constant 0 : index
    %43 = vector.load %arg5[%c0_29, %c0_30, %c0_31] : memref<3x288x4xf32, #tpu.memory_space<vmem>>, vector<1x256x4xf32>
    %44 = vector.shape_cast %43 : vector<1x256x4xf32> to vector<256x4xf32>
    %c0_32 = arith.constant 0 : index
    %c0_33 = arith.constant 0 : index
    %c0_34 = arith.constant 0 : index
    %45 = vector.load %arg2[%c0_32, %c0_33, %c0_34] : memref<9x4x4xf32, #tpu.memory_space<vmem>>, vector<1x4x4xf32>
    %46 = vector.shape_cast %45 : vector<1x4x4xf32> to vector<4x4xf32>
    %cst_35 = arith.constant dense<0.000000e+00> : vector<256x4xf32>
    %47 = tpu.matmul %44, %46, %cst_35 {dimension_numbers = #tpu.dot_dimension_numbers<[1], [0], [0], [1], [0, 0, 1, 1], [], []>} : vector<256x4xf32>, vector<4x4xf32>, vector<256x4xf32> -> vector<256x4xf32>
    %c1_36 = arith.constant 1 : index
    %c0_37 = arith.constant 0 : index
    %c0_38 = arith.constant 0 : index
    %48 = vector.load %arg5[%c1_36, %c0_37, %c0_38] : memref<3x288x4xf32, #tpu.memory_space<vmem>>, vector<1x256x4xf32>
    %49 = vector.shape_cast %48 : vector<1x256x4xf32> to vector<256x4xf32>
    %c1_39 = arith.constant 1 : index
    %c0_40 = arith.constant 0 : index
    %c0_41 = arith.constant 0 : index
    %50 = vector.load %arg2[%c1_39, %c0_40, %c0_41] : memref<9x4x4xf32, #tpu.memory_space<vmem>>, vector<1x4x4xf32>
    %51 = vector.shape_cast %50 : vector<1x4x4xf32> to vector<4x4xf32>
    %cst_42 = arith.constant dense<0.000000e+00> : vector<256x4xf32>
    %52 = tpu.matmul %49, %51, %cst_42 {dimension_numbers = #tpu.dot_dimension_numbers<[1], [0], [0], [1], [0, 0, 1, 1], [], []>} : vector<256x4xf32>, vector<4x4xf32>, vector<256x4xf32> -> vector<256x4xf32>
    %53 = arith.addf %47, %52 : vector<256x4xf32>
    %c2_43 = arith.constant 2 : index
    %c0_44 = arith.constant 0 : index
    %c0_45 = arith.constant 0 : index
    %54 = vector.load %arg5[%c2_43, %c0_44, %c0_45] : memref<3x288x4xf32, #tpu.memory_space<vmem>>, vector<1x256x4xf32>
    %55 = vector.shape_cast %54 : vector<1x256x4xf32> to vector<256x4xf32>
    %c2_46 = arith.constant 2 : index
    %c0_47 = arith.constant 0 : index
    %c0_48 = arith.constant 0 : index
    %56 = vector.load %arg2[%c2_46, %c0_47, %c0_48] : memref<9x4x4xf32, #tpu.memory_space<vmem>>, vector<1x4x4xf32>
    %57 = vector.shape_cast %56 : vector<1x4x4xf32> to vector<4x4xf32>
    %cst_49 = arith.constant dense<0.000000e+00> : vector<256x4xf32>
    %58 = tpu.matmul %55, %57, %cst_49 {dimension_numbers = #tpu.dot_dimension_numbers<[1], [0], [0], [1], [0, 0, 1, 1], [], []>} : vector<256x4xf32>, vector<4x4xf32>, vector<256x4xf32> -> vector<256x4xf32>
    %59 = arith.addf %53, %58 : vector<256x4xf32>
    %c0_50 = arith.constant 0 : index
    %c16_51 = arith.constant 16 : index
    %c0_52 = arith.constant 0 : index
    %60 = vector.load %arg5[%c0_50, %c16_51, %c0_52] : memref<3x288x4xf32, #tpu.memory_space<vmem>>, vector<1x256x4xf32>
    %61 = vector.shape_cast %60 : vector<1x256x4xf32> to vector<256x4xf32>
    %c3 = arith.constant 3 : index
    %c0_53 = arith.constant 0 : index
    %c0_54 = arith.constant 0 : index
    %62 = vector.load %arg2[%c3, %c0_53, %c0_54] : memref<9x4x4xf32, #tpu.memory_space<vmem>>, vector<1x4x4xf32>
    %63 = vector.shape_cast %62 : vector<1x4x4xf32> to vector<4x4xf32>
    %cst_55 = arith.constant dense<0.000000e+00> : vector<256x4xf32>
    %64 = tpu.matmul %61, %63, %cst_55 {dimension_numbers = #tpu.dot_dimension_numbers<[1], [0], [0], [1], [0, 0, 1, 1], [], []>} : vector<256x4xf32>, vector<4x4xf32>, vector<256x4xf32> -> vector<256x4xf32>
    %65 = arith.addf %59, %64 : vector<256x4xf32>
    %c1_56 = arith.constant 1 : index
    %c16_57 = arith.constant 16 : index
    %c0_58 = arith.constant 0 : index
    %66 = vector.load %arg5[%c1_56, %c16_57, %c0_58] : memref<3x288x4xf32, #tpu.memory_space<vmem>>, vector<1x256x4xf32>
    %67 = vector.shape_cast %66 : vector<1x256x4xf32> to vector<256x4xf32>
    %c4 = arith.constant 4 : index
    %c0_59 = arith.constant 0 : index
    %c0_60 = arith.constant 0 : index
    %68 = vector.load %arg2[%c4, %c0_59, %c0_60] : memref<9x4x4xf32, #tpu.memory_space<vmem>>, vector<1x4x4xf32>
    %69 = vector.shape_cast %68 : vector<1x4x4xf32> to vector<4x4xf32>
    %cst_61 = arith.constant dense<0.000000e+00> : vector<256x4xf32>
    %70 = tpu.matmul %67, %69, %cst_61 {dimension_numbers = #tpu.dot_dimension_numbers<[1], [0], [0], [1], [0, 0, 1, 1], [], []>} : vector<256x4xf32>, vector<4x4xf32>, vector<256x4xf32> -> vector<256x4xf32>
    %71 = arith.addf %65, %70 : vector<256x4xf32>
    %c2_62 = arith.constant 2 : index
    %c16_63 = arith.constant 16 : index
    %c0_64 = arith.constant 0 : index
    %72 = vector.load %arg5[%c2_62, %c16_63, %c0_64] : memref<3x288x4xf32, #tpu.memory_space<vmem>>, vector<1x256x4xf32>
    %73 = vector.shape_cast %72 : vector<1x256x4xf32> to vector<256x4xf32>
    %c5 = arith.constant 5 : index
    %c0_65 = arith.constant 0 : index
    %c0_66 = arith.constant 0 : index
    %74 = vector.load %arg2[%c5, %c0_65, %c0_66] : memref<9x4x4xf32, #tpu.memory_space<vmem>>, vector<1x4x4xf32>
    %75 = vector.shape_cast %74 : vector<1x4x4xf32> to vector<4x4xf32>
    %cst_67 = arith.constant dense<0.000000e+00> : vector<256x4xf32>
    %76 = tpu.matmul %73, %75, %cst_67 {dimension_numbers = #tpu.dot_dimension_numbers<[1], [0], [0], [1], [0, 0, 1, 1], [], []>} : vector<256x4xf32>, vector<4x4xf32>, vector<256x4xf32> -> vector<256x4xf32>
    %77 = arith.addf %71, %76 : vector<256x4xf32>
    %c0_68 = arith.constant 0 : index
    %c32 = arith.constant 32 : index
    %c0_69 = arith.constant 0 : index
    %78 = vector.load %arg5[%c0_68, %c32, %c0_69] : memref<3x288x4xf32, #tpu.memory_space<vmem>>, vector<1x256x4xf32>
    %79 = vector.shape_cast %78 : vector<1x256x4xf32> to vector<256x4xf32>
    %c6 = arith.constant 6 : index
    %c0_70 = arith.constant 0 : index
    %c0_71 = arith.constant 0 : index
    %80 = vector.load %arg2[%c6, %c0_70, %c0_71] : memref<9x4x4xf32, #tpu.memory_space<vmem>>, vector<1x4x4xf32>
    %81 = vector.shape_cast %80 : vector<1x4x4xf32> to vector<4x4xf32>
    %cst_72 = arith.constant dense<0.000000e+00> : vector<256x4xf32>
    %82 = tpu.matmul %79, %81, %cst_72 {dimension_numbers = #tpu.dot_dimension_numbers<[1], [0], [0], [1], [0, 0, 1, 1], [], []>} : vector<256x4xf32>, vector<4x4xf32>, vector<256x4xf32> -> vector<256x4xf32>
    %83 = arith.addf %77, %82 : vector<256x4xf32>
    %c1_73 = arith.constant 1 : index
    %c32_74 = arith.constant 32 : index
    %c0_75 = arith.constant 0 : index
    %84 = vector.load %arg5[%c1_73, %c32_74, %c0_75] : memref<3x288x4xf32, #tpu.memory_space<vmem>>, vector<1x256x4xf32>
    %85 = vector.shape_cast %84 : vector<1x256x4xf32> to vector<256x4xf32>
    %c7 = arith.constant 7 : index
    %c0_76 = arith.constant 0 : index
    %c0_77 = arith.constant 0 : index
    %86 = vector.load %arg2[%c7, %c0_76, %c0_77] : memref<9x4x4xf32, #tpu.memory_space<vmem>>, vector<1x4x4xf32>
    %87 = vector.shape_cast %86 : vector<1x4x4xf32> to vector<4x4xf32>
    %cst_78 = arith.constant dense<0.000000e+00> : vector<256x4xf32>
    %88 = tpu.matmul %85, %87, %cst_78 {dimension_numbers = #tpu.dot_dimension_numbers<[1], [0], [0], [1], [0, 0, 1, 1], [], []>} : vector<256x4xf32>, vector<4x4xf32>, vector<256x4xf32> -> vector<256x4xf32>
    %89 = arith.addf %83, %88 : vector<256x4xf32>
    %c2_79 = arith.constant 2 : index
    %c32_80 = arith.constant 32 : index
    %c0_81 = arith.constant 0 : index
    %90 = vector.load %arg5[%c2_79, %c32_80, %c0_81] : memref<3x288x4xf32, #tpu.memory_space<vmem>>, vector<1x256x4xf32>
    %91 = vector.shape_cast %90 : vector<1x256x4xf32> to vector<256x4xf32>
    %c8 = arith.constant 8 : index
    %c0_82 = arith.constant 0 : index
    %c0_83 = arith.constant 0 : index
    %92 = vector.load %arg2[%c8, %c0_82, %c0_83] : memref<9x4x4xf32, #tpu.memory_space<vmem>>, vector<1x4x4xf32>
    %93 = vector.shape_cast %92 : vector<1x4x4xf32> to vector<4x4xf32>
    %cst_84 = arith.constant dense<0.000000e+00> : vector<256x4xf32>
    %94 = tpu.matmul %91, %93, %cst_84 {dimension_numbers = #tpu.dot_dimension_numbers<[1], [0], [0], [1], [0, 0, 1, 1], [], []>} : vector<256x4xf32>, vector<4x4xf32>, vector<256x4xf32> -> vector<256x4xf32>
    %95 = arith.addf %89, %94 : vector<256x4xf32>
    %c0_85 = arith.constant 0 : index
    %c0_86 = arith.constant 0 : index
    %c0_87 = arith.constant 0 : index
    %96 = vector.load %arg3[%c0_85, %c0_86, %c0_87] : memref<1x256x4xf32, #tpu.memory_space<vmem>>, vector<1x256x4xf32>
    %97 = vector.shape_cast %96 : vector<1x256x4xf32> to vector<256x4xf32>
    %98 = vector.shape_cast %95 : vector<256x4xf32> to vector<1x256x4xf32>
    tpu.vector_store %arg3[%c0_85, %c0_86, %c0_87], %98 {strides = array<i32>} : memref<1x256x4xf32, #tpu.memory_space<vmem>>, vector<1x256x4xf32>,
    %cst_88 = arith.constant dense<0.000000e+00> : vector<4xf32>
    %99 = vector.multi_reduction <add>, %95, %cst_88 [0] : vector<256x4xf32> to vector<4xf32>
    %100 = vector.shape_cast %99 : vector<4xf32> to vector<1x4xf32>
    %cst_89 = arith.constant 3.906250e-03 : f32
    %101 = vector.broadcast %cst_89 : f32 to vector<1x4xf32>
    %102 = arith.mulf %100, %101 : vector<1x4xf32>
    %103 = vector.broadcast %102 : vector<1x4xf32> to vector<256x4xf32>
    %104 = arith.subf %95, %103 : vector<256x4xf32>
    %105 = arith.mulf %104, %104 : vector<256x4xf32>
    %cst_90 = arith.constant dense<0.000000e+00> : vector<4xf32>
    %106 = vector.multi_reduction <add>, %105, %cst_90 [0] : vector<256x4xf32> to vector<4xf32>
    %107 = vector.shape_cast %106 : vector<4xf32> to vector<1x4xf32>
    %108 = tpu.concatenate %100, %107 in 0 : vector<1x4xf32>, vector<1x4xf32> -> vector<2x4xf32>
    %c0_91 = arith.constant 0 : index
    %c0_92 = arith.constant 0 : index
    %c0_93 = arith.constant 0 : index
    %c0_94 = arith.constant 0 : index
    %109 = vector.load %arg4[%c0_91, %c0_92, %c0_93, %c0_94] : memref<1x1x2x4xf32, #tpu.memory_space<vmem>>, vector<1x1x2x4xf32>
    %110 = vector.shape_cast %109 : vector<1x1x2x4xf32> to vector<2x4xf32>
    %111 = vector.shape_cast %108 : vector<2x4xf32> to vector<1x1x2x4xf32>
    tpu.vector_store %arg4[%c0_91, %c0_92, %c0_93, %c0_94], %111 {strides = array<i32>} : memref<1x1x2x4xf32, #tpu.memory_space<vmem>>, vector<1x1x2x4xf32>,
    return
  }
  func.func @transform_0(%arg0: i32) -> (i32, i32, i32, i32) {
    %c0_i32 = arith.constant 0 : i32
    %c0_i32_0 = arith.constant 0 : i32
    %c0_i32_1 = arith.constant 0 : i32
    %c0_i32_2 = arith.constant 0 : i32
    return %arg0, %c0_i32, %c0_i32_0, %c0_i32_1 : i32, i32, i32, i32
  }
  func.func @transform_1(%arg0: i32) -> (i32, i32, i32) {
    %c0_i32 = arith.constant 0 : i32
    %c0_i32_0 = arith.constant 0 : i32
    %c0_i32_1 = arith.constant 0 : i32
    %c0_i32_2 = arith.constant 0 : i32
    return %c0_i32, %c0_i32_0, %c0_i32_1 : i32, i32, i32
  }
  func.func @transform_2(%arg0: i32) -> (i32, i32, i32) {
    %c0_i32 = arith.constant 0 : i32
    %c0_i32_0 = arith.constant 0 : i32
    %c0_i32_1 = arith.constant 0 : i32
    return %arg0, %c0_i32, %c0_i32_0 : i32, i32, i32
  }
  func.func @transform_3(%arg0: i32) -> (i32, i32, i32, i32) {
    %c0_i32 = arith.constant 0 : i32
    %c0_i32_0 = arith.constant 0 : i32
    %c0_i32_1 = arith.constant 0 : i32
    %c0_i32_2 = arith.constant 0 : i32
    return %arg0, %c0_i32, %c0_i32_0, %c0_i32_1 : i32, i32, i32, i32
  }
}

module attributes {stable_mosaic.version = 11 : i64} {
  func.func @_bn1_conv1x1_stats_kernel(%arg0: i32, %arg1: memref<1x256x4xf32, #tpu.memory_space<vmem>>, %arg2: memref<1x4xf32, #tpu.memory_space<vmem>>, %arg3: memref<1x4xf32, #tpu.memory_space<vmem>>, %arg4: memref<4x4xf32, #tpu.memory_space<vmem>>, %arg5: memref<1x256x4xf32, #tpu.memory_space<vmem>>, %arg6: memref<1x2x4xf32, #tpu.memory_space<vmem>>) attributes {dimension_semantics = [#tpu.dimension_semantics<parallel>], iteration_bounds = array<i64: 2>, scalar_prefetch = 0 : i64, scratch_operands = 0 : i64, tpu.core_type = #tpu.core_type<tc>, window_params = [{transform_indices = @transform_0, window_bounds = array<i64: 1, 256, 4>}, {pipeline_mode = #tpu.pipeline_mode<synchronous>, transform_indices = @transform_1, window_bounds = array<i64: 1, 4>}, {pipeline_mode = #tpu.pipeline_mode<synchronous>, transform_indices = @transform_2, window_bounds = array<i64: 1, 4>}, {pipeline_mode = #tpu.pipeline_mode<synchronous>, transform_indices = @transform_3, window_bounds = array<i64: 4, 4>}, {transform_indices = @transform_4, window_bounds = array<i64: 1, 256, 4>}, {transform_indices = @transform_5, window_bounds = array<i64: 1, 2, 4>}]} {
    %c0 = arith.constant 0 : index
    %c0_0 = arith.constant 0 : index
    %c0_1 = arith.constant 0 : index
    %0 = vector.load %arg1[%c0, %c0_0, %c0_1] : memref<1x256x4xf32, #tpu.memory_space<vmem>>, vector<1x256x4xf32>
    %1 = vector.shape_cast %0 : vector<1x256x4xf32> to vector<256x4xf32>
    %c0_2 = arith.constant 0 : index
    %c0_3 = arith.constant 0 : index
    %2 = vector.load %arg2[%c0_2, %c0_3] : memref<1x4xf32, #tpu.memory_space<vmem>>, vector<1x4xf32>
    %3 = vector.broadcast %2 : vector<1x4xf32> to vector<256x4xf32>
    %4 = arith.mulf %1, %3 : vector<256x4xf32>
    %c0_4 = arith.constant 0 : index
    %c0_5 = arith.constant 0 : index
    %5 = vector.load %arg3[%c0_4, %c0_5] : memref<1x4xf32, #tpu.memory_space<vmem>>, vector<1x4xf32>
    %6 = vector.broadcast %5 : vector<1x4xf32> to vector<256x4xf32>
    %7 = arith.addf %4, %6 : vector<256x4xf32>
    %cst = arith.constant 0.000000e+00 : f32
    %8 = vector.broadcast %cst : f32 to vector<256x4xf32>
    %9 = arith.cmpf ogt, %7, %8 : vector<256x4xf32>
    %cst_6 = arith.constant 0.00999999977 : f32
    %10 = vector.broadcast %cst_6 : f32 to vector<256x4xf32>
    %11 = arith.mulf %10, %7 : vector<256x4xf32>
    %12 = arith.select %9, %7, %11 : vector<256x4xi1>, vector<256x4xf32>
    %c0_7 = arith.constant 0 : index
    %c0_8 = arith.constant 0 : index
    %13 = vector.load %arg4[%c0_7, %c0_8] : memref<4x4xf32, #tpu.memory_space<vmem>>, vector<4x4xf32>
    %cst_9 = arith.constant dense<0.000000e+00> : vector<256x4xf32>
    %14 = tpu.matmul %12, %13, %cst_9 {dimension_numbers = #tpu.dot_dimension_numbers<[1], [0], [0], [1], [0, 0, 1, 1], [], []>} : vector<256x4xf32>, vector<4x4xf32>, vector<256x4xf32> -> vector<256x4xf32>
    %15 = vector.shape_cast %14 : vector<256x4xf32> to vector<1x256x4xf32>
    %c0_10 = arith.constant 0 : index
    %c0_11 = arith.constant 0 : index
    %c0_12 = arith.constant 0 : index
    %16 = vector.load %arg5[%c0_10, %c0_11, %c0_12] : memref<1x256x4xf32, #tpu.memory_space<vmem>>, vector<1x256x4xf32>
    tpu.vector_store %arg5[%c0_10, %c0_11, %c0_12], %15 {strides = array<i32>} : memref<1x256x4xf32, #tpu.memory_space<vmem>>, vector<1x256x4xf32>,
    %cst_13 = arith.constant dense<0.000000e+00> : vector<4xf32>
    %17 = vector.multi_reduction <add>, %14, %cst_13 [0] : vector<256x4xf32> to vector<4xf32>
    %18 = vector.shape_cast %17 : vector<4xf32> to vector<1x4xf32>
    %cst_14 = arith.constant 3.906250e-03 : f32
    %19 = vector.broadcast %cst_14 : f32 to vector<1x4xf32>
    %20 = arith.mulf %18, %19 : vector<1x4xf32>
    %21 = vector.broadcast %20 : vector<1x4xf32> to vector<256x4xf32>
    %22 = arith.subf %14, %21 : vector<256x4xf32>
    %23 = arith.mulf %22, %22 : vector<256x4xf32>
    %cst_15 = arith.constant dense<0.000000e+00> : vector<4xf32>
    %24 = vector.multi_reduction <add>, %23, %cst_15 [0] : vector<256x4xf32> to vector<4xf32>
    %25 = vector.shape_cast %24 : vector<4xf32> to vector<1x4xf32>
    %26 = tpu.concatenate %18, %25 in 0 : vector<1x4xf32>, vector<1x4xf32> -> vector<2x4xf32>
    %c0_16 = arith.constant 0 : index
    %c0_17 = arith.constant 0 : index
    %c0_18 = arith.constant 0 : index
    %27 = vector.load %arg6[%c0_16, %c0_17, %c0_18] : memref<1x2x4xf32, #tpu.memory_space<vmem>>, vector<1x2x4xf32>
    %28 = vector.shape_cast %27 : vector<1x2x4xf32> to vector<2x4xf32>
    %29 = vector.shape_cast %26 : vector<2x4xf32> to vector<1x2x4xf32>
    tpu.vector_store %arg6[%c0_16, %c0_17, %c0_18], %29 {strides = array<i32>} : memref<1x2x4xf32, #tpu.memory_space<vmem>>, vector<1x2x4xf32>,
    return
  }
  func.func @transform_0(%arg0: i32) -> (i32, i32, i32) {
    %c0_i32 = arith.constant 0 : i32
    %c0_i32_0 = arith.constant 0 : i32
    %c0_i32_1 = arith.constant 0 : i32
    return %arg0, %c0_i32, %c0_i32_0 : i32, i32, i32
  }
  func.func @transform_1(%arg0: i32) -> (i32, i32) {
    %c0_i32 = arith.constant 0 : i32
    %c0_i32_0 = arith.constant 0 : i32
    %c0_i32_1 = arith.constant 0 : i32
    return %c0_i32, %c0_i32_0 : i32, i32
  }
  func.func @transform_2(%arg0: i32) -> (i32, i32) {
    %c0_i32 = arith.constant 0 : i32
    %c0_i32_0 = arith.constant 0 : i32
    %c0_i32_1 = arith.constant 0 : i32
    return %c0_i32, %c0_i32_0 : i32, i32
  }
  func.func @transform_3(%arg0: i32) -> (i32, i32) {
    %c0_i32 = arith.constant 0 : i32
    %c0_i32_0 = arith.constant 0 : i32
    %c0_i32_1 = arith.constant 0 : i32
    return %c0_i32, %c0_i32_0 : i32, i32
  }
  func.func @transform_4(%arg0: i32) -> (i32, i32, i32) {
    %c0_i32 = arith.constant 0 : i32
    %c0_i32_0 = arith.constant 0 : i32
    %c0_i32_1 = arith.constant 0 : i32
    return %arg0, %c0_i32, %c0_i32_0 : i32, i32, i32
  }
  func.func @transform_5(%arg0: i32) -> (i32, i32, i32) {
    %c0_i32 = arith.constant 0 : i32
    %c0_i32_0 = arith.constant 0 : i32
    %c0_i32_1 = arith.constant 0 : i32
    return %arg0, %c0_i32, %c0_i32_0 : i32, i32, i32
  }
}

</mosaic_0001>

<bundles_post_ra>
// kernel: res_block_oord.3
= control target key start
LH: loop header
LB: loop body
LE: loop exit
PB: predicated region body
PF: predicated region fallthrough
CT: control target
= control target key end

     0   :  { %s1274_s18 = smov 0   ;;  %s1788_s0 = inlined_call_operand.vmem [shape: f32[2,256,4], index: 0, kind: input, shape index: {}]   ;;  %s1789_s1 = inlined_call_operand.vmem [shape: f32[1,4], index: 1, kind: input, shape index: {}]   ;;  %s1790_s2 = inlined_call_operand.vmem [shape: f32[1,4], index: 2, kind: input, shape index: {}]   ;;  %s1791_s3 = inlined_call_operand.vmem [shape: f32[4,4], index: 3, kind: input, shape index: {}]   ;;  %s1792_s4 = inlined_call_operand.vmem [shape: f32[2,256,4], index: 4, kind: output, shape index: {0}]   ;;  %s1793_s5 = inlined_call_operand.vmem [shape: f32[2,2,4], index: 5, kind: output, shape index: {1}]  }
   0x1 LB: > { %s1094_s19 = sadd.s32 4294967295, %s1242_s18   ;;  %p1098_p0 = scmp.ge.s32.totalorder %s1242_s18, 1  ;;  %s1242_s18 = sphi %s1274_s18, %s16_s18  }
   0x2   : > { %p190_p1 = scmp.lt.s32.totalorder %s1242_s18, 3 }
   0x4   : > { %p191_p2 = pnand %p1098_p0, %p190_p1 }
   0x5   : > { %p222_p3 = scmp.lt.s32.totalorder (!%p191_p2), %s1094_s19, 1 }
   0x6   : > { %194 = sbr.rel (%p191_p2) target bundleno = 378 (0x17a), region = 36 }
   0xb   : > { %v442_v0 = vld [vmem:[%s1791_s3] sm:$0xf]  ;;  %vm540_vm0 = vcmask 1043456   ;;  %s1795_s19 = smov (!%p222_p3, %s1094_s19), 1  ;;  %vm443_vm1 = vcmask 31744  }
   0xc   : > { %1176 = vmatprep.subr.msk.mxu0 %vm540_vm0, %v442_v0  ;;  %1226 = vmatprep.subr.msk.mxu1 %vm540_vm0, %v442_v0  ;;  %s1141_s22 = sshll.u32 %s1795_s19, 8  ;;  %v1291_v1 = vld [vmem:[%s1789_s1] ss:$0 sm:$0xff]  ;;  %s1103_s8 = sshll.u32 %s1795_s19, 1 }
   0xd   : > { %1177 = vmatpush3.msk.msra.mxu0 %vm540_vm0, %v442_v0  ;;  %1227 = vmatpush3.msk.msra.mxu1 %vm540_vm0, %v442_v0  ;;  %s1298_s27 = scalar_lea.vmem %s1788_s0, %s1141_s22  ;;  %v1303_v2 = vld [vmem:[%s1790_s2] ss:$0 sm:$0xff]  ;;  %s1453_s7 = scalar_lea.vmem %s1792_s4, %s1141_s22 }
   0xe   : > { %v236_v3 = vld [vmem:[%s1298_s27] sm:$0xff]  ;;  %v237_v4 = vld [vmem:[%s1298_s27 + $0x8] sm:$0xff]  ;;  %v238_v5 = vld [vmem:[%s1298_s27 + $0x10] sm:$0xff]  ;;  %s235_s11 = scalar_lea.vmem %s1793_s5, %s1103_s8 }
   0xf   : > { %v275_v6 = vmul.f32 %v1291_v1, %v236_v3  ;;  %v276_v7 = vmul.f32 %v1291_v1, %v237_v4  ;;  %v277_v8 = vmul.f32 %v1291_v1, %v238_v5  ;;  %v239_v9 = vld [vmem:[%s1298_s27 + $0x18] sm:$0xff]  ;;  %v240_v10 = vld [vmem:[%s1298_s27 + $0x20] sm:$0xff]  ;;  %v241_v11 = vld [vmem:[%s1298_s27 + $0x28] sm:$0xff] }
  0x10   : > { %v278_v12 = vmul.f32 %v1291_v1, %v239_v9  ;;  %v279_v13 = vmul.f32 %v1291_v1, %v240_v10  ;;  %v280_v14 = vmul.f32 %v1291_v1, %v241_v11  ;;  %v242_v15 = vld [vmem:[%s1298_s27 + $0x30] sm:$0xff]  ;;  %v243_v16 = vld [vmem:[%s1298_s27 + $0x38] sm:$0xff]  ;;  %v244_v25 = vld [vmem:[%s1298_s27 + $0x40] sm:$0xff] }
  0x11   : > { %v314_v17 = vadd.f32 %v1303_v2, %v275_v6  ;;  %v315_v18 = vadd.f32 %v1303_v2, %v276_v7  ;;  %v316_v19 = vadd.f32 %v1303_v2, %v277_v8  ;;  %v281_v20 = vmul.f32 %v1291_v1, %v242_v15  ;;  %v245_v33 = vld [vmem:[%s1298_s27 + $0x48] sm:$0xff]  ;;  %v246_v34 = vld [vmem:[%s1298_s27 + $0x50] sm:$0xff]  ;;  %v247_v35 = vld [vmem:[%s1298_s27 + $0x58] sm:$0xff] }
  0x12   : > { %v317_v21 = vadd.f32 %v1303_v2, %v278_v12  ;;  %v318_v22 = vadd.f32 %v1303_v2, %v279_v13  ;;  %v319_v23 = vadd.f32 %v1303_v2, %v280_v14  ;;  %v282_v24 = vmul.f32 %v1291_v1, %v243_v16  ;;  %v248_v46 = vld [vmem:[%s1298_s27 + $0x60] sm:$0xff]  ;;  %v249_v47 = vld [vmem:[%s1298_s27 + $0x68] sm:$0xff]  ;;  %v250_v59 = vld [vmem:[%s1298_s27 + $0x70] sm:$0xff] }
  0x13   : > { %vm346_vm2 = vcmp.gt.f32.partialorder %v314_v17, 0.0  ;;  %v378_v26 = vmul.f32 0.01, %v314_v17  ;;  %vm347_vm3 = vcmp.gt.f32.partialorder %v315_v18, 0.0  ;;  %v379_v27 = vmul.f32 0.01, %v315_v18 }
  0x14   : > { %vm348_vm4 = vcmp.gt.f32.partialorder %v316_v19, 0.0  ;;  %v380_v28 = vmul.f32 0.01, %v316_v19  ;;  %vm349_vm5 = vcmp.gt.f32.partialorder %v317_v21, 0.0  ;;  %v381_v29 = vmul.f32 0.01, %v317_v21 }
  0x15   : > { %v410_v30 = vsel %vm346_vm2, %v314_v17, %v378_v26  ;;  %v411_v31 = vsel %vm347_vm3, %v315_v18, %v379_v27  ;;  %vm350_vm6 = vcmp.gt.f32.partialorder %v318_v22, 0.0  ;;  %v382_v32 = vmul.f32 0.01, %v318_v22  ;;  %v251_v60 = vld [vmem:[%s1298_s27 + $0x78] sm:$0xff]  ;;  %v252_v4 = vld [vmem:[%s1298_s27 + $0x80] sm:$0xff]  ;;  %v253_v5 = vld [vmem:[%s1298_s27 + $0x88] sm:$0xff] }
  0x16   : > { %1178 = vmatprep.mubr.msk.f32.mxu0 %vm443_vm1, %v410_v30  ;;  %v412_v36 = vsel %vm348_vm4, %v316_v19, %v380_v28  ;;  %v413_v37 = vsel %vm349_vm5, %v317_v21, %v381_v29  ;;  %vm351_vm7 = vcmp.gt.f32.partialorder %v319_v23, 0.0  ;;  %v383_v38 = vmul.f32 0.01, %v319_v23  ;;  %v254_v9 = vld [vmem:[%s1298_s27 + $0x90] sm:$0xff]  ;;  %v255_v10 = vld [vmem:[%s1298_s27 + $0x98] sm:$0xff]  ;;  %v256_v21 = vld [vmem:[%s1298_s27 + $0xa0] sm:$0xff] }
  0x17   : > { %1179 = vmatmul.mubr.msk.f32.vlgmr.msra.gmra.mxu0 %vm443_vm1, %v411_v31  ;;  %v320_v39 = vadd.f32 %v1303_v2, %v281_v20  ;;  %v321_v40 = vadd.f32 %v1303_v2, %v282_v24  ;;  %v283_v41 = vmul.f32 %v1291_v1, %v244_v25  ;;  %v414_v42 = vsel %vm350_vm6, %v318_v22, %v382_v32  ;;  %v257_v22 = vld [vmem:[%s1298_s27 + $0xa8] sm:$0xff] }
  0x18   : > { %1181 = vmatprep.mubr.msk.f32.mxu0 %vm443_vm1, %v412_v36  ;;  %v284_v43 = vmul.f32 %v1291_v1, %v245_v33  ;;  %v285_v44 = vmul.f32 %v1291_v1, %v246_v34  ;;  %v286_v45 = vmul.f32 %v1291_v1, %v247_v35  ;;  %v287_v54 = vmul.f32 %v1291_v1, %v248_v46  ;;  %v258_v34 = vld [vmem:[%s1298_s27 + $0xb0] sm:$0xff]  ;;  %v259_v35 = vld [vmem:[%s1298_s27 + $0xb8] sm:$0xff] }
  0x19   : > { %vm352_vm8 = vcmp.gt.f32.partialorder %v320_v39, 0.0  ;;  %v384_v48 = vmul.f32 0.01, %v320_v39  ;;  %vm353_vm9 = vcmp.gt.f32.partialorder %v321_v40, 0.0  ;;  %v385_v49 = vmul.f32 0.01, %v321_v40 }
  0x1a   : > { %v322_v50 = vadd.f32 %v1303_v2, %v283_v41  ;;  %v323_v51 = vadd.f32 %v1303_v2, %v284_v43  ;;  %v324_v52 = vadd.f32 %v1303_v2, %v285_v44  ;;  %v325_v53 = vadd.f32 %v1303_v2, %v286_v45  ;;  %v260_v44 = vld [vmem:[%s1298_s27 + $0xc0] sm:$0xff] }
  0x1b   : > { %1182 = vmatmul.mubr.msk.f32.gmra.mxu0 %vm443_vm1, %v413_v37  ;;  %v288_v55 = vmul.f32 %v1291_v1, %v249_v47  ;;  %v415_v56 = vsel %vm351_vm7, %v319_v23, %v383_v38  ;;  %v416_v57 = vsel %vm352_vm8, %v320_v39, %v384_v48  ;;  %v417_v58 = vsel %vm353_vm9, %v321_v40, %v385_v49  ;;  %v261_v48 = vld [vmem:[%s1298_s27 + $0xc8] sm:$0xff]  ;;  %v262_v49 = vld [vmem:[%s1298_s27 + $0xd0] sm:$0xff] }
  0x1c   : > { %1184 = vmatprep.mubr.msk.f32.mxu0 %vm443_vm1, %v414_v42  ;;  %vm354_vm10 = vcmp.gt.f32.partialorder %v322_v50, 0.0  ;;  %v386_v61 = vmul.f32 0.01, %v322_v50  ;;  %vm355_vm11 = vcmp.gt.f32.partialorder %v323_v51, 0.0  ;;  %v387_v62 = vmul.f32 0.01, %v323_v51 }
  0x1d   : > { %vm356_vm12 = vcmp.gt.f32.partialorder %v324_v52, 0.0  ;;  %v388_v63 = vmul.f32 0.01, %v324_v52  ;;  %v326_v0 = vadd.f32 %v1303_v2, %v287_v54  ;;  %v327_v3 = vadd.f32 %v1303_v2, %v288_v55 }
  0x1e   : > { %vm357_vm13 = vcmp.gt.f32.partialorder %v325_v53, 0.0  ;;  %v389_v6 = vmul.f32 0.01, %v325_v53  ;;  %v289_v7 = vmul.f32 %v1291_v1, %v250_v59  ;;  %v290_v8 = vmul.f32 %v1291_v1, %v251_v60  ;;  %v263_v60 = vld [vmem:[%s1298_s27 + $0xd8] sm:$0xff] }
  0x1f   : > { %1185 = vmatmul.mubr.msk.f32.gmra.mxu0 %vm443_vm1, %v415_v56  ;;  %vm358_vm14 = vcmp.gt.f32.partialorder %v326_v0, 0.0  ;;  %v390_v11 = vmul.f32 0.01, %v326_v0  ;;  %vm359_vm15 = vcmp.gt.f32.partialorder %v327_v3, 0.0  ;;  %v391_v12 = vmul.f32 0.01, %v327_v3 }
  0x20   : > { %1187 = vmatprep.mubr.msk.f32.mxu0 %vm443_vm1, %v416_v57  ;;  %v418_v13 = vsel %vm354_vm10, %v322_v50, %v386_v61  ;;  %v1365_v14 = vadd.f32 %v1303_v2, %v289_v7  ;;  %v291_v15 = vmul.f32 %v1291_v1, %v252_v4  ;;  %v292_v16 = vmul.f32 %v1291_v1, %v253_v5 }
  0x21   : > { %v419_v17 = vsel %vm355_vm11, %v323_v51, %v387_v62  ;;  %v420_v18 = vsel %vm356_vm12, %v324_v52, %v388_v63  ;;  %v293_v19 = vmul.f32 %v1291_v1, %v254_v9  ;;  %v294_v20 = vmul.f32 %v1291_v1, %v255_v10  ;;  %v264_v63 = vld [vmem:[%s1298_s27 + $0xe0] sm:$0xff] }
  0x22   : > { %v421_v23 = vsel %vm357_vm13, %v325_v53, %v389_v6  ;;  %v422_v24 = vsel %vm358_vm14, %v326_v0, %v390_v11  ;;  %v423_v25 = vsel %vm359_vm15, %v327_v3, %v391_v12  ;;  %v329_v26 = vadd.f32 %v1303_v2, %v290_v8  ;;  %v265_v12 = vld [vmem:[%s1298_s27 + $0xe8] sm:$0xff] }
  0x23   : > { %1188 = vmatmul.mubr.msk.f32.gmra.mxu0 %vm443_vm1, %v417_v58  ;;  %v330_v27 = vadd.f32 %v1303_v2, %v291_v15  ;;  %v331_v28 = vadd.f32 %v1303_v2, %v292_v16  ;;  %v332_v29 = vadd.f32 %v1303_v2, %v293_v19  ;;  %v333_v30 = vadd.f32 %v1303_v2, %v294_v20 }
  0x24   : > { %1190 = vmatprep.mubr.msk.f32.mxu0 %vm443_vm1, %v418_v13  ;;  %vm360_vm0 = vcmp.gt.f32.partialorder %v1365_v14, 0.0  ;;  %v392_v31 = vmul.f32 0.01, %v1365_v14  ;;  %v295_v32 = vmul.f32 %v1291_v1, %v256_v21  ;;  %v296_v33 = vmul.f32 %v1291_v1, %v257_v22  ;;  %v266_v13 = vld [vmem:[%s1298_s27 + $0xf0] sm:$0xff]  ;;  %v267_v22 = vld [vmem:[%s1298_s27 + $0xf8] sm:$0xff] }
  0x25   : > { %vm362_vm2 = vcmp.gt.f32.partialorder %v330_v27, 0.0  ;;  %v394_v36 = vmul.f32 0.01, %v330_v27  ;;  %vm363_vm3 = vcmp.gt.f32.partialorder %v331_v28, 0.0  ;;  %v395_v37 = vmul.f32 0.01, %v331_v28 }
  0x26   : > { %vm364_vm4 = vcmp.gt.f32.partialorder %v332_v29, 0.0  ;;  %v396_v38 = vmul.f32 0.01, %v332_v29  ;;  %vm365_vm5 = vcmp.gt.f32.partialorder %v333_v30, 0.0  ;;  %v397_v39 = vmul.f32 0.01, %v333_v30 }
  0x27   : > { %1191 = vmatmul.mubr.msk.f32.gmra.mxu0 %vm443_vm1, %v419_v17  ;;  %v426_v40 = vsel %vm362_vm2, %v330_v27, %v394_v36  ;;  %v427_v41 = vsel %vm363_vm3, %v331_v28, %v395_v37  ;;  %v334_v42 = vadd.f32 %v1303_v2, %v295_v32  ;;  %v335_v43 = vadd.f32 %v1303_v2, %v296_v33 }
  0x28   : > { %1193 = vmatprep.mubr.msk.f32.mxu0 %vm443_vm1, %v420_v18  ;;  %vm361_vm6 = vcmp.gt.f32.partialorder %v329_v26, 0.0  ;;  %1202 = vmatprep.mubr.msk.f32.mxu1 %vm443_vm1, %v426_v40  ;;  %v428_v45 = vsel %vm364_vm4, %v332_v29, %v396_v38  ;;  %v297_v46 = vmul.f32 %v1291_v1, %v258_v34  ;;  %v298_v47 = vmul.f32 %v1291_v1, %v259_v35 }
  0x29   : > { %v393_v50 = vmul.f32 0.01, %v329_v26  ;;  %1203 = vmatmul.mubr.msk.f32.vlgmr.msra.gmra.mxu1 %vm443_vm1, %v427_v41  ;;  %v429_v51 = vsel %vm365_vm5, %v333_v30, %v397_v39  ;;  %vm366_vm7 = vcmp.gt.f32.partialorder %v334_v42, 0.0  ;;  %v398_v52 = vmul.f32 0.01, %v334_v42 }
  0x2a   : > { %1205 = vmatprep.mubr.msk.f32.mxu1 %vm443_vm1, %v428_v45  ;;  %v399_v53 = vmul.f32 0.01, %v335_v43  ;;  %v336_v54 = vadd.f32 %v1303_v2, %v297_v46  ;;  %v337_v55 = vadd.f32 %v1303_v2, %v298_v47  ;;  %v299_v56 = vmul.f32 %v1291_v1, %v260_v44 }
  0x2b   : > { %1194 = vmatmul.mubr.msk.f32.gmra.mxu0 %vm443_vm1, %v421_v23  ;;  %v430_v57 = vsel %vm366_vm7, %v334_v42, %v398_v52  ;;  %vm367_vm8 = vcmp.gt.f32.partialorder %v335_v43, 0.0  ;;  %v300_v58 = vmul.f32 %v1291_v1, %v261_v48  ;;  %v301_v59 = vmul.f32 %v1291_v1, %v262_v49 }
  0x2c   : > { %1196 = vmatprep.mubr.msk.f32.mxu0 %vm443_vm1, %v422_v24  ;;  %v424_v61 = vsel %vm360_vm0, %v1365_v14, %v392_v31  ;;  %vm368_vm9 = vcmp.gt.f32.partialorder %v336_v54, 0.0  ;;  %v400_v62 = vmul.f32 0.01, %v336_v54  ;;  %v425_v0 = vsel %vm361_vm6, %v329_v26, %v393_v50 }
  0x2d   : > { %1206 = vmatmul.mubr.msk.f32.gmra.mxu1 %vm443_vm1, %v429_v51  ;;  %v401_v3 = vmul.f32 0.01, %v337_v55  ;;  %v338_v4 = vadd.f32 %v1303_v2, %v299_v56  ;;  %v431_v5 = vsel %vm367_vm8, %v335_v43, %v399_v53  ;;  %vm369_vm10 = vcmp.gt.f32.partialorder %v337_v55, 0.0 }
  0x2e   : > { %1208 = vmatprep.mubr.msk.f32.mxu1 %vm443_vm1, %v430_v57  ;;  %v339_v6 = vadd.f32 %v1303_v2, %v300_v58  ;;  %v302_v7 = vmul.f32 %v1291_v1, %v263_v60  ;;  %v432_v8 = vsel %vm368_vm9, %v336_v54, %v400_v62  ;;  %v340_v10 = vadd.f32 %v1303_v2, %v301_v59 }
  0x2f   : > { %1197 = vmatmul.mubr.msk.f32.gmra.mxu0 %vm443_vm1, %v423_v25  ;;  %v402_v9 = vmul.f32 0.01, %v338_v4  ;;  %v303_v11 = vmul.f32 %v1291_v1, %v264_v63  ;;  %vm370_vm11 = vcmp.gt.f32.partialorder %v338_v4, 0.0  ;;  %v433_v14 = vsel %vm369_vm10, %v337_v55, %v401_v3 }
  0x30   : > { %1199 = vmatprep.mubr.msk.f32.mxu0 %vm443_vm1, %v424_v61  ;;  %vm371_vm12 = vcmp.gt.f32.partialorder %v339_v6, 0.0  ;;  %v403_v15 = vmul.f32 0.01, %v339_v6  ;;  %v341_v16 = vadd.f32 %v1303_v2, %v302_v7  ;;  %v304_v17 = vmul.f32 %v1291_v1, %v265_v12 }
  0x31   : > { %1209 = vmatmul.mubr.msk.f32.gmra.mxu1 %vm443_vm1, %v431_v5  ;;  %v434_v18 = vsel %vm370_vm11, %v338_v4, %v402_v9  ;;  %v404_v19 = vmul.f32 0.01, %v340_v10  ;;  %v342_v20 = vadd.f32 %v1303_v2, %v303_v11  ;;  %v305_v21 = vmul.f32 %v1291_v1, %v266_v13 }
  0x32   : > { %1211 = vmatprep.mubr.msk.f32.mxu1 %vm443_vm1, %v432_v8  ;;  %vm372_vm13 = vcmp.gt.f32.partialorder %v340_v10, 0.0  ;;  %v435_v23 = vsel %vm371_vm12, %v339_v6, %v403_v15  ;;  %v405_v24 = vmul.f32 0.01, %v341_v16  ;;  %v343_v25 = vadd.f32 %v1303_v2, %v304_v17 }
  0x33   : > { %1200 = vmatmul.mubr.msk.f32.gmra.mxu0 %vm443_vm1, %v425_v0  ;;  %v306_v26 = vmul.f32 %v1291_v1, %v267_v22  ;;  %v436_v27 = vsel %vm372_vm13, %v340_v10, %v404_v19  ;;  %vm373_vm14 = vcmp.gt.f32.partialorder %v341_v16, 0.0  ;;  %v406_v28 = vmul.f32 0.01, %v342_v20 }
  0x34   : > { %v344_v29 = vadd.f32 %v1303_v2, %v305_v21  ;;  %vm374_vm15 = vcmp.gt.f32.partialorder %v342_v20, 0.0  ;;  %v437_v30 = vsel %vm373_vm14, %v341_v16, %v405_v24  ;;  %v407_v31 = vmul.f32 0.01, %v343_v25 }
  0x35   : > { %1212 = vmatmul.mubr.msk.f32.gmra.mxu1 %vm443_vm1, %v433_v14  ;;  %v345_v32 = vadd.f32 %v1303_v2, %v306_v26  ;;  %v438_v33 = vsel %vm374_vm15, %v342_v20, %v406_v28  ;;  %vm375_vm0 = vcmp.gt.f32.partialorder %v343_v25, 0.0  ;;  %vm1004_vm4 = vcmask 1040384  }
  0x36   : > { %1214 = vmatprep.mubr.msk.f32.mxu1 %vm443_vm1, %v434_v18  ;;  %v408_v34 = vmul.f32 0.01, %v344_v29  ;;  %vm376_vm2 = vcmp.gt.f32.partialorder %v344_v29, 0.0  ;;  %v439_v1 = vsel %vm375_vm0, %v343_v25, %v407_v31  ;;  %vm1006_vm5 = vcmask 25600  }
  0x37   : > { %v409_v35 = vmul.f32 0.01, %v345_v32  ;;  %vm377_vm3 = vcmp.gt.f32.partialorder %v345_v32, 0.0 }
  0x38   : > { %v440_v36 = vsel %vm376_vm2, %v344_v29, %v408_v34 }
  0x39   : > { %1215 = vmatmul.mubr.msk.f32.gmra.mxu1 %vm443_vm1, %v435_v23  ;;  %v441_v37 = vsel %vm377_vm3, %v345_v32, %v409_v35 }
  0x3a   : > { %1217 = vmatprep.mubr.msk.f32.mxu1 %vm443_vm1, %v436_v27 }
  0x3d   : > { %1218 = vmatmul.mubr.msk.f32.gmra.mxu1 %vm443_vm1, %v437_v30 }
  0x3e   : > { %1220 = vmatprep.mubr.msk.f32.mxu1 %vm443_vm1, %v438_v33 }
  0x41   : > { %1221 = vmatmul.mubr.msk.f32.gmra.mxu1 %vm443_vm1, %v439_v1 }
  0x42   : > { %1223 = vmatprep.mubr.msk.f32.mxu1 %vm443_vm1, %v440_v36 }
  0x45   : > { %1224 = vmatmul.mubr.msk.f32.gmra.mxu1 %vm443_vm1, %v441_v37 }
  0xd7   : > { %v1455_v2 = vpop.f32.mrf.mxu0 }
  0xd8   : > { %770 = vst.msk [vmem:[%s1453_s7 + $0x8] sm:$0xff] %vm443_vm1, %v1455_v2  ;;  %v802_v41 = vsel %vm443_vm1, %v1455_v2, 0.0 }
  0xd9   : > { %v1460_v38 = vpop.f32.mrf.mxu0 }
  0xda   : > { %769 = vst.msk [vmem:[%s1453_s7] sm:$0xff] %vm443_vm1, %v1460_v38  ;;  %v801_v39 = vsel %vm443_vm1, %v1460_v38, 0.0 }
  0xdb   : > { %v1467_v40 = vpop.f32.mrf.mxu0  ;;  %v803_v42 = vadd.f32 %v802_v41, %v801_v39 }
  0xdc   : > { %772 = vst.msk [vmem:[%s1453_s7 + $0x18] sm:$0xff] %vm443_vm1, %v1467_v40  ;;  %v806_v47 = vsel %vm443_vm1, %v1467_v40, 0.0 }
  0xdd   : > { %v1474_v43 = vpop.f32.mrf.mxu0 }
  0xde   : > { %771 = vst.msk [vmem:[%s1453_s7 + $0x10] sm:$0xff] %vm443_vm1, %v1474_v43  ;;  %v804_v44 = vsel %vm443_vm1, %v1474_v43, 0.0 }
  0xdf   : > { %v805_v45 = vadd.f32 %v804_v44, %v803_v42  ;;  %v1481_v46 = vpop.f32.mrf.mxu0 }
  0xe0   : > { %774 = vst.msk [vmem:[%s1453_s7 + $0x28] sm:$0xff] %vm443_vm1, %v1481_v46  ;;  %v810_v53 = vsel %vm443_vm1, %v1481_v46, 0.0 }
  0xe1   : > { %v1488_v48 = vpop.f32.mrf.mxu0  ;;  %v807_v49 = vadd.f32 %v806_v47, %v805_v45 }
  0xe2   : > { %773 = vst.msk [vmem:[%s1453_s7 + $0x20] sm:$0xff] %vm443_vm1, %v1488_v48  ;;  %v808_v50 = vsel %vm443_vm1, %v1488_v48, 0.0 }
  0xe3   : > { %v809_v51 = vadd.f32 %v808_v50, %v807_v49  ;;  %v1495_v52 = vpop.f32.mrf.mxu0 }
  0xe4   : > { %776 = vst.msk [vmem:[%s1453_s7 + $0x38] sm:$0xff] %vm443_vm1, %v1495_v52  ;;  %v814_v59 = vsel %vm443_vm1, %v1495_v52, 0.0 }
  0xe5   : > { %v1502_v54 = vpop.f32.mrf.mxu0  ;;  %v811_v55 = vadd.f32 %v810_v53, %v809_v51 }
  0xe6   : > { %775 = vst.msk [vmem:[%s1453_s7 + $0x30] sm:$0xff] %vm443_vm1, %v1502_v54  ;;  %v812_v56 = vsel %vm443_vm1, %v1502_v54, 0.0 }
  0xe7   : > { %v813_v57 = vadd.f32 %v812_v56, %v811_v55  ;;  %v1509_v58 = vpop.f32.mrf.mxu0 }
  0xe8   : > { %778 = vst.msk [vmem:[%s1453_s7 + $0x48] sm:$0xff] %vm443_vm1, %v1509_v58  ;;  %v818_v4 = vsel %vm443_vm1, %v1509_v58, 0.0 }
  0xe9   : > { %v1516_v60 = vpop.f32.mrf.mxu0  ;;  %v815_v61 = vadd.f32 %v814_v59, %v813_v57  ;;  %v1523_v63 = vpop.f32.mrf.mxu1 }
  0xea   : > { %777 = vst.msk [vmem:[%s1453_s7 + $0x40] sm:$0xff] %vm443_vm1, %v1516_v60  ;;  %v816_v62 = vsel %vm443_vm1, %v1516_v60, 0.0  ;;  %786 = vst.msk [vmem:[%s1453_s7 + $0x88] sm:$0xff] %vm443_vm1, %v1523_v63  ;;  %v834_v33 = vsel %vm443_vm1, %v1523_v63, 0.0 }
  0xeb   : > { %v817_v0 = vadd.f32 %v816_v62, %v815_v61  ;;  %v1525_v3 = vpop.f32.mrf.mxu0  ;;  %v1535_v5 = vpop.f32.mrf.mxu1 }
  0xec   : > { %780 = vst.msk [vmem:[%s1453_s7 + $0x58] sm:$0xff] %vm443_vm1, %v1525_v3  ;;  %785 = vst.msk [vmem:[%s1453_s7 + $0x80] sm:$0xff] %vm443_vm1, %v1535_v5  ;;  %v822_v12 = vsel %vm443_vm1, %v1525_v3, 0.0  ;;  %v832_v30 = vsel %vm443_vm1, %v1535_v5, 0.0 }
  0xed   : > { %v1537_v6 = vpop.f32.mrf.mxu0  ;;  %v819_v7 = vadd.f32 %v818_v4, %v817_v0  ;;  %v1547_v9 = vpop.f32.mrf.mxu1 }
  0xee   : > { %779 = vst.msk [vmem:[%s1453_s7 + $0x50] sm:$0xff] %vm443_vm1, %v1537_v6  ;;  %v820_v8 = vsel %vm443_vm1, %v1537_v6, 0.0  ;;  %788 = vst.msk [vmem:[%s1453_s7 + $0x98] sm:$0xff] %vm443_vm1, %v1547_v9  ;;  %v838_v39 = vsel %vm443_vm1, %v1547_v9, 0.0 }
  0xef   : > { %v821_v10 = vadd.f32 %v820_v8, %v819_v7  ;;  %v1549_v11 = vpop.f32.mrf.mxu0  ;;  %v1559_v13 = vpop.f32.mrf.mxu1 }
  0xf0   : > { %782 = vst.msk [vmem:[%s1453_s7 + $0x68] sm:$0xff] %vm443_vm1, %v1549_v11  ;;  %787 = vst.msk [vmem:[%s1453_s7 + $0x90] sm:$0xff] %vm443_vm1, %v1559_v13  ;;  %v826_v20 = vsel %vm443_vm1, %v1549_v11, 0.0  ;;  %v836_v35 = vsel %vm443_vm1, %v1559_v13, 0.0 }
  0xf1   : > { %v1561_v14 = vpop.f32.mrf.mxu0  ;;  %v823_v15 = vadd.f32 %v822_v12, %v821_v10  ;;  %v1571_v17 = vpop.f32.mrf.mxu1 }
  0xf2   : > { %781 = vst.msk [vmem:[%s1453_s7 + $0x60] sm:$0xff] %vm443_vm1, %v1561_v14  ;;  %v824_v16 = vsel %vm443_vm1, %v1561_v14, 0.0  ;;  %790 = vst.msk [vmem:[%s1453_s7 + $0xa8] sm:$0xff] %vm443_vm1, %v1571_v17  ;;  %v842_v49 = vsel %vm443_vm1, %v1571_v17, 0.0 }
  0xf3   : > { %v825_v18 = vadd.f32 %v824_v16, %v823_v15  ;;  %v1573_v19 = vpop.f32.mrf.mxu0  ;;  %v1583_v21 = vpop.f32.mrf.mxu1 }
  0xf4   : > { %784 = vst.msk [vmem:[%s1453_s7 + $0x78] sm:$0xff] %vm443_vm1, %v1573_v19  ;;  %789 = vst.msk [vmem:[%s1453_s7 + $0xa0] sm:$0xff] %vm443_vm1, %v1583_v21  ;;  %v830_v27 = vsel %vm443_vm1, %v1573_v19, 0.0  ;;  %v840_v44 = vsel %vm443_vm1, %v1583_v21, 0.0 }
  0xf5   : > { %v1585_v22 = vpop.f32.mrf.mxu0  ;;  %v827_v23 = vadd.f32 %v826_v20, %v825_v18  ;;  %v1595_v25 = vpop.f32.mrf.mxu1 }
  0xf6   : > { %783 = vst.msk [vmem:[%s1453_s7 + $0x70] sm:$0xff] %vm443_vm1, %v1585_v22  ;;  %v828_v24 = vsel %vm443_vm1, %v1585_v22, 0.0  ;;  %792 = vst.msk [vmem:[%s1453_s7 + $0xb8] sm:$0xff] %vm443_vm1, %v1595_v25  ;;  %v846_v57 = vsel %vm443_vm1, %v1595_v25, 0.0 }
  0xf7   : > { %v829_v26 = vadd.f32 %v828_v24, %v827_v23  ;;  %v1602_v28 = vpop.f32.mrf.mxu1 }
  0xf8   : > { %791 = vst.msk [vmem:[%s1453_s7 + $0xb0] sm:$0xff] %vm443_vm1, %v1602_v28  ;;  %v844_v53 = vsel %vm443_vm1, %v1602_v28, 0.0 }
  0xf9   : > { %v831_v29 = vadd.f32 %v830_v27, %v829_v26  ;;  %v1609_v31 = vpop.f32.mrf.mxu1 }
  0xfa   : > { %794 = vst.msk [vmem:[%s1453_s7 + $0xc8] sm:$0xff] %vm443_vm1, %v1609_v31  ;;  %v850_v4 = vsel %vm443_vm1, %v1609_v31, 0.0 }
  0xfb   : > { %v833_v32 = vadd.f32 %v832_v30, %v831_v29  ;;  %v1616_v34 = vpop.f32.mrf.mxu1 }
  0xfc   : > { %793 = vst.msk [vmem:[%s1453_s7 + $0xc0] sm:$0xff] %vm443_vm1, %v1616_v34  ;;  %v848_v62 = vsel %vm443_vm1, %v1616_v34, 0.0 }
  0xfd   : > { %v835_v1 = vadd.f32 %v834_v33, %v833_v32  ;;  %v1623_v36 = vpop.f32.mrf.mxu1 }
  0xfe   : > { %796 = vst.msk [vmem:[%s1453_s7 + $0xd8] sm:$0xff] %vm443_vm1, %v1623_v36  ;;  %v854_v12 = vsel %vm443_vm1, %v1623_v36, 0.0 }
  0xff   : > { %v837_v37 = vadd.f32 %v836_v35, %v835_v1  ;;  %v1630_v41 = vpop.f32.mrf.mxu1 }
 0x100   : > { %795 = vst.msk [vmem:[%s1453_s7 + $0xd0] sm:$0xff] %vm443_vm1, %v1630_v41  ;;  %v852_v8 = vsel %vm443_vm1, %v1630_v41, 0.0 }
 0x101   : > { %v839_v42 = vadd.f32 %v838_v39, %v837_v37  ;;  %v1637_v45 = vpop.f32.mrf.mxu1 }
 0x102   : > { %798 = vst.msk [vmem:[%s1453_s7 + $0xe8] sm:$0xff] %vm443_vm1, %v1637_v45  ;;  %v858_v20 = vsel %vm443_vm1, %v1637_v45, 0.0 }
 0x103   : > { %v841_v47 = vadd.f32 %v840_v44, %v839_v42  ;;  %v1644_v50 = vpop.f32.mrf.mxu1 }
 0x104   : > { %797 = vst.msk [vmem:[%s1453_s7 + $0xe0] sm:$0xff] %vm443_vm1, %v1644_v50  ;;  %v856_v16 = vsel %vm443_vm1, %v1644_v50, 0.0 }
 0x105   : > { %v843_v51 = vadd.f32 %v842_v49, %v841_v47  ;;  %v1651_v55 = vpop.f32.mrf.mxu1 }
 0x106   : > { %800 = vst.msk [vmem:[%s1453_s7 + $0xf8] sm:$0xff] %vm443_vm1, %v1651_v55  ;;  %v862_v27 = vsel %vm443_vm1, %v1651_v55, 0.0 }
 0x107   : > { %v845_v56 = vadd.f32 %v844_v53, %v843_v51  ;;  %v1658_v59 = vpop.f32.mrf.mxu1 }
 0x108   : > { %799 = vst.msk [vmem:[%s1453_s7 + $0xf0] sm:$0xff] %vm443_vm1, %v1658_v59  ;;  %v860_v24 = vsel %vm443_vm1, %v1658_v59, 0.0 }
 0x109   : > { %v847_v61 = vadd.f32 %v846_v57, %v845_v56 }
 0x10b   : > { %v849_v0 = vadd.f32 %v848_v62, %v847_v61 }
 0x10d   : > { %v851_v7 = vadd.f32 %v850_v4, %v849_v0 }
 0x10f   : > { %v853_v10 = vadd.f32 %v852_v8, %v851_v7 }
 0x111   : > { %v855_v15 = vadd.f32 %v854_v12, %v853_v10 }
 0x113   : > { %v857_v18 = vadd.f32 %v856_v16, %v855_v15 }
 0x115   : > { %v859_v23 = vadd.f32 %v858_v20, %v857_v18 }
 0x117   : > { %v861_v26 = vadd.f32 %v860_v24, %v859_v23 }
 0x119   : > { %v863_v29 = vadd.f32 %v862_v27, %v861_v26 }
 0x11b   : > { %v864_v30 = vrot.slane %v863_v29, 4 }
 0x11d   : > { %v865_v32 = vadd.f32 %v864_v30, %v863_v29 }
 0x11f   : > { %v866_v33 = vrot.slane %v865_v32, 2 }
 0x121   : > { %v867_v1 = vadd.f32 %v866_v33, %v865_v32 }
 0x123   : > { %v868_v35 = vrot.slane %v867_v1, 1 }
 0x125   : > { %v1679_v37 = vadd.f32 %v868_v35, %v867_v1 }
 0x127   : > { %v1682_v39 = vmul.f32 0.00390625, %v1679_v37 }
 0x129   : > { %v871_v42 = vsub.f32 %v1460_v38, %v1682_v39  ;;  %v872_v44 = vsub.f32 %v1455_v2, %v1682_v39  ;;  %v873_v47 = vsub.f32 %v1474_v43, %v1682_v39  ;;  %v874_v49 = vsub.f32 %v1467_v40, %v1682_v39 }
 0x12a   : > { %v875_v56 = vsub.f32 %v1488_v48, %v1682_v39  ;;  %v876_v61 = vsub.f32 %v1481_v46, %v1682_v39  ;;  %v877_v43 = vsub.f32 %v1502_v54, %v1682_v39  ;;  %v878_v48 = vsub.f32 %v1495_v52, %v1682_v39 }
 0x12b   : > { %v903_v51 = vmul.f32 %v871_v42, %v871_v42  ;;  %v904_v53 = vmul.f32 %v872_v44, %v872_v44  ;;  %v905_v57 = vmul.f32 %v873_v47, %v873_v47  ;;  %v906_v62 = vmul.f32 %v874_v49, %v874_v49 }
 0x12c   : > { %v907_v4 = vmul.f32 %v875_v56, %v875_v56  ;;  %v908_v8 = vmul.f32 %v876_v61, %v876_v61  ;;  %v879_v12 = vsub.f32 %v1516_v60, %v1682_v39  ;;  %v909_v15 = vmul.f32 %v877_v43, %v877_v43 }
 0x12d   : > { %v935_v38 = vsel %vm443_vm1, %v903_v51, 0.0  ;;  %v936_v2 = vsel %vm443_vm1, %v904_v53, 0.0  ;;  %v938_v40 = vsel %vm443_vm1, %v905_v57, 0.0  ;;  %v940_v10 = vsel %vm443_vm1, %v906_v62, 0.0 }
 0x12e   : > { %v937_v0 = vadd.f32 %v936_v2, %v935_v38  ;;  %v942_v16 = vsel %vm443_vm1, %v907_v4, 0.0  ;;  %v880_v54 = vsub.f32 %v1509_v58, %v1682_v39  ;;  %v910_v20 = vmul.f32 %v878_v48, %v878_v48 }
 0x12f   : > { %v944_v23 = vsel %vm443_vm1, %v908_v8, 0.0  ;;  %v881_v52 = vsub.f32 %v1537_v6, %v1682_v39  ;;  %v911_v26 = vmul.f32 %v879_v12, %v879_v12  ;;  %v946_v27 = vsel %vm443_vm1, %v909_v15, 0.0 }
 0x130   : > { %v939_v7 = vadd.f32 %v938_v40, %v937_v0  ;;  %v882_v60 = vsub.f32 %v1525_v3, %v1682_v39  ;;  %v912_v30 = vmul.f32 %v880_v54, %v880_v54  ;;  %v948_v32 = vsel %vm443_vm1, %v910_v20, 0.0 }
 0x131   : > { %v883_v58 = vsub.f32 %v1561_v14, %v1682_v39  ;;  %v913_v1 = vmul.f32 %v881_v52, %v881_v52  ;;  %v950_v35 = vsel %vm443_vm1, %v911_v26, 0.0  ;;  %v884_v6 = vsub.f32 %v1549_v11, %v1682_v39 }
 0x132   : > { %v941_v46 = vadd.f32 %v940_v10, %v939_v7  ;;  %v914_v44 = vmul.f32 %v882_v60, %v882_v60  ;;  %v952_v47 = vsel %vm443_vm1, %v912_v30, 0.0  ;;  %v885_v3 = vsub.f32 %v1585_v22, %v1682_v39 }
 0x133   : > { %v915_v51 = vmul.f32 %v883_v58, %v883_v58  ;;  %v954_v53 = vsel %vm443_vm1, %v913_v1, 0.0  ;;  %v886_v14 = vsub.f32 %v1573_v19, %v1682_v39  ;;  %v916_v57 = vmul.f32 %v884_v6, %v884_v6 }
 0x134   : > { %v943_v18 = vadd.f32 %v942_v16, %v941_v46  ;;  %v956_v61 = vsel %vm443_vm1, %v914_v44, 0.0  ;;  %v887_v11 = vsub.f32 %v1535_v5, %v1682_v39  ;;  %v917_v38 = vmul.f32 %v885_v3, %v885_v3 }
 0x135   : > { %v958_v2 = vsel %vm443_vm1, %v915_v51, 0.0  ;;  %v888_v22 = vsub.f32 %v1523_v63, %v1682_v39  ;;  %v918_v43 = vmul.f32 %v886_v14, %v886_v14  ;;  %v960_v4 = vsel %vm443_vm1, %v916_v57, 0.0 }
 0x136   : > { %v945_v24 = vadd.f32 %v944_v23, %v943_v18  ;;  %v889_v19 = vsub.f32 %v1559_v13, %v1682_v39  ;;  %v919_v7 = vmul.f32 %v887_v11, %v887_v11  ;;  %v962_v48 = vsel %vm443_vm1, %v917_v38, 0.0 }
 0x137   : > { %v890_v5 = vsub.f32 %v1547_v9, %v1682_v39  ;;  %v920_v10 = vmul.f32 %v888_v22, %v888_v22  ;;  %v964_v46 = vsel %vm443_vm1, %v918_v43, 0.0  ;;  %v891_v63 = vsub.f32 %v1583_v21, %v1682_v39 }
 0x138   : > { %v947_v29 = vadd.f32 %v946_v27, %v945_v24  ;;  %v921_v15 = vmul.f32 %v889_v19, %v889_v19  ;;  %v966_v16 = vsel %vm443_vm1, %v919_v7, 0.0  ;;  %v892_v13 = vsub.f32 %v1571_v17, %v1682_v39 }
 0x139   : > { %v922_v54 = vmul.f32 %v890_v5, %v890_v5  ;;  %v968_v20 = vsel %vm443_vm1, %v920_v10, 0.0  ;;  %v893_v9 = vsub.f32 %v1602_v28, %v1682_v39  ;;  %v923_v24 = vmul.f32 %v891_v63, %v891_v63 }
 0x13a   : > { %v949_v33 = vadd.f32 %v948_v32, %v947_v29  ;;  %v970_v52 = vsel %vm443_vm1, %v921_v15, 0.0  ;;  %v894_v21 = vsub.f32 %v1595_v25, %v1682_v39  ;;  %v924_v27 = vmul.f32 %v892_v13, %v892_v13 }
 0x13b   : > { %v972_v29 = vsel %vm443_vm1, %v922_v54, 0.0  ;;  %v895_v17 = vsub.f32 %v1616_v34, %v1682_v39  ;;  %v925_v30 = vmul.f32 %v893_v9, %v893_v9  ;;  %v974_v32 = vsel %vm443_vm1, %v923_v24, 0.0 }
 0x13c   : > { %v951_v42 = vadd.f32 %v950_v35, %v949_v33  ;;  %v896_v28 = vsub.f32 %v1609_v31, %v1682_v39  ;;  %v926_v58 = vmul.f32 %v894_v21, %v894_v21  ;;  %v976_v1 = vsel %vm443_vm1, %v924_v27, 0.0 }
 0x13d   : > { %v897_v25 = vsub.f32 %v1630_v41, %v1682_v39  ;;  %v978_v6 = vsel %vm443_vm1, %v925_v30, 0.0  ;;  %v898_v34 = vsub.f32 %v1623_v36, %v1682_v39  ;;  %v899_v31 = vsub.f32 %v1644_v50, %v1682_v39 }
 0x13e   : > { %v953_v49 = vadd.f32 %v952_v47, %v951_v42  ;;  %v927_v42 = vmul.f32 %v895_v17, %v895_v17  ;;  %v928_v47 = vmul.f32 %v896_v28, %v896_v28  ;;  %v900_v41 = vsub.f32 %v1637_v45, %v1682_v39 }
 0x13f   : > { %v929_v51 = vmul.f32 %v897_v25, %v897_v25  ;;  %v930_v14 = vmul.f32 %v898_v34, %v898_v34  ;;  %v901_v36 = vsub.f32 %v1658_v59, %v1682_v39  ;;  %v902_v50 = vsub.f32 %v1651_v55, %v1682_v39 }
 0x140   : > { %v955_v56 = vadd.f32 %v954_v53, %v953_v49  ;;  %v980_v49 = vsel %vm443_vm1, %v926_v58, 0.0  ;;  %v982_v53 = vsel %vm443_vm1, %v927_v42, 0.0  ;;  %v984_v57 = vsel %vm443_vm1, %v928_v47, 0.0 }
 0x141   : > { %v986_v11 = vsel %vm443_vm1, %v929_v51, 0.0  ;;  %v933_v45 = vmul.f32 %v901_v36, %v901_v36 }
 0x142   : > { %v957_v62 = vadd.f32 %v956_v61, %v955_v56 }
 0x143   : > { %v994_v7 = vsel %vm443_vm1, %v933_v45, 0.0 }
 0x144   : > { %v959_v0 = vadd.f32 %v958_v2, %v957_v62  ;;  %v931_v62 = vmul.f32 %v899_v31, %v899_v31  ;;  %v932_v2 = vmul.f32 %v900_v41, %v900_v41 }
 0x146   : > { %v961_v40 = vadd.f32 %v960_v4, %v959_v0  ;;  %v988_v0 = vsel %vm443_vm1, %v930_v14, 0.0  ;;  %v990_v43 = vsel %vm443_vm1, %v931_v62, 0.0  ;;  %v992_v19 = vsel %vm443_vm1, %v932_v2, 0.0 }
 0x148   : > { %v963_v8 = vadd.f32 %v962_v48, %v961_v40  ;;  %v934_v40 = vmul.f32 %v902_v50, %v902_v50 }
 0x14a   : > { %v965_v12 = vadd.f32 %v964_v46, %v963_v8  ;;  %v996_v8 = vsel %vm443_vm1, %v934_v40, 0.0 }
 0x14c   : > { %v967_v18 = vadd.f32 %v966_v16, %v965_v12 }
 0x14e   : > { %v969_v23 = vadd.f32 %v968_v20, %v967_v18 }
 0x150   : > { %v971_v26 = vadd.f32 %v970_v52, %v969_v23 }
 0x152   : > { %v973_v60 = vadd.f32 %v972_v29, %v971_v26 }
 0x154   : > { %v975_v33 = vadd.f32 %v974_v32, %v973_v60 }
 0x156   : > { %v977_v35 = vadd.f32 %v976_v1, %v975_v33 }
 0x158   : > { %v979_v44 = vadd.f32 %v978_v6, %v977_v35 }
 0x15a   : > { %v981_v3 = vadd.f32 %v980_v49, %v979_v44 }
 0x15c   : > { %v983_v56 = vadd.f32 %v982_v53, %v981_v3 }
 0x15e   : > { %v985_v61 = vadd.f32 %v984_v57, %v983_v56 }
 0x160   : > { %v987_v38 = vadd.f32 %v986_v11, %v985_v61 }
 0x162   : > { %v989_v22 = vadd.f32 %v988_v0, %v987_v38 }
 0x164   : > { %v991_v4 = vadd.f32 %v990_v43, %v989_v22 }
 0x166   : > { %v993_v59 = vadd.f32 %v992_v19, %v991_v4 }
 0x168   : > { %v995_v48 = vadd.f32 %v994_v7, %v993_v59 }
 0x16a   : > { %v997_v5 = vadd.f32 %v996_v8, %v995_v48 }
 0x16c   : > { %v998_v55 = vrot.slane %v997_v5, 4 }
 0x16e   : > { %v999_v39 = vadd.f32 %v998_v55, %v997_v5 }
 0x170   : > { %v1000_v10 = vrot.slane %v999_v39, 2 }
 0x172   : > { %v1001_v46 = vadd.f32 %v1000_v10, %v999_v39 }
 0x174   : > { %v1002_v12 = vrot.slane %v1001_v46, 1 }
 0x176   : > { %v1003_v63 = vadd.f32 %v1002_v12, %v1001_v46 }
 0x178   : > { %v1005_v15 = vsel %vm1004_vm4, %v1679_v37, %v1003_v63 }
 0x179   : > { %1007 = vst.msk [vmem:[%s235_s11] sm:$0x3] %vm1006_vm5, %v1005_v15 }
 0x17a PF: > { %s16_s18 = sadd.s32 1, %s1242_s18  }
 0x17b   : > { %p13_p4 = scmp.ge.s32.totalorder %s16_s18, 4  }
 0x17d   :  { %15 = sbr.rel (!%p13_p4) target bundleno = 1 (0x1), region = 78 }

// kernel: res_block_oord.2
= control target key start
LH: loop header
LB: loop body
LE: loop exit
PB: predicated region body
PF: predicated region fallthrough
CT: control target
= control target key end

     0   :  { %s5523_s12 = smov 0   ;;  %s7637_s0 = inlined_call_operand.vmem [shape: f32[2,16,16,4], index: 0, kind: input, shape index: {}]   ;;  %s7638_s1 = inlined_call_operand.vmem [shape: f32[9,4,4], index: 1, kind: input, shape index: {}]   ;;  %s7639_s2 = inlined_call_operand.vmem [shape: f32[2,256,4], index: 2, kind: output, shape index: {0}]   ;;  %s7640_s3 = inlined_call_operand.vmem [shape: f32[2,1,2,4], index: 3, kind: output, shape index: {1}]  }
   0x1 LB: > { %s4417_s13 = sadd.s32 4294967295, %s5500_s12   ;;  %p4421_p0 = scmp.ge.s32.totalorder %s5500_s12, 1  ;;  %s5500_s12 = sphi %s5523_s12, %s14_s12  }
   0x2   : > { %p140_p1 = scmp.lt.s32.totalorder %s5500_s12, 3 }
   0x4   : > { %p141_p2 = pnand %p4421_p0, %p140_p1 }
   0x6   : > { %144 = sbr.rel (%p141_p2) target bundleno = 619 (0x26b), region = 28 }
   0xb   : > { %v4427_v0 = vld [vmem:[%s7638_s1 + $0x4] sm:$0xf]  ;;  %vm810_vm0 = vcmask 1043456   ;;  %vm536_vm1 = vcmask 31744   ;;  %p5534_p3 = scmp.lt.s32.totalorder %s4417_s13, 1  ;;  %v5502_v1 = vmov 0.0  }
   0xc   : > { %5483 = vmatprep.subr.msk.mxu1 %vm810_vm0, %v4427_v0  ;;  %5033 = vmatprep.subr.msk.mxu0 %vm810_vm0, %v4427_v0  ;;  %574 = vst.msk [vmem:[#allocation2 + $0x120] sm:$0xff] %vm536_vm1, %v5502_v1  ;;  %537 = vst.msk [vmem:[#allocation2] sm:$0xff] %vm536_vm1, %v5502_v1  ;;  %v5555_v2 = vld [vmem:[%s7638_s1] sm:$0xf]  ;;  %v4494_v3 = vld [vmem:[%s7638_s1 + $0x8] sm:$0xf] }
   0xd   : > { %538 = vst.msk [vmem:[#allocation2 + $0x8] sm:$0xff] %vm536_vm1, %v5502_v1  ;;  %571 = vst.msk [vmem:[#allocation2 + $0x110] sm:$0xff] %vm536_vm1, %v5502_v1  ;;  %5484 = vmatpush3.msk.msra.mxu1 %vm810_vm0, %v4427_v0  ;;  %5034 = vmatpush3.msk.msra.mxu0 %vm810_vm0, %v4427_v0  ;;  %s7828_s13 = smov (!%p5534_p3, %s4417_s13), 1  ;;  %vm439_vm2 = vcmask 1046528   ;;  %v5583_v9 = vld [vmem:[%s7638_s1 + $0x10] sm:$0xf] }
   0xe   : > { %572 = vst.msk [vmem:[#allocation2 + $0x118] sm:$0xff] %vm536_vm1, %v5502_v1  ;;  %575 = vst.msk [vmem:[#allocation2 + $0x128] sm:$0xff] %vm536_vm1, %v5502_v1  ;;  %5083 = vmatprep.subr.msk.mxu1 %vm810_vm0, %v5555_v2  ;;  %5133 = vmatprep.subr.msk.mxu0 %vm810_vm0, %v4494_v3  ;;  %s4734_s21 = sshll.u32 %s7828_s13, 8  ;;  %v5646_v48 = vld [vmem:[%s7638_s1 + $0xc] sm:$0xf]  ;;  %s4426_s15 = sshll.u32 %s7828_s13, 1 }
   0xf   : > { %608 = vst.msk [vmem:[#allocation2 + $0x230] sm:$0xff] %vm536_vm1, %v5502_v1  ;;  %609 = vst.msk [vmem:[#allocation2 + $0x238] sm:$0xff] %vm536_vm1, %v5502_v1  ;;  %s5575_s24 = scalar_lea.vmem %s7637_s0, %s4734_s21  ;;  %s7217_s14 = scalar_lea.vmem %s7639_s2, %s4734_s21 }
  0x10   : > { %611 = vst.msk [vmem:[#allocation2 + $0x240] sm:$0xff] %vm536_vm1, %v5502_v1  ;;  %612 = vst.msk [vmem:[#allocation2 + $0x248] sm:$0xff] %vm536_vm1, %v5502_v1  ;;  %v196_v4 = vld [vmem:[%s5575_s24 + $0x70] sm:$0xff]  ;;  %v197_v5 = vld [vmem:[%s5575_s24 + $0x78] sm:$0xff]  ;;  %s181_s18 = scalar_lea.vmem %s7640_s3, %s4426_s15 }
  0x11   : > { %645 = vst.msk [vmem:[#allocation2 + $0x350] sm:$0xff] %vm536_vm1, %v5502_v1  ;;  %646 = vst.msk [vmem:[#allocation2 + $0x358] sm:$0xff] %vm536_vm1, %v5502_v1  ;;  %v182_v6 = vld [vmem:[%s5575_s24] sm:$0xff]  ;;  %vm228_vm3 = vcmp.gt.f32.partialorder %v196_v4, 0.0  ;;  %v260_v7 = vmul.f32 0.01, %v196_v4 }
  0x12   : > { %vm229_vm4 = vcmp.gt.f32.partialorder %v197_v5, 0.0  ;;  %v261_v8 = vmul.f32 0.01, %v197_v5  ;;  %vm214_vm5 = vcmp.gt.f32.partialorder %v182_v6, 0.0  ;;  %v246_v12 = vmul.f32 0.01, %v182_v6 }
  0x13   : > { %v680_v10 = vld [vmem:[#allocation2 + $0x120] sm:$0xff]  ;;  %v5587_v14 = vsel %vm228_vm3, %v196_v4, %v260_v7  ;;  %v183_v17 = vld [vmem:[%s5575_s24 + $0x8] sm:$0xff]  ;;  %v184_v23 = vld [vmem:[%s5575_s24 + $0x10] sm:$0xff] }
  0x14   : > { %v198_v13 = vld [vmem:[%s5575_s24 + $0x80] sm:$0xff]  ;;  %5035 = vmatprep.mubr.msk.f32.mxu0 %vm536_vm1, %v680_v10  ;;  %v5589_v15 = vsel %vm229_vm4, %v197_v5, %v261_v8  ;;  %v199_v18 = vld [vmem:[%s5575_s24 + $0x88] sm:$0xff]  ;;  %v461_v20 = vrot.slane %v5587_v14, 1  ;;  %590 = vst.msk [vmem:[#allocation2 + $0x1a0] sm:$0xff] %vm536_vm1, %v5587_v14  ;;  %v200_v24 = vld [vmem:[%s5575_s24 + $0x90] sm:$0xff]  ;;  %v5606_v25 = vsel %vm214_vm5, %v182_v6, %v246_v12  ;;  %vm215_vm7 = vcmp.gt.f32.partialorder %v183_v17, 0.0 }
  0x15   : > { %v681_v11 = vld [vmem:[#allocation2 + $0x128] sm:$0xff]  ;;  %vm230_vm6 = vcmp.gt.f32.partialorder %v198_v13, 0.0  ;;  %v262_v16 = vmul.f32 0.01, %v198_v13  ;;  %v7641_v22 = vrot.slane %v5589_v15, 1  ;;  %591 = vst.msk [vmem:[#allocation2 + $0x1a8] sm:$0xff] %vm536_vm1, %v5589_v15 }
  0x16   : > { %5036 = vmatmul.mubr.msk.f32.vlgmr.msra.gmra.mxu0 %vm536_vm1, %v681_v11  ;;  %v247_v27 = vmul.f32 0.01, %v183_v17  ;;  %v440_v28 = vrot.slane %v5606_v25, 1  ;;  %576 = vst.msk [vmem:[#allocation2 + $0x130] sm:$0xff] %vm536_vm1, %v5606_v25  ;;  %vm231_vm8 = vcmp.gt.f32.partialorder %v199_v18, 0.0  ;;  %v185_v31 = vld [vmem:[%s5575_s24 + $0x18] sm:$0xff] }
  0x17   : > { %5134 = vmatpush3.msk.msra.mxu0 %vm810_vm0, %v4494_v3  ;;  %v5608_v26 = vsel %vm230_vm6, %v198_v13, %v262_v16  ;;  %v263_v30 = vmul.f32 0.01, %v199_v18  ;;  %vm216_vm9 = vcmp.gt.f32.partialorder %v184_v23, 0.0  ;;  %v248_v33 = vmul.f32 0.01, %v184_v23  ;;  %v201_v34 = vld [vmem:[%s5575_s24 + $0x98] sm:$0xff] }
  0x18   : > { %592 = vst.msk [vmem:[#allocation2 + $0x1b0] sm:$0xff] %vm536_vm1, %v5608_v26  ;;  %5233 = vmatprep.subr.msk.mxu0 %vm810_vm0, %v5583_v9  ;;  %v5619_v32 = vsel %vm215_vm7, %v183_v17, %v247_v27  ;;  %vm232_vm10 = vcmp.gt.f32.partialorder %v200_v24, 0.0  ;;  %v264_v38 = vmul.f32 0.01, %v200_v24  ;;  %v186_v39 = vld [vmem:[%s5575_s24 + $0x20] sm:$0xff]  ;;  %vm217_vm11 = vcmp.gt.f32.partialorder %v185_v31, 0.0 }
  0x19   : > { %v344_v35 = vrot.slane %v5619_v32, 7  ;;  %v441_v36 = vrot.slane %v5619_v32, 1  ;;  %577 = vst.msk [vmem:[#allocation2 + $0x138] sm:$0xff] %vm536_vm1, %v5619_v32  ;;  %v5626_v37 = vsel %vm231_vm8, %v199_v18, %v263_v30  ;;  %v5633_v42 = vsel %vm216_vm9, %v184_v23, %v248_v33  ;;  %v202_v43 = vld [vmem:[%s5575_s24 + $0xa0] sm:$0xff]  ;;  %v187_v47 = vld [vmem:[%s5575_s24 + $0x28] sm:$0xff]  ;;  %v188_v63 = vld [vmem:[%s5575_s24 + $0x30] sm:$0xff] }
  0x1a   : > { %593 = vst.msk [vmem:[#allocation2 + $0x1b8] sm:$0xff] %vm536_vm1, %v5626_v37  ;;  %v443_v44 = vrot.slane %v5633_v42, 1  ;;  %578 = vst.msk [vmem:[#allocation2 + $0x140] sm:$0xff] %vm536_vm1, %v5633_v42  ;;  %v5640_v45 = vsel %vm232_vm10, %v200_v24, %v264_v38  ;;  %v249_v46 = vmul.f32 0.01, %v185_v31  ;;  %vm233_vm12 = vcmp.gt.f32.partialorder %v201_v34, 0.0 }
  0x1b   : > { %v696_v49 = vld [vmem:[#allocation2 + $0x1a0] sm:$0xff]  ;;  %594 = vst.msk [vmem:[#allocation2 + $0x1c0] sm:$0xff] %vm536_vm1, %v5640_v45  ;;  %v265_v52 = vmul.f32 0.01, %v201_v34  ;;  %vm218_vm13 = vcmp.gt.f32.partialorder %v186_v39, 0.0  ;;  %v442_v53 = vsel %vm439_vm2, %v440_v28, %v441_v36  ;;  %vm234_vm14 = vcmp.gt.f32.partialorder %v202_v43, 0.0 }
  0x1c   : > { %v697_v50 = vld [vmem:[#allocation2 + $0x1a8] sm:$0xff]  ;;  %5059 = vmatprep.mubr.msk.f32.mxu1 %vm536_vm1, %v696_v49  ;;  %v5656_v54 = vsel %vm217_vm11, %v185_v31, %v249_v46  ;;  %v250_v55 = vmul.f32 0.01, %v186_v39  ;;  %v266_v56 = vmul.f32 0.01, %v202_v43  ;;  %613 = vst.msk [vmem:[#allocation2 + $0x250] sm:$0xff] %vm536_vm1, %v442_v53 }
  0x1d   : > { %v203_v57 = vld [vmem:[%s5575_s24 + $0xa8] sm:$0xff]  ;;  %5060 = vmatmul.mubr.msk.f32.vlgmr.msra.gmra.mxu1 %vm536_vm1, %v697_v50  ;;  %v5661_v58 = vld [vmem:[#allocation2 + $0x130] sm:$0xff]  ;;  %v347_v60 = vrot.slane %v5656_v54, 7  ;;  %v444_v61 = vrot.slane %v5656_v54, 1  ;;  %579 = vst.msk [vmem:[#allocation2 + $0x148] sm:$0xff] %vm536_vm1, %v5656_v54  ;;  %v5668_v62 = vsel %vm233_vm12, %v201_v34, %v265_v52  ;;  %vm219_vm15 = vcmp.gt.f32.partialorder %v187_v47, 0.0 }
  0x1e   : > { %5084 = vmatpush3.msk.msra.mxu1 %vm810_vm0, %v5555_v2  ;;  %5038 = vmatprep.mubr.msk.f32.mxu0 %vm536_vm1, %v5661_v58  ;;  %595 = vst.msk [vmem:[#allocation2 + $0x1c8] sm:$0xff] %vm536_vm1, %v5668_v62  ;;  %v5680_v3 = vsel %vm218_vm13, %v186_v39, %v250_v55  ;;  %v5683_v4 = vsel %vm234_vm14, %v202_v43, %v266_v56  ;;  %v204_v5 = vld [vmem:[%s5575_s24 + $0xb0] sm:$0xff]  ;;  %v189_v6 = vld [vmem:[%s5575_s24 + $0x38] sm:$0xff]  ;;  %v251_v10 = vmul.f32 0.01, %v187_v47  ;;  %vm235_vm3 = vcmp.gt.f32.partialorder %v203_v57, 0.0 }
  0x1f   : > { %v698_v59 = vld [vmem:[#allocation2 + $0x1b0] sm:$0xff]  ;;  %v446_v7 = vrot.slane %v5680_v3, 1  ;;  %580 = vst.msk [vmem:[#allocation2 + $0x150] sm:$0xff] %vm536_vm1, %v5680_v3  ;;  %596 = vst.msk [vmem:[#allocation2 + $0x1d0] sm:$0xff] %vm536_vm1, %v5683_v4  ;;  %v205_v11 = vld [vmem:[%s5575_s24 + $0xb8] sm:$0xff]  ;;  %5183 = vmatprep.subr.msk.mxu1 %vm810_vm0, %v5646_v48  ;;  %vm220_vm4 = vcmp.gt.f32.partialorder %v188_v63, 0.0  ;;  %v445_v17 = vsel %vm439_vm2, %v443_v44, %v444_v61 }
  0x20   : > { %5062 = vmatprep.mubr.msk.f32.mxu1 %vm536_vm1, %v698_v59  ;;  %v5688_v2 = vld [vmem:[#allocation2 + $0x138] sm:$0xff]  ;;  %v267_v13 = vmul.f32 0.01, %v203_v57  ;;  %v252_v16 = vmul.f32 0.01, %v188_v63  ;;  %v5708_v23 = vsel %vm219_vm15, %v187_v47, %v251_v10  ;;  %vm236_vm5 = vcmp.gt.f32.partialorder %v204_v5, 0.0 }
  0x21   : > { %5039 = vmatmul.mubr.msk.f32.gmra.mxu0 %vm536_vm1, %v5688_v2  ;;  %v699_v12 = vld [vmem:[#allocation2 + $0x1b8] sm:$0xff]  ;;  %v5705_v18 = vld [vmem:[#allocation2 + $0x140] sm:$0xff]  ;;  %v268_v24 = vmul.f32 0.01, %v204_v5  ;;  %vm221_vm6 = vcmp.gt.f32.partialorder %v189_v6, 0.0  ;;  %615 = vst.msk [vmem:[#allocation2 + $0x260] sm:$0xff] %vm536_vm1, %v445_v17 }
  0x22   : > { %5063 = vmatmul.mubr.msk.f32.gmra.mxu1 %vm536_vm1, %v699_v12  ;;  %v190_v27 = vld [vmem:[%s5575_s24 + $0x40] sm:$0xff]  ;;  %5041 = vmatprep.mubr.msk.f32.mxu0 %vm536_vm1, %v5705_v18  ;;  %v350_v30 = vrot.slane %v5708_v23, 7  ;;  %v447_v31 = vrot.slane %v5708_v23, 1  ;;  %581 = vst.msk [vmem:[#allocation2 + $0x158] sm:$0xff] %vm536_vm1, %v5708_v23  ;;  %v5719_v33 = vsel %vm235_vm3, %v203_v57, %v267_v13  ;;  %v5722_v34 = vsel %vm220_vm4, %v188_v63, %v252_v16  ;;  %v191_v47 = vld [vmem:[%s5575_s24 + $0x48] sm:$0xff]  ;;  %v192_v17 = vld [vmem:[%s5575_s24 + $0x50] sm:$0xff] }
  0x23   : > { %v700_v28 = vld [vmem:[#allocation2 + $0x1c0] sm:$0xff]  ;;  %597 = vst.msk [vmem:[#allocation2 + $0x1d8] sm:$0xff] %vm536_vm1, %v5719_v33  ;;  %v449_v44 = vrot.slane %v5722_v34, 1  ;;  %582 = vst.msk [vmem:[#allocation2 + $0x160] sm:$0xff] %vm536_vm1, %v5722_v34  ;;  %v5734_v46 = vsel %vm236_vm5, %v204_v5, %v268_v24  ;;  %v207_v49 = vld [vmem:[%s5575_s24 + $0xc8] sm:$0xff]  ;;  %vm237_vm7 = vcmp.gt.f32.partialorder %v205_v11, 0.0 }
  0x24   : > { %v206_v38 = vld [vmem:[%s5575_s24 + $0xc0] sm:$0xff]  ;;  %5065 = vmatprep.mubr.msk.f32.mxu1 %vm536_vm1, %v700_v28  ;;  %v5738_v50 = vld [vmem:[#allocation2 + $0x148] sm:$0xff]  ;;  %598 = vst.msk [vmem:[#allocation2 + $0x1e0] sm:$0xff] %vm536_vm1, %v5734_v46  ;;  %v253_v53 = vmul.f32 0.01, %v189_v6  ;;  %vm222_vm8 = vcmp.gt.f32.partialorder %v190_v27, 0.0  ;;  %v448_v59 = vsel %vm439_vm2, %v446_v7, %v447_v31 }
  0x25   : > { %5042 = vmatmul.mubr.msk.f32.gmra.mxu0 %vm536_vm1, %v5738_v50  ;;  %v701_v55 = vld [vmem:[#allocation2 + $0x1c8] sm:$0xff]  ;;  %v269_v56 = vmul.f32 0.01, %v205_v11  ;;  %v254_v57 = vmul.f32 0.01, %v190_v27  ;;  %vm238_vm9 = vcmp.gt.f32.partialorder %v206_v38, 0.0 }
  0x26   : > { %5066 = vmatmul.mubr.msk.f32.gmra.mxu1 %vm536_vm1, %v701_v55  ;;  %v5749_v63 = vld [vmem:[#allocation2 + $0x150] sm:$0xff]  ;;  %v5752_v10 = vsel %vm221_vm6, %v189_v6, %v253_v53  ;;  %v270_v12 = vmul.f32 0.01, %v206_v38  ;;  %vm223_vm10 = vcmp.gt.f32.partialorder %v191_v47, 0.0  ;;  %vm239_vm11 = vcmp.gt.f32.partialorder %v207_v49, 0.0  ;;  %617 = vst.msk [vmem:[#allocation2 + $0x270] sm:$0xff] %vm536_vm1, %v448_v59 }
  0x27   : > { %v702_v5 = vld [vmem:[#allocation2 + $0x1d0] sm:$0xff]  ;;  %5044 = vmatprep.mubr.msk.f32.mxu0 %vm536_vm1, %v5749_v63  ;;  %v450_v13 = vrot.slane %v5752_v10, 1  ;;  %583 = vst.msk [vmem:[#allocation2 + $0x168] sm:$0xff] %vm536_vm1, %v5752_v10  ;;  %v5763_v6 = vsel %vm237_vm7, %v205_v11, %v269_v56  ;;  %v5766_v16 = vsel %vm222_vm8, %v190_v27, %v254_v57  ;;  %v193_v56 = vld [vmem:[%s5575_s24 + $0x58] sm:$0xff]  ;;  %v271_v28 = vmul.f32 0.01, %v207_v49 }
  0x28   : > { %5068 = vmatprep.mubr.msk.f32.mxu1 %vm536_vm1, %v702_v5  ;;  %v208_v24 = vld [vmem:[%s5575_s24 + $0xd0] sm:$0xff]  ;;  %599 = vst.msk [vmem:[#allocation2 + $0x1e8] sm:$0xff] %vm536_vm1, %v5763_v6  ;;  %584 = vst.msk [vmem:[#allocation2 + $0x170] sm:$0xff] %vm536_vm1, %v5766_v16  ;;  %v5778_v11 = vsel %vm238_vm9, %v206_v38, %v270_v12  ;;  %v209_v27 = vld [vmem:[%s5575_s24 + $0xd8] sm:$0xff]  ;;  %v255_v5 = vmul.f32 0.01, %v191_v47 }
  0x29   : > { %v5782_v57 = vld [vmem:[#allocation2 + $0x158] sm:$0xff]  ;;  %600 = vst.msk [vmem:[#allocation2 + $0x1f0] sm:$0xff] %vm536_vm1, %v5778_v11  ;;  %v451_v52 = vsel %vm439_vm2, %v449_v44, %v450_v13  ;;  %vm224_vm12 = vcmp.gt.f32.partialorder %v192_v17, 0.0  ;;  %v256_v53 = vmul.f32 0.01, %v192_v17  ;;  %vm240_vm13 = vcmp.gt.f32.partialorder %v208_v24, 0.0 }
  0x2a   : > { %5045 = vmatmul.mubr.msk.f32.gmra.mxu0 %vm536_vm1, %v5782_v57  ;;  %v5792_v38 = vld [vmem:[#allocation2 + $0x1d8] sm:$0xff]  ;;  %v5794_v12 = vld [vmem:[#allocation2 + $0x160] sm:$0xff]  ;;  %vm342_vm14 = vcmask 1040384   ;;  %619 = vst.msk [vmem:[#allocation2 + $0x280] sm:$0xff] %vm536_vm1, %v451_v52  ;;  %v463_v44 = vsel %vm439_vm2, %v461_v20, %v7641_v22  ;;  %v5809_v39 = vsel %vm223_vm10, %v191_v47, %v255_v5  ;;  %v5812_v52 = vsel %vm239_vm11, %v207_v49, %v271_v28  ;;  %v195_v5 = vld [vmem:[%s5575_s24 + $0x68] sm:$0xff] }
  0x2b   : > { %5069 = vmatmul.mubr.msk.f32.gmra.mxu1 %vm536_vm1, %v5792_v38  ;;  %5047 = vmatprep.mubr.msk.f32.mxu0 %vm536_vm1, %v5794_v12  ;;  %v5806_v59 = vld [vmem:[#allocation2 + $0x1e0] sm:$0xff]  ;;  %v272_v0 = vmul.f32 0.01, %v208_v24  ;;  %vm225_vm15 = vcmp.gt.f32.partialorder %v193_v56, 0.0  ;;  %627 = vst.msk [vmem:[#allocation2 + $0x2c0] sm:$0xff] %vm536_vm1, %v463_v44  ;;  %v453_v43 = vrot.slane %v5809_v39, 1  ;;  %v5829_v44 = vsel %vm224_vm12, %v192_v17, %v256_v53 }
  0x2c   : > { %v194_v20 = vld [vmem:[%s5575_s24 + $0x60] sm:$0xff]  ;;  %5071 = vmatprep.mubr.msk.f32.mxu1 %vm536_vm1, %v5806_v59  ;;  %585 = vst.msk [vmem:[#allocation2 + $0x178] sm:$0xff] %vm536_vm1, %v5809_v39  ;;  %601 = vst.msk [vmem:[#allocation2 + $0x1f8] sm:$0xff] %vm536_vm1, %v5812_v52  ;;  %v257_v51 = vmul.f32 0.01, %v193_v56  ;;  %vm241_vm3 = vcmp.gt.f32.partialorder %v209_v27, 0.0 }
  0x2d   : > { %v210_v28 = vld [vmem:[%s5575_s24 + $0xe0] sm:$0xff]  ;;  %v5832_v40 = vsel %vm240_vm13, %v208_v24, %v272_v0  ;;  %v211_v1 = vld [vmem:[%s5575_s24 + $0xe8] sm:$0xff]  ;;  %586 = vst.msk [vmem:[#allocation2 + $0x180] sm:$0xff] %vm536_vm1, %v5829_v44  ;;  %v273_v17 = vmul.f32 0.01, %v209_v27  ;;  %vm226_vm4 = vcmp.gt.f32.partialorder %v194_v20, 0.0 }
  0x2e   : > { %v5835_v29 = vld [vmem:[#allocation2 + $0x168] sm:$0xff]  ;;  %602 = vst.msk [vmem:[#allocation2 + $0x200] sm:$0xff] %vm536_vm1, %v5832_v40  ;;  %v5850_v53 = vsel %vm225_vm15, %v193_v56, %v257_v51  ;;  %v258_v41 = vmul.f32 0.01, %v194_v20  ;;  %vm242_vm5 = vcmp.gt.f32.partialorder %v210_v28, 0.0  ;;  %vm227_vm6 = vcmp.gt.f32.partialorder %v195_v5, 0.0 }
  0x2f   : > { %5048 = vmatmul.mubr.msk.f32.gmra.mxu0 %vm536_vm1, %v5835_v29  ;;  %v5845_v0 = vld [vmem:[#allocation2 + $0x1e8] sm:$0xff]  ;;  %v5847_v24 = vld [vmem:[#allocation2 + $0x170] sm:$0xff]  ;;  %587 = vst.msk [vmem:[#allocation2 + $0x188] sm:$0xff] %vm536_vm1, %v5850_v53  ;;  %v5863_v51 = vsel %vm241_vm3, %v209_v27, %v273_v17  ;;  %v274_v56 = vmul.f32 0.01, %v210_v28  ;;  %vm243_vm7 = vcmp.gt.f32.partialorder %v211_v1, 0.0 }
  0x30   : > { %5072 = vmatmul.mubr.msk.f32.gmra.mxu1 %vm536_vm1, %v5845_v0  ;;  %5050 = vmatprep.mubr.msk.f32.mxu0 %vm536_vm1, %v5847_v24  ;;  %v5856_v49 = vld [vmem:[#allocation2 + $0x1f0] sm:$0xff]  ;;  %603 = vst.msk [vmem:[#allocation2 + $0x208] sm:$0xff] %vm536_vm1, %v5863_v51  ;;  %v5872_v22 = vsel %vm226_vm4, %v194_v20, %v258_v41  ;;  %v259_v21 = vmul.f32 0.01, %v195_v5  ;;  %v275_v17 = vmul.f32 0.01, %v211_v1 }
  0x31   : > { %5074 = vmatprep.mubr.msk.f32.mxu1 %vm536_vm1, %v5856_v49  ;;  %588 = vst.msk [vmem:[#allocation2 + $0x190] sm:$0xff] %vm536_vm1, %v5872_v22  ;;  %v5878_v27 = vsel %vm242_vm5, %v210_v28, %v274_v56  ;;  %v343_v20 = vrot.slane %v5606_v25, 7  ;;  %v520_v28 = vsel %vm439_vm2, %v441_v36, 0.0  ;;  %v346_v25 = vrot.slane %v5633_v42, 7 }
  0x32   : > { %604 = vst.msk [vmem:[#allocation2 + $0x210] sm:$0xff] %vm536_vm1, %v5878_v27  ;;  %v5888_v41 = vsel %vm227_vm6, %v195_v5, %v259_v21  ;;  %v5902_v21 = vsel %vm243_vm7, %v211_v1, %v275_v17  ;;  %614 = vst.msk [vmem:[#allocation2 + $0x258] sm:$0xff] %vm536_vm1, %v520_v28  ;;  %v521_v32 = vsel %vm439_vm2, %v444_v61, 0.0  ;;  %v522_v28 = vsel %vm439_vm2, %v447_v31, 0.0 }
  0x33   : > { %v5880_v19 = vld [vmem:[#allocation2 + $0x178] sm:$0xff]  ;;  %v459_v7 = vrot.slane %v5888_v41, 1  ;;  %589 = vst.msk [vmem:[#allocation2 + $0x198] sm:$0xff] %vm536_vm1, %v5888_v41  ;;  %v386_v8 = vrot.slane %v5902_v21, 7  ;;  %v483_v55 = vrot.slane %v5902_v21, 1  ;;  %605 = vst.msk [vmem:[#allocation2 + $0x218] sm:$0xff] %vm536_vm1, %v5902_v21  ;;  %v345_v1 = vsel %vm342_vm14, %v343_v20, %v344_v35 }
  0x34   : > { %v5882_v47 = vld [vmem:[#allocation2 + $0x1f8] sm:$0xff]  ;;  %5051 = vmatmul.mubr.msk.f32.gmra.mxu0 %vm536_vm1, %v5880_v19  ;;  %v5906_v36 = vld [vmem:[#allocation2 + $0x180] sm:$0xff]  ;;  %v423_v56 = vsel %vm342_vm14, 0.0, %v343_v20  ;;  %540 = vst.msk [vmem:[#allocation2 + $0x18] sm:$0xff] %vm536_vm1, %v345_v1  ;;  %v424_v42 = vsel %vm342_vm14, 0.0, %v346_v25  ;;  %v348_v17 = vsel %vm342_vm14, %v346_v25, %v347_v60  ;;  %v349_v35 = vrot.slane %v5680_v3, 7 }
  0x35   : > { %5075 = vmatmul.mubr.msk.f32.gmra.mxu1 %vm536_vm1, %v5882_v47  ;;  %v5908_v5 = vld [vmem:[#allocation2 + $0x200] sm:$0xff]  ;;  %5053 = vmatprep.mubr.msk.f32.mxu0 %vm536_vm1, %v5906_v36  ;;  %539 = vst.msk [vmem:[#allocation2 + $0x10] sm:$0xff] %vm536_vm1, %v423_v56  ;;  %541 = vst.msk [vmem:[#allocation2 + $0x20] sm:$0xff] %vm536_vm1, %v424_v42  ;;  %v352_v60 = vrot.slane %v5722_v34, 7  ;;  %v523_v54 = vsel %vm439_vm2, %v450_v13, 0.0  ;;  %v355_v61 = vrot.slane %v5766_v16, 7 }
  0x36   : > { %5077 = vmatprep.mubr.msk.f32.mxu1 %vm536_vm1, %v5908_v5  ;;  %v5932_v20 = vld [vmem:[#allocation2 + $0x188] sm:$0xff]  ;;  %542 = vst.msk [vmem:[#allocation2 + $0x28] sm:$0xff] %vm536_vm1, %v348_v17  ;;  %616 = vst.msk [vmem:[#allocation2 + $0x268] sm:$0xff] %vm536_vm1, %v521_v32  ;;  %v425_v56 = vsel %vm342_vm14, 0.0, %v349_v35  ;;  %v351_v25 = vsel %vm342_vm14, %v349_v35, %v350_v30  ;;  %v7665_v31 = vrot.slane %v5766_v16, 1  ;;  %v524_v13 = vsel %vm439_vm2, %v453_v43, 0.0 }
  0x37   : > { %v5947_v3 = vld [vmem:[#allocation2 + $0x208] sm:$0xff]  ;;  %618 = vst.msk [vmem:[#allocation2 + $0x278] sm:$0xff] %vm536_vm1, %v522_v28  ;;  %620 = vst.msk [vmem:[#allocation2 + $0x288] sm:$0xff] %vm536_vm1, %v523_v54  ;;  %v426_v30 = vsel %vm342_vm14, 0.0, %v352_v60  ;;  %v7666_v1 = vrot.slane %v5752_v10, 7  ;;  %v427_v42 = vsel %vm342_vm14, 0.0, %v355_v61 }
  0x38   : > { %5054 = vmatmul.mubr.msk.f32.gmra.mxu0 %vm536_vm1, %v5932_v20  ;;  %v454_v34 = vsel %vm439_vm2, %v7665_v31, %v453_v43  ;;  %v5965_v23 = vld [vmem:[#allocation2 + $0x190] sm:$0xff]  ;;  %543 = vst.msk [vmem:[#allocation2 + $0x30] sm:$0xff] %vm536_vm1, %v425_v56  ;;  %544 = vst.msk [vmem:[#allocation2 + $0x38] sm:$0xff] %vm536_vm1, %v351_v25  ;;  %v7667_v43 = vrot.slane %v5809_v39, 7  ;;  %v1363_v35 = vld [vmem:[#allocation2 + $0x240] sm:$0xff]  ;;  %v358_v39 = vrot.slane %v5829_v44, 7 }
  0x39   : > { %5078 = vmatmul.mubr.msk.f32.gmra.mxu1 %vm536_vm1, %v5947_v3  ;;  %v354_v16 = vsel %vm342_vm14, %v352_v60, %v7666_v1  ;;  %621 = vst.msk [vmem:[#allocation2 + $0x290] sm:$0xff] %vm536_vm1, %v454_v34  ;;  %622 = vst.msk [vmem:[#allocation2 + $0x298] sm:$0xff] %vm536_vm1, %v524_v13  ;;  %5056 = vmatprep.mubr.msk.f32.mxu0 %vm536_vm1, %v5965_v23  ;;  %v5981_v32 = vld [vmem:[#allocation2 + $0x210] sm:$0xff]  ;;  %v7668_v10 = vrot.slane %v5850_v53, 1  ;;  %v7669_v28 = vrot.slane %v5829_v44, 1  ;;  %v361_v56 = vrot.slane %v5872_v22, 7 }
  0x3a   : > { %v357_v17 = vsel %vm342_vm14, %v355_v61, %v7667_v43  ;;  %545 = vst.msk [vmem:[#allocation2 + $0x40] sm:$0xff] %vm536_vm1, %v426_v30  ;;  %546 = vst.msk [vmem:[#allocation2 + $0x48] sm:$0xff] %vm536_vm1, %v354_v16  ;;  %5080 = vmatprep.mubr.msk.f32.mxu1 %vm536_vm1, %v5981_v32  ;;  %v5999_v25 = vld [vmem:[#allocation2 + $0x198] sm:$0xff]  ;;  %v647_v31 = vld [vmem:[#allocation2] sm:$0xff]  ;;  %v7671_v44 = vrot.slane %v5872_v22, 1  ;;  %v526_v13 = vsel %vm439_vm2, %v459_v7, 0.0 }
  0x3b   : > { %547 = vst.msk [vmem:[#allocation2 + $0x50] sm:$0xff] %vm536_vm1, %v427_v42  ;;  %548 = vst.msk [vmem:[#allocation2 + $0x58] sm:$0xff] %vm536_vm1, %v357_v17  ;;  %v457_v60 = vsel %vm439_vm2, %v7669_v28, %v7668_v10  ;;  %v7670_v54 = vmov %v7668_v10  ;;  %v7672_v30 = vrot.slane %v5587_v14, 7  ;;  %v7673_v16 = vrot.slane %v5589_v15, 7  ;;  %v6021_v22 = vld [vmem:[#allocation2 + $0x218] sm:$0xff] }
  0x3c   : > { %v525_v61 = vsel %vm439_vm2, %v7670_v54, 0.0  ;;  %623 = vst.msk [vmem:[#allocation2 + $0x2a0] sm:$0xff] %vm536_vm1, %v457_v60  ;;  %v460_v34 = vsel %vm439_vm2, %v7671_v44, %v459_v7  ;;  %5057 = vmatmul.mubr.msk.f32.gmra.mxu0 %vm536_vm1, %v5999_v25  ;;  %v428_v17 = vsel %vm342_vm14, 0.0, %v358_v39  ;;  %v7675_v10 = vrot.slane %v5850_v53, 7  ;;  %626 = vst.msk [vmem:[#allocation2 + $0x2b8] sm:$0xff] %vm536_vm1, %v526_v13  ;;  %v1364_v53 = vld [vmem:[#allocation2 + $0x248] sm:$0xff] }
  0x3d   : > { %624 = vst.msk [vmem:[#allocation2 + $0x2a8] sm:$0xff] %vm536_vm1, %v525_v61  ;;  %v430_v1 = vsel %vm342_vm14, 0.0, %v7672_v30  ;;  %v7674_v42 = vmov %v7672_v30  ;;  %v429_v28 = vsel %vm342_vm14, 0.0, %v361_v56  ;;  %625 = vst.msk [vmem:[#allocation2 + $0x2b0] sm:$0xff] %vm536_vm1, %v460_v34  ;;  %v7676_v60 = vrot.slane %v5888_v41, 7  ;;  %5081 = vmatmul.mubr.msk.f32.gmra.mxu1 %vm536_vm1, %v6021_v22  ;;  %5135 = vmatprep.mubr.msk.f32.mxu0 %vm536_vm1, %v1363_v35  ;;  %v648_v13 = vld [vmem:[#allocation2 + $0x8] sm:$0xff] }
  0x3e   : > { %v366_v43 = vsel %vm342_vm14, %v7674_v42, %v7673_v16  ;;  %v360_v7 = vsel %vm342_vm14, %v358_v39, %v7675_v10  ;;  %553 = vst.msk [vmem:[#allocation2 + $0x80] sm:$0xff] %vm536_vm1, %v430_v1  ;;  %549 = vst.msk [vmem:[#allocation2 + $0x60] sm:$0xff] %vm536_vm1, %v428_v17  ;;  %v7677_v41 = vrot.slane %v5589_v15, 1  ;;  %v367_v54 = vrot.slane %v5608_v26, 7  ;;  %5085 = vmatprep.mubr.msk.f32.mxu1 %vm536_vm1, %v647_v31 }
  0x3f   : > { %v363_v14 = vsel %vm342_vm14, %v361_v56, %v7676_v60  ;;  %554 = vst.msk [vmem:[#allocation2 + $0x88] sm:$0xff] %vm536_vm1, %v366_v43  ;;  %550 = vst.msk [vmem:[#allocation2 + $0x68] sm:$0xff] %vm536_vm1, %v360_v7  ;;  %v7678_v61 = vrot.slane %v5626_v37, 1  ;;  %v7679_v56 = vrot.slane %v5608_v26, 1  ;;  %v370_v15 = vrot.slane %v5640_v45, 7  ;;  %v6068_v43 = vld [vmem:[#allocation2 + $0x10] sm:$0xff] }
  0x40   : > { %551 = vst.msk [vmem:[#allocation2 + $0x70] sm:$0xff] %vm536_vm1, %v429_v28  ;;  %552 = vst.msk [vmem:[#allocation2 + $0x78] sm:$0xff] %vm536_vm1, %v363_v14  ;;  %v527_v39 = vsel %vm439_vm2, %v7677_v41, 0.0  ;;  %v7681_v30 = vrot.slane %v5668_v62, 1  ;;  %v7682_v26 = vrot.slane %v5640_v45, 1  ;;  %v373_v31 = vrot.slane %v5683_v4, 7  ;;  %5136 = vmatmul.mubr.msk.f32.vlgmr.msra.gmra.mxu0 %vm536_vm1, %v1364_v53 }
  0x41   : > { %v466_v35 = vsel %vm439_vm2, %v7679_v56, %v7678_v61  ;;  %v7680_v44 = vmov %v7678_v61  ;;  %628 = vst.msk [vmem:[#allocation2 + $0x2c8] sm:$0xff] %vm536_vm1, %v527_v39  ;;  %v431_v17 = vsel %vm342_vm14, 0.0, %v367_v54  ;;  %v7684_v10 = vrot.slane %v5626_v37, 7  ;;  %v6085_v39 = vld [vmem:[#allocation2 + $0x250] sm:$0xff]  ;;  %5086 = vmatmul.mubr.msk.f32.vlgmr.msra.gmra.mxu1 %vm536_vm1, %v648_v13  ;;  %5234 = vmatpush3.msk.msra.mxu0 %vm810_vm0, %v5583_v9 }
  0x42   : > { %v528_v34 = vsel %vm439_vm2, %v7680_v44, 0.0  ;;  %629 = vst.msk [vmem:[#allocation2 + $0x2d0] sm:$0xff] %vm536_vm1, %v466_v35  ;;  %v469_v1 = vsel %vm439_vm2, %v7682_v26, %v7681_v30  ;;  %v7683_v16 = vmov %v7681_v30  ;;  %v7685_v45 = vrot.slane %v5719_v33, 1  ;;  %555 = vst.msk [vmem:[#allocation2 + $0x90] sm:$0xff] %vm536_vm1, %v431_v17  ;;  %v6102_v35 = vld [vmem:[%s7638_s1 + $0x14] sm:$0xf]  ;;  %5184 = vmatpush3.msk.msra.mxu1 %vm810_vm0, %v5646_v48  ;;  %5088 = vmatprep.mubr.msk.f32.mxu1 %vm536_vm1, %v6068_v43 }
  0x43   : > { %630 = vst.msk [vmem:[#allocation2 + $0x2d8] sm:$0xff] %vm536_vm1, %v528_v34  ;;  %v529_v42 = vsel %vm439_vm2, %v7683_v16, 0.0  ;;  %v369_v7 = vsel %vm342_vm14, %v367_v54, %v7684_v10  ;;  %631 = vst.msk [vmem:[#allocation2 + $0x2e0] sm:$0xff] %vm536_vm1, %v469_v1  ;;  %v7686_v28 = vrot.slane %v5683_v4, 1  ;;  %v432_v37 = vsel %vm342_vm14, 0.0, %v370_v15  ;;  %v6134_v1 = vld [vmem:[#allocation2 + $0x260] sm:$0xff]  ;;  %5138 = vmatprep.mubr.msk.f32.mxu0 %vm536_vm1, %v6085_v39  ;;  %5283 = vmatprep.subr.msk.mxu1 %vm810_vm0, %v6102_v35 }
  0x44   : > { %632 = vst.msk [vmem:[#allocation2 + $0x2e8] sm:$0xff] %vm536_vm1, %v529_v42  ;;  %v7687_v14 = vmov %v7685_v45  ;;  %556 = vst.msk [vmem:[#allocation2 + $0x98] sm:$0xff] %vm536_vm1, %v369_v7  ;;  %v7688_v54 = vrot.slane %v5668_v62, 7  ;;  %v433_v61 = vsel %vm342_vm14, 0.0, %v373_v31  ;;  %v7689_v56 = vrot.slane %v5719_v33, 7  ;;  %v6107_v62 = vld [vmem:[#allocation2 + $0x258] sm:$0xff] }
  0x45   : > { %v472_v60 = vsel %vm439_vm2, %v7686_v28, %v7685_v45  ;;  %v530_v41 = vsel %vm439_vm2, %v7687_v14, 0.0  ;;  %557 = vst.msk [vmem:[#allocation2 + $0xa0] sm:$0xff] %vm536_vm1, %v432_v37  ;;  %559 = vst.msk [vmem:[#allocation2 + $0xb0] sm:$0xff] %vm536_vm1, %v433_v61  ;;  %v376_v33 = vrot.slane %v5734_v46, 7  ;;  %v7690_v44 = vrot.slane %v5763_v6, 1  ;;  %v213_v61 = vld [vmem:[%s5575_s24 + $0xf8] sm:$0xff]  ;;  %5139 = vmatmul.mubr.msk.f32.gmra.mxu0 %vm536_vm1, %v6107_v62 }
  0x46   : > { %v372_v4 = vsel %vm342_vm14, %v370_v15, %v7688_v54  ;;  %633 = vst.msk [vmem:[#allocation2 + $0x2f0] sm:$0xff] %vm536_vm1, %v472_v60  ;;  %v375_v53 = vsel %vm342_vm14, %v373_v31, %v7689_v56  ;;  %634 = vst.msk [vmem:[#allocation2 + $0x2f8] sm:$0xff] %vm536_vm1, %v530_v41  ;;  %v7691_v34 = vrot.slane %v5734_v46, 1  ;;  %v379_v30 = vrot.slane %v5778_v11, 7  ;;  %v6126_v26 = vld [vmem:[%s7638_s1 + $0x18] sm:$0xf]  ;;  %5141 = vmatprep.mubr.msk.f32.mxu0 %vm536_vm1, %v6134_v1 }
  0x47   : > { %558 = vst.msk [vmem:[#allocation2 + $0xa8] sm:$0xff] %vm536_vm1, %v372_v4  ;;  %560 = vst.msk [vmem:[#allocation2 + $0xb8] sm:$0xff] %vm536_vm1, %v375_v53  ;;  %v7692_v9 = vmov %v7690_v44  ;;  %v6132_v46 = vld [vmem:[#allocation2 + $0x18] sm:$0xff]  ;;  %v7693_v16 = vrot.slane %v5812_v52, 1  ;;  %v7694_v42 = vrot.slane %v5778_v11, 1  ;;  %v382_v10 = vrot.slane %v5832_v40, 7  ;;  %5333 = vmatprep.subr.msk.mxu0 %vm810_vm0, %v6126_v26 }
  0x48   : > { %v475_v13 = vsel %vm439_vm2, %v7691_v34, %v7690_v44  ;;  %v531_v15 = vsel %vm439_vm2, %v7692_v9, 0.0  ;;  %v7696_v7 = vrot.slane %v5863_v51, 1  ;;  %v7697_v45 = vrot.slane %v5832_v40, 1  ;;  %v212_v60 = vld [vmem:[%s5575_s24 + $0xf0] sm:$0xff]  ;;  %v6155_v11 = vld [vmem:[#allocation2 + $0x20] sm:$0xff]  ;;  %5089 = vmatmul.mubr.msk.f32.gmra.mxu1 %vm536_vm1, %v6132_v46  ;;  %v6191_v34 = vld [vmem:[#allocation2 + $0x268] sm:$0xff] }
  0x49   : > { %635 = vst.msk [vmem:[#allocation2 + $0x300] sm:$0xff] %vm536_vm1, %v475_v13  ;;  %636 = vst.msk [vmem:[#allocation2 + $0x308] sm:$0xff] %vm536_vm1, %v531_v15  ;;  %v478_v31 = vsel %vm439_vm2, %v7694_v42, %v7693_v16  ;;  %v7695_v48 = vmov %v7693_v16  ;;  %v434_v14 = vsel %vm342_vm14, 0.0, %v376_v33  ;;  %v7698_v41 = vrot.slane %v5763_v6, 7  ;;  %5091 = vmatprep.mubr.msk.f32.mxu1 %vm536_vm1, %v6155_v11  ;;  %v6206_v15 = vld [vmem:[#allocation2 + $0x28] sm:$0xff]  ;;  %5142 = vmatmul.mubr.msk.f32.gmra.mxu0 %vm536_vm1, %v6191_v34 }
  0x4a   : > { %v532_v17 = vsel %vm439_vm2, %v7695_v48, 0.0  ;;  %v481_v28 = vsel %vm439_vm2, %v7697_v45, %v7696_v7  ;;  %v435_v54 = vsel %vm342_vm14, 0.0, %v379_v30  ;;  %637 = vst.msk [vmem:[#allocation2 + $0x310] sm:$0xff] %vm536_vm1, %v478_v31  ;;  %v7699_v40 = vrot.slane %v5812_v52, 7  ;;  %561 = vst.msk [vmem:[#allocation2 + $0xc0] sm:$0xff] %vm536_vm1, %v434_v14 }
  0x4b   : > { %v378_v37 = vsel %vm342_vm14, %v376_v33, %v7698_v41  ;;  %638 = vst.msk [vmem:[#allocation2 + $0x318] sm:$0xff] %vm536_vm1, %v532_v17  ;;  %639 = vst.msk [vmem:[#allocation2 + $0x320] sm:$0xff] %vm536_vm1, %v481_v28  ;;  %v436_v6 = vsel %vm342_vm14, 0.0, %v382_v10  ;;  %v7700_v52 = vrot.slane %v5863_v51, 7  ;;  %v7701_v53 = vmov %v7696_v7  ;;  %v6239_v7 = vld [vmem:[#allocation2 + $0x280] sm:$0xff]  ;;  %v6255_v41 = vld [vmem:[#allocation2 + $0x288] sm:$0xff] }
  0x4c   : > { %v381_v4 = vsel %vm342_vm14, %v379_v30, %v7699_v40  ;;  %562 = vst.msk [vmem:[#allocation2 + $0xc8] sm:$0xff] %vm536_vm1, %v378_v37  ;;  %563 = vst.msk [vmem:[#allocation2 + $0xd0] sm:$0xff] %vm536_vm1, %v435_v54  ;;  %v533_v33 = vsel %vm439_vm2, %v7701_v53, 0.0  ;;  %v385_v44 = vrot.slane %v5878_v27, 7  ;;  %v7702_v51 = vrot.slane %v5878_v27, 1  ;;  %v6208_v30 = vld [vmem:[#allocation2 + $0x270] sm:$0xff]  ;;  %5092 = vmatmul.mubr.msk.f32.gmra.mxu1 %vm536_vm1, %v6206_v15 }
  0x4d   : > { %564 = vst.msk [vmem:[#allocation2 + $0xd8] sm:$0xff] %vm536_vm1, %v381_v4  ;;  %v384_v56 = vsel %vm342_vm14, %v382_v10, %v7700_v52  ;;  %565 = vst.msk [vmem:[#allocation2 + $0xe0] sm:$0xff] %vm536_vm1, %v436_v6  ;;  %v534_v9 = vsel %vm439_vm2, %v483_v55, 0.0  ;;  %vm244_vm8 = vcmp.gt.f32.partialorder %v212_v60, 0.0  ;;  %v276_v42 = vmul.f32 0.01, %v212_v60  ;;  %5144 = vmatprep.mubr.msk.f32.mxu0 %vm536_vm1, %v6208_v30 }
  0x4e   : > { %566 = vst.msk [vmem:[#allocation2 + $0xe8] sm:$0xff] %vm536_vm1, %v384_v56  ;;  %640 = vst.msk [vmem:[#allocation2 + $0x328] sm:$0xff] %vm536_vm1, %v533_v33  ;;  %v484_v13 = vsel %vm439_vm2, %v7702_v51, %v483_v55  ;;  %v437_v16 = vsel %vm342_vm14, 0.0, %v385_v44  ;;  %v387_v27 = vsel %vm342_vm14, %v385_v44, %v386_v8  ;;  %vm245_vm9 = vcmp.gt.f32.partialorder %v213_v61, 0.0  ;;  %v6216_v55 = vld [vmem:[#allocation2 + $0x30] sm:$0xff]  ;;  %v6228_v8 = vld [vmem:[#allocation2 + $0x278] sm:$0xff] }
  0x4f   : > { %7703 = vst [vmem:[#allocation3_spill] sm:$0xff] %v6208_v30  ;;  %641 = vst.msk [vmem:[#allocation2 + $0x330] sm:$0xff] %vm536_vm1, %v484_v13  ;;  %v277_v31 = vmul.f32 0.01, %v213_v61  ;;  %v6222_v48 = vsel %vm244_vm8, %v212_v60, %v276_v42  ;;  %5094 = vmatprep.mubr.msk.f32.mxu1 %vm536_vm1, %v6216_v55  ;;  %v6237_v10 = vld [vmem:[#allocation2 + $0x38] sm:$0xff]  ;;  %v6244_v28 = vld [vmem:[#allocation2 + $0x40] sm:$0xff]  ;;  %5145 = vmatmul.mubr.msk.f32.gmra.mxu0 %vm536_vm1, %v6228_v8 }
  0x50   : > { %642 = vst.msk [vmem:[#allocation2 + $0x338] sm:$0xff] %vm536_vm1, %v534_v9  ;;  %567 = vst.msk [vmem:[#allocation2 + $0xf0] sm:$0xff] %vm536_vm1, %v437_v16  ;;  %v388_v21 = vrot.slane %v6222_v48, 7  ;;  %5095 = vmatmul.mubr.msk.f32.gmra.mxu1 %vm536_vm1, %v6237_v10  ;;  %5147 = vmatprep.mubr.msk.f32.mxu0 %vm536_vm1, %v6239_v7  ;;  %v6260_v37 = vld [vmem:[#allocation2 + $0x48] sm:$0xff]  ;;  %v6262_v54 = vld [vmem:[#allocation2 + $0x290] sm:$0xff] }
  0x51   : > { %568 = vst.msk [vmem:[#allocation2 + $0xf8] sm:$0xff] %vm536_vm1, %v387_v27  ;;  %7704 = vst [vmem:[#allocation4_spill] sm:$0xff] %v6228_v8  ;;  %v6233_v17 = vsel %vm245_vm9, %v213_v61, %v277_v31  ;;  %5097 = vmatprep.mubr.msk.f32.mxu1 %vm536_vm1, %v6244_v28  ;;  %v6264_v40 = vld [vmem:[#allocation2 + $0x50] sm:$0xff]  ;;  %v6272_v4 = vld [vmem:[#allocation2 + $0x298] sm:$0xff] }
  0x52   : > { %606 = vst.msk [vmem:[#allocation2 + $0x220] sm:$0xff] %vm536_vm1, %v6222_v48  ;;  %7705 = vst [vmem:[#allocation5_spill] sm:$0xff] %v6239_v7  ;;  %v389_v45 = vrot.slane %v6233_v17, 7  ;;  %v438_v60 = vsel %vm342_vm14, 0.0, %v388_v21  ;;  %v6276_v61 = vld [vmem:[#allocation2 + $0x58] sm:$0xff]  ;;  %v6278_v6 = vld [vmem:[#allocation2 + $0x2a0] sm:$0xff] }
  0x53   : > { %607 = vst.msk [vmem:[#allocation2 + $0x228] sm:$0xff] %vm536_vm1, %v6233_v17  ;;  %569 = vst.msk [vmem:[#allocation2 + $0x100] sm:$0xff] %vm536_vm1, %v438_v60  ;;  %5148 = vmatmul.mubr.msk.f32.gmra.mxu0 %vm536_vm1, %v6255_v41  ;;  %v6280_v52 = vld [vmem:[#allocation2 + $0x60] sm:$0xff]  ;;  %v6288_v56 = vld [vmem:[#allocation2 + $0x2a8] sm:$0xff] }
  0x54   : > { %v390_v14 = vsel %vm342_vm14, %v388_v21, %v389_v45  ;;  %7706 = vst [vmem:[#allocation6_spill] sm:$0xff] %v6255_v41  ;;  %7707 = vst [vmem:[#allocation7_spill] sm:$0xff] %v6262_v54  ;;  %5098 = vmatmul.mubr.msk.f32.gmra.mxu1 %vm536_vm1, %v6260_v37  ;;  %5150 = vmatprep.mubr.msk.f32.mxu0 %vm536_vm1, %v6262_v54  ;;  %v6292_v53 = vld [vmem:[#allocation2 + $0x68] sm:$0xff]  ;;  %v6294_v33 = vld [vmem:[#allocation2 + $0x2b0] sm:$0xff]  ;;  %v486_v41 = vrot.slane %v6233_v17, 1 }
  0x55   : > { %570 = vst.msk [vmem:[#allocation2 + $0x108] sm:$0xff] %vm536_vm1, %v390_v14  ;;  %7708 = vst [vmem:[#allocation8_spill] sm:$0xff] %v6272_v4  ;;  %5100 = vmatprep.mubr.msk.f32.mxu1 %vm536_vm1, %v6264_v40  ;;  %v6296_v44 = vld [vmem:[#allocation2 + $0x70] sm:$0xff]  ;;  %v6304_v51 = vld [vmem:[#allocation2 + $0x2b8] sm:$0xff] }
  0x56   : > { %7709 = vst [vmem:[#allocation9_spill] sm:$0xff] %v6278_v6  ;;  %7710 = vst [vmem:[#allocation10_spill] sm:$0xff] %v6288_v56  ;;  %v6308_v13 = vld [vmem:[#allocation2 + $0x78] sm:$0xff]  ;;  %v6310_v9 = vld [vmem:[#allocation2 + $0x2c0] sm:$0xff] }
  0x57   : > { %5151 = vmatmul.mubr.msk.f32.gmra.mxu0 %vm536_vm1, %v6272_v4  ;;  %7711 = vst [vmem:[#allocation11_spill] sm:$0xff] %v6294_v33  ;;  %7712 = vst [vmem:[#allocation12_spill] sm:$0xff] %v6304_v51  ;;  %v6312_v16 = vld [vmem:[#allocation2 + $0x80] sm:$0xff]  ;;  %v6320_v27 = vld [vmem:[#allocation2 + $0x2c8] sm:$0xff] }
  0x58   : > { %5101 = vmatmul.mubr.msk.f32.gmra.mxu1 %vm536_vm1, %v6276_v61  ;;  %5153 = vmatprep.mubr.msk.f32.mxu0 %vm536_vm1, %v6278_v6  ;;  %7713 = vst [vmem:[#allocation13_spill] sm:$0xff] %v6310_v9  ;;  %7714 = vst [vmem:[#allocation14_spill] sm:$0xff] %v6320_v27  ;;  %v6324_v42 = vld [vmem:[#allocation2 + $0x88] sm:$0xff]  ;;  %v6326_v31 = vld [vmem:[#allocation2 + $0x2d0] sm:$0xff] }
  0x59   : > { %5103 = vmatprep.mubr.msk.f32.mxu1 %vm536_vm1, %v6280_v52  ;;  %7715 = vst [vmem:[#allocation15_spill] sm:$0xff] %v6326_v31  ;;  %v6328_v21 = vld [vmem:[#allocation2 + $0x90] sm:$0xff]  ;;  %v6336_v45 = vld [vmem:[#allocation2 + $0x2d8] sm:$0xff]  ;;  %v6342_v14 = vld [vmem:[#allocation2 + $0x2e0] sm:$0xff] }
  0x5a   : > { %7716 = vst [vmem:[#allocation16_spill] sm:$0xff] %v6336_v45  ;;  %v6340_v60 = vld [vmem:[#allocation2 + $0x98] sm:$0xff]  ;;  %7717 = vst [vmem:[#allocation17_spill] sm:$0xff] %v6342_v14  ;;  %v6376_v6 = vld [vmem:[#allocation2 + $0xc0] sm:$0xff] }
  0x5b   : > { %5154 = vmatmul.mubr.msk.f32.gmra.mxu0 %vm536_vm1, %v6288_v56  ;;  %v6374_v56 = vld [vmem:[#allocation2 + $0x300] sm:$0xff]  ;;  %v6390_v4 = vld [vmem:[#allocation2 + $0x310] sm:$0xff]  ;;  %v6406_v7 = vld [vmem:[#allocation2 + $0xd8] sm:$0xff] }
  0x5c   : > { %5104 = vmatmul.mubr.msk.f32.gmra.mxu1 %vm536_vm1, %v6292_v53  ;;  %5156 = vmatprep.mubr.msk.f32.mxu0 %vm536_vm1, %v6294_v33  ;;  %v6360_v33 = vld [vmem:[#allocation2 + $0xb0] sm:$0xff]  ;;  %7721 = vst [vmem:[#allocation21_spill] sm:$0xff] %v6374_v56  ;;  %v6408_v8 = vld [vmem:[#allocation2 + $0x320] sm:$0xff]  ;;  %v6421_v17 = vld [vmem:[#allocation2 + $0x328] sm:$0xff] }
  0x5d   : > { %5106 = vmatprep.mubr.msk.f32.mxu1 %vm536_vm1, %v6296_v44  ;;  %v6392_v54 = vld [vmem:[#allocation2 + $0xd0] sm:$0xff] }
  0x5f   : > { %5157 = vmatmul.mubr.msk.f32.gmra.mxu0 %vm536_vm1, %v6304_v51  ;;  %v6358_v51 = vld [vmem:[#allocation2 + $0x2f0] sm:$0xff] }
  0x60   : > { %5107 = vmatmul.mubr.msk.f32.gmra.mxu1 %vm536_vm1, %v6308_v13  ;;  %5159 = vmatprep.mubr.msk.f32.mxu0 %vm536_vm1, %v6310_v9  ;;  %v6344_v9 = vld [vmem:[#allocation2 + $0xa0] sm:$0xff]  ;;  %7719 = vst [vmem:[#allocation19_spill] sm:$0xff] %v6358_v51 }
  0x61   : > { %5109 = vmatprep.mubr.msk.f32.mxu1 %vm536_vm1, %v6312_v16 }
  0x63   : > { %5160 = vmatmul.mubr.msk.f32.gmra.mxu0 %vm536_vm1, %v6320_v27  ;;  %v6356_v27 = vld [vmem:[#allocation2 + $0xa8] sm:$0xff] }
  0x64   : > { %5110 = vmatmul.mubr.msk.f32.gmra.mxu1 %vm536_vm1, %v6324_v42  ;;  %5162 = vmatprep.mubr.msk.f32.mxu0 %vm536_vm1, %v6326_v31  ;;  %v6352_v31 = vld [vmem:[#allocation2 + $0x2e8] sm:$0xff] }
  0x65   : > { %5112 = vmatprep.mubr.msk.f32.mxu1 %vm536_vm1, %v6328_v21  ;;  %7718 = vst [vmem:[#allocation18_spill] sm:$0xff] %v6352_v31 }
  0x67   : > { %5163 = vmatmul.mubr.msk.f32.gmra.mxu0 %vm536_vm1, %v6336_v45  ;;  %v6372_v45 = vld [vmem:[#allocation2 + $0xb8] sm:$0xff] }
  0x68   : > { %5113 = vmatmul.mubr.msk.f32.gmra.mxu1 %vm536_vm1, %v6340_v60  ;;  %5165 = vmatprep.mubr.msk.f32.mxu0 %vm536_vm1, %v6342_v14  ;;  %v6368_v14 = vld [vmem:[#allocation2 + $0x2f8] sm:$0xff] }
  0x69   : > { %5115 = vmatprep.mubr.msk.f32.mxu1 %vm536_vm1, %v6344_v9  ;;  %7720 = vst [vmem:[#allocation20_spill] sm:$0xff] %v6368_v14 }
  0x6b   : > { %5166 = vmatmul.mubr.msk.f32.gmra.mxu0 %vm536_vm1, %v6352_v31  ;;  %v6388_v31 = vld [vmem:[#allocation2 + $0xc8] sm:$0xff] }
  0x6c   : > { %5116 = vmatmul.mubr.msk.f32.gmra.mxu1 %vm536_vm1, %v6356_v27  ;;  %5168 = vmatprep.mubr.msk.f32.mxu0 %vm536_vm1, %v6358_v51  ;;  %v6384_v51 = vld [vmem:[#allocation2 + $0x308] sm:$0xff] }
  0x6d   : > { %5118 = vmatprep.mubr.msk.f32.mxu1 %vm536_vm1, %v6360_v33  ;;  %7722 = vst [vmem:[#allocation22_spill] sm:$0xff] %v6384_v51 }
  0x6f   : > { %5169 = vmatmul.mubr.msk.f32.gmra.mxu0 %vm536_vm1, %v6368_v14  ;;  %v485_v14 = vrot.slane %v6222_v48, 1  ;;  %v535_v48 = vsel %vm439_vm2, %v486_v41, 0.0 }
  0x70   : > { %5119 = vmatmul.mubr.msk.f32.gmra.mxu1 %vm536_vm1, %v6372_v45  ;;  %5171 = vmatprep.mubr.msk.f32.mxu0 %vm536_vm1, %v6374_v56  ;;  %v6400_v56 = vld [vmem:[#allocation2 + $0x318] sm:$0xff]  ;;  %644 = vst.msk [vmem:[#allocation2 + $0x348] sm:$0xff] %vm536_vm1, %v535_v48 }
  0x71   : > { %5121 = vmatprep.mubr.msk.f32.mxu1 %vm536_vm1, %v6376_v6  ;;  %7723 = vst [vmem:[#allocation23_spill] sm:$0xff] %v6400_v56  ;;  %v487_v30 = vsel %vm439_vm2, %v485_v14, %v486_v41  ;;  %v6426_v14 = vld [vmem:[#allocation2 + $0xe8] sm:$0xff]  ;;  %v6438_v41 = vld [vmem:[#allocation2 + $0x338] sm:$0xff] }
  0x72   : > { %643 = vst.msk [vmem:[#allocation2 + $0x340] sm:$0xff] %vm536_vm1, %v487_v30  ;;  %v6430_v30 = vld [vmem:[#allocation2 + $0xf0] sm:$0xff]  ;;  %v6442_v48 = vld [vmem:[#allocation2 + $0xf8] sm:$0xff] }
  0x73   : > { %5172 = vmatmul.mubr.msk.f32.gmra.mxu0 %vm536_vm1, %v6384_v51  ;;  %v6410_v51 = vld [vmem:[#allocation2 + $0xe0] sm:$0xff] }
  0x74   : > { %5122 = vmatmul.mubr.msk.f32.gmra.mxu1 %vm536_vm1, %v6388_v31  ;;  %5174 = vmatprep.mubr.msk.f32.mxu0 %vm536_vm1, %v6390_v4 }
  0x75   : > { %5124 = vmatprep.mubr.msk.f32.mxu1 %vm536_vm1, %v6392_v54 }
  0x77   : > { %5175 = vmatmul.mubr.msk.f32.gmra.mxu0 %vm536_vm1, %v6400_v56  ;;  %v6428_v56 = vld [vmem:[#allocation2 + $0x330] sm:$0xff] }
  0x78   : > { %5125 = vmatmul.mubr.msk.f32.gmra.mxu1 %vm536_vm1, %v6406_v7  ;;  %5177 = vmatprep.mubr.msk.f32.mxu0 %vm536_vm1, %v6408_v8  ;;  %7724 = vst [vmem:[#allocation24_spill] sm:$0xff] %v6428_v56 }
  0x79   : > { %5127 = vmatprep.mubr.msk.f32.mxu1 %vm536_vm1, %v6410_v51 }
  0x7b   : > { %5178 = vmatmul.mubr.msk.f32.gmra.mxu0 %vm536_vm1, %v6421_v17 }
  0x7c   : > { %5128 = vmatmul.mubr.msk.f32.gmra.mxu1 %vm536_vm1, %v6426_v14  ;;  %5180 = vmatprep.mubr.msk.f32.mxu0 %vm536_vm1, %v6428_v56  ;;  %v6457_v56 = vld [vmem:[%s7638_s1 + $0x1c] sm:$0xf] }
  0x7d   : > { %5130 = vmatprep.mubr.msk.f32.mxu1 %vm536_vm1, %v6430_v30 }
  0x7f   : > { %5181 = vmatmul.mubr.msk.f32.gmra.mxu0 %vm536_vm1, %v6438_v41 }
  0x80   : > { %5131 = vmatmul.mubr.msk.f32.gmra.mxu1 %vm536_vm1, %v6442_v48  ;;  %5235 = vmatprep.mubr.msk.f32.mxu0 %vm536_vm1, %v5661_v58  ;;  %v6466_v58 = vld [vmem:[%s7638_s1 + $0x20] sm:$0xf] }
  0x81   : > { %5185 = vmatprep.mubr.msk.f32.mxu1 %vm536_vm1, %v6068_v43  ;;  %v7735_v43 = vld [vmem:[#allocation13_spill] sm:$0xff] }
  0x83   : > { %5236 = vmatmul.mubr.msk.f32.vlgmr.msra.gmra.mxu0 %vm536_vm1, %v5688_v2  ;;  %v6530_v2 = vld [vmem:[#allocation2 + $0x1b0] sm:$0xff] }
  0x84   : > { %5186 = vmatmul.mubr.msk.f32.vlgmr.msra.gmra.mxu1 %vm536_vm1, %v6132_v46  ;;  %5334 = vmatpush3.msk.msra.mxu0 %vm810_vm0, %v6126_v26  ;;  %v7737_v26 = vld [vmem:[#allocation15_spill] sm:$0xff] }
  0x85   : > { %5284 = vmatpush3.msk.msra.mxu1 %vm810_vm0, %v6102_v35  ;;  %5188 = vmatprep.mubr.msk.f32.mxu1 %vm536_vm1, %v6155_v11  ;;  %v7736_v35 = vld [vmem:[#allocation14_spill] sm:$0xff] }
  0x86   : > { %5238 = vmatprep.mubr.msk.f32.mxu0 %vm536_vm1, %v5705_v18  ;;  %5383 = vmatprep.subr.msk.mxu1 %vm810_vm0, %v6457_v56  ;;  %v6538_v18 = vld [vmem:[#allocation2 + $0x1b8] sm:$0xff] }
  0x87   : > { %5239 = vmatmul.mubr.msk.f32.gmra.mxu0 %vm536_vm1, %v5738_v50  ;;  %5433 = vmatprep.subr.msk.mxu0 %vm810_vm0, %v6466_v58  ;;  %v6542_v50 = vld [vmem:[#allocation2 + $0x1c0] sm:$0xff] }
  0x88   : > { %5189 = vmatmul.mubr.msk.f32.gmra.mxu1 %vm536_vm1, %v6206_v15  ;;  %5241 = vmatprep.mubr.msk.f32.mxu0 %vm536_vm1, %v5749_v63  ;;  %v6550_v63 = vld [vmem:[#allocation2 + $0x1c8] sm:$0xff] }
  0x89   : > { %5191 = vmatprep.mubr.msk.f32.mxu1 %vm536_vm1, %v6216_v55 }
  0x8b   : > { %5242 = vmatmul.mubr.msk.f32.gmra.mxu0 %vm536_vm1, %v5782_v57  ;;  %v6554_v57 = vld [vmem:[#allocation2 + $0x1d0] sm:$0xff] }
  0x8c   : > { %5192 = vmatmul.mubr.msk.f32.gmra.mxu1 %vm536_vm1, %v6237_v10  ;;  %5244 = vmatprep.mubr.msk.f32.mxu0 %vm536_vm1, %v5794_v12  ;;  %v6606_v12 = vld [vmem:[#allocation2 + $0x228] sm:$0xff] }
  0x8d   : > { %5194 = vmatprep.mubr.msk.f32.mxu1 %vm536_vm1, %v6244_v28 }
  0x8f   : > { %5245 = vmatmul.mubr.msk.f32.gmra.mxu0 %vm536_vm1, %v5835_v29  ;;  %v6526_v29 = vld [vmem:[#allocation2 + $0x1a8] sm:$0xff] }
  0x90   : > { %5195 = vmatmul.mubr.msk.f32.gmra.mxu1 %vm536_vm1, %v6260_v37  ;;  %5247 = vmatprep.mubr.msk.f32.mxu0 %vm536_vm1, %v5847_v24  ;;  %v7727_v24 = vld [vmem:[#allocation5_spill] sm:$0xff] }
  0x91   : > { %5197 = vmatprep.mubr.msk.f32.mxu1 %vm536_vm1, %v6264_v40 }
  0x93   : > { %5248 = vmatmul.mubr.msk.f32.gmra.mxu0 %vm536_vm1, %v5880_v19  ;;  %v6518_v19 = vld [vmem:[#allocation2 + $0x1a0] sm:$0xff] }
  0x94   : > { %5198 = vmatmul.mubr.msk.f32.gmra.mxu1 %vm536_vm1, %v6276_v61  ;;  %5250 = vmatprep.mubr.msk.f32.mxu0 %vm536_vm1, %v5906_v36  ;;  %v7728_v36 = vld [vmem:[#allocation6_spill] sm:$0xff] }
  0x95   : > { %5200 = vmatprep.mubr.msk.f32.mxu1 %vm536_vm1, %v6280_v52 }
  0x97   : > { %5251 = vmatmul.mubr.msk.f32.gmra.mxu0 %vm536_vm1, %v5932_v20  ;;  %v7730_v20 = vld [vmem:[#allocation8_spill] sm:$0xff] }
  0x98   : > { %5201 = vmatmul.mubr.msk.f32.gmra.mxu1 %vm536_vm1, %v6292_v53  ;;  %5253 = vmatprep.mubr.msk.f32.mxu0 %vm536_vm1, %v5965_v23  ;;  %v7732_v23 = vld [vmem:[#allocation10_spill] sm:$0xff] }
  0x99   : > { %5203 = vmatprep.mubr.msk.f32.mxu1 %vm536_vm1, %v6296_v44 }
  0x9b   : > { %5254 = vmatmul.mubr.msk.f32.gmra.mxu0 %vm536_vm1, %v5999_v25 }
  0x9c   : > { %5204 = vmatmul.mubr.msk.f32.gmra.mxu1 %vm536_vm1, %v6308_v13  ;;  %5256 = vmatprep.mubr.msk.f32.mxu0 %vm536_vm1, %v6518_v19 }
  0x9d   : > { %5206 = vmatprep.mubr.msk.f32.mxu1 %vm536_vm1, %v6312_v16 }
  0x9f   : > { %5257 = vmatmul.mubr.msk.f32.gmra.mxu0 %vm536_vm1, %v6526_v29 }
  0xa0   : > { %5207 = vmatmul.mubr.msk.f32.gmra.mxu1 %vm536_vm1, %v6324_v42  ;;  %5259 = vmatprep.mubr.msk.f32.mxu0 %vm536_vm1, %v6530_v2 }
  0xa1   : > { %5209 = vmatprep.mubr.msk.f32.mxu1 %vm536_vm1, %v6328_v21 }
  0xa3   : > { %5260 = vmatmul.mubr.msk.f32.gmra.mxu0 %vm536_vm1, %v6538_v18 }
  0xa4   : > { %5210 = vmatmul.mubr.msk.f32.gmra.mxu1 %vm536_vm1, %v6340_v60  ;;  %5262 = vmatprep.mubr.msk.f32.mxu0 %vm536_vm1, %v6542_v50 }
  0xa5   : > { %5212 = vmatprep.mubr.msk.f32.mxu1 %vm536_vm1, %v6344_v9 }
  0xa7   : > { %5263 = vmatmul.mubr.msk.f32.gmra.mxu0 %vm536_vm1, %v6550_v63 }
  0xa8   : > { %5213 = vmatmul.mubr.msk.f32.gmra.mxu1 %vm536_vm1, %v6356_v27  ;;  %5265 = vmatprep.mubr.msk.f32.mxu0 %vm536_vm1, %v6554_v57 }
  0xa9   : > { %5215 = vmatprep.mubr.msk.f32.mxu1 %vm536_vm1, %v6360_v33 }
  0xab   : > { %5266 = vmatmul.mubr.msk.f32.gmra.mxu0 %vm536_vm1, %v5792_v38  ;;  %v6598_v38 = vld [vmem:[#allocation2 + $0x100] sm:$0xff] }
  0xac   : > { %5216 = vmatmul.mubr.msk.f32.gmra.mxu1 %vm536_vm1, %v6372_v45  ;;  %5268 = vmatprep.mubr.msk.f32.mxu0 %vm536_vm1, %v5806_v59  ;;  %v6596_v59 = vld [vmem:[#allocation2 + $0x220] sm:$0xff] }
  0xad   : > { %5218 = vmatprep.mubr.msk.f32.mxu1 %vm536_vm1, %v6376_v6 }
  0xaf   : > { %5269 = vmatmul.mubr.msk.f32.gmra.mxu0 %vm536_vm1, %v5845_v0  ;;  %v7726_v0 = vld [vmem:[#allocation4_spill] sm:$0xff] }
  0xb0   : > { %5219 = vmatmul.mubr.msk.f32.gmra.mxu1 %vm536_vm1, %v6388_v31  ;;  %5271 = vmatprep.mubr.msk.f32.mxu0 %vm536_vm1, %v5856_v49  ;;  %v7725_v49 = vld [vmem:[#allocation3_spill] sm:$0xff] }
  0xb1   : > { %5221 = vmatprep.mubr.msk.f32.mxu1 %vm536_vm1, %v6392_v54 }
  0xb3   : > { %5272 = vmatmul.mubr.msk.f32.gmra.mxu0 %vm536_vm1, %v5882_v47  ;;  %v6610_v47 = vld [vmem:[#allocation2 + $0x108] sm:$0xff] }
  0xb4   : > { %5222 = vmatmul.mubr.msk.f32.gmra.mxu1 %vm536_vm1, %v6406_v7  ;;  %5274 = vmatprep.mubr.msk.f32.mxu0 %vm536_vm1, %v5908_v5  ;;  %v7729_v5 = vld [vmem:[#allocation7_spill] sm:$0xff] }
  0xb5   : > { %5224 = vmatprep.mubr.msk.f32.mxu1 %vm536_vm1, %v6410_v51 }
  0xb7   : > { %5275 = vmatmul.mubr.msk.f32.gmra.mxu0 %vm536_vm1, %v5947_v3  ;;  %v7731_v3 = vld [vmem:[#allocation9_spill] sm:$0xff] }
  0xb8   : > { %5225 = vmatmul.mubr.msk.f32.gmra.mxu1 %vm536_vm1, %v6426_v14  ;;  %5277 = vmatprep.mubr.msk.f32.mxu0 %vm536_vm1, %v5981_v32  ;;  %v7733_v32 = vld [vmem:[#allocation11_spill] sm:$0xff] }
  0xb9   : > { %5227 = vmatprep.mubr.msk.f32.mxu1 %vm536_vm1, %v6430_v30 }
  0xbb   : > { %5278 = vmatmul.mubr.msk.f32.gmra.mxu0 %vm536_vm1, %v6021_v22  ;;  %v7734_v22 = vld [vmem:[#allocation12_spill] sm:$0xff] }
  0xbc   : > { %5228 = vmatmul.mubr.msk.f32.gmra.mxu1 %vm536_vm1, %v6442_v48  ;;  %5280 = vmatprep.mubr.msk.f32.mxu0 %vm536_vm1, %v6596_v59 }
  0xbd   : > { %5230 = vmatprep.mubr.msk.f32.mxu1 %vm536_vm1, %v6598_v38 }
  0xbf   : > { %5281 = vmatmul.mubr.msk.f32.gmra.mxu0 %vm536_vm1, %v6606_v12 }
  0xc0   : > { %5231 = vmatmul.mubr.msk.f32.gmra.mxu1 %vm536_vm1, %v6610_v47  ;;  %5335 = vmatprep.mubr.msk.f32.mxu0 %vm536_vm1, %v6155_v11  ;;  %v7738_v11 = vld [vmem:[#allocation16_spill] sm:$0xff] }
  0xc1   : > { %5285 = vmatprep.mubr.msk.f32.mxu1 %vm536_vm1, %v6085_v39 }
  0xc3   : > { %5336 = vmatmul.mubr.msk.f32.vlgmr.msra.gmra.mxu0 %vm536_vm1, %v6206_v15  ;;  %v7739_v15 = vld [vmem:[#allocation17_spill] sm:$0xff] }
  0xc4   : > { %5286 = vmatmul.mubr.msk.f32.vlgmr.msra.gmra.mxu1 %vm536_vm1, %v6107_v62  ;;  %5434 = vmatpush3.msk.msra.mxu0 %vm810_vm0, %v6466_v58 }
  0xc5   : > { %5384 = vmatpush3.msk.msra.mxu1 %vm810_vm0, %v6457_v56  ;;  %5288 = vmatprep.mubr.msk.f32.mxu1 %vm536_vm1, %v6134_v1  ;;  %vm4329_vm0 = vcmask 25600  }
  0xc6   : > { %5338 = vmatprep.mubr.msk.f32.mxu0 %vm536_vm1, %v6216_v55 }
  0xc7   : > { %5339 = vmatmul.mubr.msk.f32.gmra.mxu0 %vm536_vm1, %v6237_v10 }
  0xc8   : > { %5289 = vmatmul.mubr.msk.f32.gmra.mxu1 %vm536_vm1, %v6191_v34  ;;  %5341 = vmatprep.mubr.msk.f32.mxu0 %vm536_vm1, %v6244_v28  ;;  %v7740_v28 = vld [vmem:[#allocation18_spill] sm:$0xff] }
  0xc9   : > { %5291 = vmatprep.mubr.msk.f32.mxu1 %vm536_vm1, %v7725_v49  ;;  %v3703_v49 = vld [vmem:[#allocation2 + $0x260] sm:$0xff] }
  0xcb   : > { %5342 = vmatmul.mubr.msk.f32.gmra.mxu0 %vm536_vm1, %v6260_v37 }
  0xcc   : > { %5292 = vmatmul.mubr.msk.f32.gmra.mxu1 %vm536_vm1, %v7726_v0  ;;  %5344 = vmatprep.mubr.msk.f32.mxu0 %vm536_vm1, %v6264_v40  ;;  %v7741_v40 = vld [vmem:[#allocation19_spill] sm:$0xff] }
  0xcd   : > { %5294 = vmatprep.mubr.msk.f32.mxu1 %vm536_vm1, %v7727_v24  ;;  %v3313_v24 = vld [vmem:[#allocation2 + $0x140] sm:$0xff] }
  0xcf   : > { %5345 = vmatmul.mubr.msk.f32.gmra.mxu0 %vm536_vm1, %v6276_v61 }
  0xd0   : > { %5295 = vmatmul.mubr.msk.f32.gmra.mxu1 %vm536_vm1, %v7728_v36  ;;  %5347 = vmatprep.mubr.msk.f32.mxu0 %vm536_vm1, %v6280_v52 }
  0xd1   : > { %5297 = vmatprep.mubr.msk.f32.mxu1 %vm536_vm1, %v7729_v5 }
  0xd3   : > { %5348 = vmatmul.mubr.msk.f32.gmra.mxu0 %vm536_vm1, %v6292_v53  ;;  %v7742_v53 = vld [vmem:[#allocation20_spill] sm:$0xff] }
  0xd4   : > { %5298 = vmatmul.mubr.msk.f32.gmra.mxu1 %vm536_vm1, %v7730_v20  ;;  %5350 = vmatprep.mubr.msk.f32.mxu0 %vm536_vm1, %v6296_v44  ;;  %v3314_v20 = vld [vmem:[#allocation2 + $0x148] sm:$0xff] }
  0xd5   : > { %5300 = vmatprep.mubr.msk.f32.mxu1 %vm536_vm1, %v7731_v3  ;;  %v3705_v3 = vld [vmem:[#allocation2 + $0x270] sm:$0xff] }
  0xd6   : > { %v6674_v25 = vpop.f32.mrf.mxu0 }
  0xd7   : > { %5351 = vmatmul.mubr.msk.f32.gmra.mxu0 %vm536_vm1, %v6308_v13 }
  0xd8   : > { %5301 = vmatmul.mubr.msk.f32.gmra.mxu1 %vm536_vm1, %v7732_v23  ;;  %5353 = vmatprep.mubr.msk.f32.mxu0 %vm536_vm1, %v6312_v16  ;;  %v6684_v39 = vpop.f32.mrf.mxu0 }
  0xd9   : > { %5303 = vmatprep.mubr.msk.f32.mxu1 %vm536_vm1, %v7733_v32  ;;  %v3315_v32 = vld [vmem:[#allocation2 + $0x150] sm:$0xff] }
  0xdb   : > { %5354 = vmatmul.mubr.msk.f32.gmra.mxu0 %vm536_vm1, %v6324_v42 }
  0xdc   : > { %5304 = vmatmul.mubr.msk.f32.gmra.mxu1 %vm536_vm1, %v7734_v22  ;;  %5356 = vmatprep.mubr.msk.f32.mxu0 %vm536_vm1, %v6328_v21 }
  0xdd   : > { %5306 = vmatprep.mubr.msk.f32.mxu1 %vm536_vm1, %v7735_v43  ;;  %v6690_v62 = vpop.f32.mrf.mxu1 }
  0xdf   : > { %5357 = vmatmul.mubr.msk.f32.gmra.mxu0 %vm536_vm1, %v6340_v60  ;;  %v6694_v46 = vpop.f32.mrf.mxu1  ;;  %v7746_v60 = vld [vmem:[#allocation24_spill] sm:$0xff] }
  0xe0   : > { %5307 = vmatmul.mubr.msk.f32.gmra.mxu1 %vm536_vm1, %v7736_v35  ;;  %5359 = vmatprep.mubr.msk.f32.mxu0 %vm536_vm1, %v6344_v9  ;;  %v7744_v9 = vld [vmem:[#allocation22_spill] sm:$0xff] }
  0xe1   : > { %5309 = vmatprep.mubr.msk.f32.mxu1 %vm536_vm1, %v7737_v26  ;;  %v6698_v1 = vpop.f32.mrf.mxu0  ;;  %v3706_v35 = vld [vmem:[#allocation2 + $0x278] sm:$0xff] }
  0xe2   : > { %v6704_v34 = vpop.f32.mrf.mxu1 }
  0xe3   : > { %5360 = vmatmul.mubr.msk.f32.gmra.mxu0 %vm536_vm1, %v6356_v27  ;;  %v6708_v55 = vpop.f32.mrf.mxu0 }
  0xe4   : > { %5310 = vmatmul.mubr.msk.f32.gmra.mxu1 %vm536_vm1, %v7738_v11  ;;  %5362 = vmatprep.mubr.msk.f32.mxu0 %vm536_vm1, %v6360_v33  ;;  %v6710_v10 = vpop.f32.mrf.mxu1 }
  0xe5   : > { %5312 = vmatprep.mubr.msk.f32.mxu1 %vm536_vm1, %v7739_v15  ;;  %v6718_v37 = vpop.f32.mrf.mxu0  ;;  %v3316_v15 = vld [vmem:[#allocation2 + $0x158] sm:$0xff] }
  0xe6   : > { %v6722_v61 = vpop.f32.mrf.mxu1 }
  0xe7   : > { %5363 = vmatmul.mubr.msk.f32.gmra.mxu0 %vm536_vm1, %v6372_v45  ;;  %v6724_v52 = vpop.f32.mrf.mxu0 }
  0xe8   : > { %5313 = vmatmul.mubr.msk.f32.gmra.mxu1 %vm536_vm1, %v7740_v28  ;;  %5365 = vmatprep.mubr.msk.f32.mxu0 %vm536_vm1, %v6376_v6  ;;  %v6728_v56 = vpop.f32.mrf.mxu1  ;;  %v7743_v6 = vld [vmem:[#allocation21_spill] sm:$0xff]  ;;  %v3707_v28 = vld [vmem:[#allocation2 + $0x280] sm:$0xff] }
  0xe9   : > { %5315 = vmatprep.mubr.msk.f32.mxu1 %vm536_vm1, %v7741_v40 }
  0xea   : > { %v6736_v33 = vpop.f32.mrf.mxu0 }
  0xeb   : > { %5366 = vmatmul.mubr.msk.f32.gmra.mxu0 %vm536_vm1, %v6388_v31  ;;  %v6738_v44 = vpop.f32.mrf.mxu1 }
  0xec   : > { %5316 = vmatmul.mubr.msk.f32.gmra.mxu1 %vm536_vm1, %v7742_v53  ;;  %5368 = vmatprep.mubr.msk.f32.mxu0 %vm536_vm1, %v6392_v54  ;;  %v6742_v13 = vpop.f32.mrf.mxu0  ;;  %v3317_v53 = vld [vmem:[#allocation2 + $0x160] sm:$0xff] }
  0xed   : > { %5318 = vmatprep.mubr.msk.f32.mxu1 %vm536_vm1, %v7743_v6  ;;  %v6746_v16 = vpop.f32.mrf.mxu1 }
  0xef   : > { %5369 = vmatmul.mubr.msk.f32.gmra.mxu0 %vm536_vm1, %v6406_v7  ;;  %v6752_v54 = vpop.f32.mrf.mxu0  ;;  %v7745_v7 = vld [vmem:[#allocation23_spill] sm:$0xff] }
  0xf0   : > { %5319 = vmatmul.mubr.msk.f32.gmra.mxu1 %vm536_vm1, %v7744_v9  ;;  %5371 = vmatprep.mubr.msk.f32.mxu0 %vm536_vm1, %v6410_v51  ;;  %v6754_v27 = vpop.f32.mrf.mxu1 }
  0xf1   : > { %5321 = vmatprep.mubr.msk.f32.mxu1 %vm536_vm1, %v6390_v4  ;;  %v6760_v42 = vpop.f32.mrf.mxu0 }
  0xf2   : > { %v6764_v31 = vpop.f32.mrf.mxu1 }
  0xf3   : > { %5372 = vmatmul.mubr.msk.f32.gmra.mxu0 %vm536_vm1, %v6426_v14  ;;  %v6784_v14 = vld [vmem:[#allocation2 + $0x340] sm:$0xff] }
  0xf4   : > { %5322 = vmatmul.mubr.msk.f32.gmra.mxu1 %vm536_vm1, %v7745_v7  ;;  %5374 = vmatprep.mubr.msk.f32.mxu0 %vm536_vm1, %v6430_v30  ;;  %v6768_v4 = vpop.f32.mrf.mxu0 }
  0xf5   : > { %5324 = vmatprep.mubr.msk.f32.mxu1 %vm536_vm1, %v6408_v8  ;;  %v6770_v51 = vpop.f32.mrf.mxu1  ;;  %v2953_v8 = vld [vmem:[#allocation2 + $0x110] sm:$0xff] }
  0xf6   : > { %v6778_v21 = vpop.f32.mrf.mxu0 }
  0xf7   : > { %5375 = vmatmul.mubr.msk.f32.gmra.mxu0 %vm536_vm1, %v6442_v48  ;;  %v6780_v45 = vpop.f32.mrf.mxu1 }
  0xf8   : > { %5325 = vmatmul.mubr.msk.f32.gmra.mxu1 %vm536_vm1, %v6421_v17  ;;  %5377 = vmatprep.mubr.msk.f32.mxu0 %vm536_vm1, %v6598_v38  ;;  %v6786_v30 = vpop.f32.mrf.mxu0  ;;  %v2954_v17 = vld [vmem:[#allocation2 + $0x118] sm:$0xff]  ;;  %v6799_v38 = vld [vmem:[#allocation2 + $0x348] sm:$0xff] }
  0xf9   : > { %5327 = vmatprep.mubr.msk.f32.mxu1 %vm536_vm1, %v7746_v60  ;;  %v6790_v48 = vpop.f32.mrf.mxu1 }
  0xfa   : > { %v6795_v58 = vpop.f32.mrf.mxu0 }
  0xfb   : > { %5378 = vmatmul.mubr.msk.f32.gmra.mxu0 %vm536_vm1, %v6610_v47  ;;  %v6801_v0 = vpop.f32.mrf.mxu1 }
  0xfc   : > { %5328 = vmatmul.mubr.msk.f32.gmra.mxu1 %vm536_vm1, %v6438_v41  ;;  %5380 = vmatprep.mubr.msk.f32.mxu0 %vm536_vm1, %v2953_v8  ;;  %v6803_v47 = vpop.f32.mrf.mxu0  ;;  %v3704_v41 = vld [vmem:[#allocation2 + $0x268] sm:$0xff] }
  0xfd   : > { %5330 = vmatprep.mubr.msk.f32.mxu1 %vm536_vm1, %v6784_v14  ;;  %v6806_v36 = vpop.f32.mrf.mxu1 }
  0xfe   : > { %v6811_v5 = vpop.f32.mrf.mxu0 }
  0xff   : > { %5381 = vmatmul.mubr.msk.f32.gmra.mxu0 %vm536_vm1, %v2954_v17  ;;  %v6814_v23 = vpop.f32.mrf.mxu1 }
 0x100   : > { %5331 = vmatmul.mubr.msk.f32.gmra.mxu1 %vm536_vm1, %v6799_v38  ;;  %5435 = vmatprep.mubr.msk.f32.mxu0 %vm536_vm1, %v3703_v49  ;;  %v5137_v22 = vpop.f32.mrf.mxu0 }
 0x101   : > { %5385 = vmatprep.mubr.msk.f32.mxu1 %vm536_vm1, %v3313_v24  ;;  %v5087_v43 = vpop.f32.mrf.mxu1  ;;  %v3318_v24 = vld [vmem:[#allocation2 + $0x168] sm:$0xff] }
 0x102   : > { %v1210_v26 = vadd.f32 %v5087_v43, %v6674_v25  ;;  %v1562_v11 = vpop.f32.mrf.mxu0  ;;  %v3708_v25 = vld [vmem:[#allocation2 + $0x288] sm:$0xff] }
 0x103   : > { %5436 = vmatmul.mubr.msk.f32.vlgmr.msra.gmra.mxu0 %vm536_vm1, %v3704_v41  ;;  %v1204_v40 = vpop.f32.mrf.mxu1  ;;  %v3709_v41 = vld [vmem:[#allocation2 + $0x290] sm:$0xff] }
 0x104   : > { %5386 = vmatmul.mubr.msk.f32.vlgmr.msra.gmra.mxu1 %vm536_vm1, %v3314_v20  ;;  %5438 = vmatprep.mubr.msk.f32.mxu0 %vm536_vm1, %v3705_v3  ;;  %v6821_v6 = vadd.f32 %v5137_v22, %v1210_v26  ;;  %v1205_v9 = vadd.f32 %v1204_v40, %v6684_v39  ;;  %v3319_v39 = vld [vmem:[#allocation2 + $0x170] sm:$0xff] }
 0x105   : > { %5388 = vmatprep.mubr.msk.f32.mxu1 %vm536_vm1, %v3315_v32  ;;  %v5140_v7 = vpop.f32.mrf.mxu0 }
 0x106   : > { %v6827_v8 = vadd.f32 %v1562_v11, %v1205_v9 }
 0x107   : > { %5439 = vmatmul.mubr.msk.f32.gmra.mxu0 %vm536_vm1, %v3706_v35  ;;  %v1572_v49 = vpop.f32.mrf.mxu0 }
 0x108   : > { %v5090_v60 = vpop.f32.mrf.mxu1  ;;  %5389 = vmatmul.mubr.msk.f32.gmra.mxu1 %vm536_vm1, %v3316_v15  ;;  %5441 = vmatprep.mubr.msk.f32.mxu0 %vm536_vm1, %v3707_v28  ;;  %v3320_v15 = vld [vmem:[#allocation2 + $0x178] sm:$0xff]  ;;  %v3711_v28 = vld [vmem:[#allocation2 + $0x2a0] sm:$0xff] }
 0x109   : > { %v1220_v17 = vadd.f32 %v5090_v60, %v6698_v1  ;;  %5391 = vmatprep.mubr.msk.f32.mxu1 %vm536_vm1, %v3317_v53  ;;  %v5143_v22 = vpop.f32.mrf.mxu0  ;;  %v3710_v1 = vld [vmem:[#allocation2 + $0x298] sm:$0xff] }
 0x10a   : > { %v1214_v20 = vpop.f32.mrf.mxu1 }
 0x10b   : > { %v6831_v3 = vadd.f32 %v5140_v7, %v1220_v17  ;;  %v1215_v32 = vadd.f32 %v1214_v20, %v6708_v55  ;;  %5442 = vmatmul.mubr.msk.f32.gmra.mxu0 %vm536_vm1, %v3708_v25  ;;  %v1582_v11 = vpop.f32.mrf.mxu0  ;;  %v3321_v55 = vld [vmem:[#allocation2 + $0x180] sm:$0xff] }
 0x10c   : > { %v5093_v43 = vpop.f32.mrf.mxu1  ;;  %5392 = vmatmul.mubr.msk.f32.gmra.mxu1 %vm536_vm1, %v3318_v24  ;;  %5444 = vmatprep.mubr.msk.f32.mxu0 %vm536_vm1, %v3709_v41  ;;  %v3322_v24 = vld [vmem:[#allocation2 + $0x188] sm:$0xff]  ;;  %v3713_v41 = vld [vmem:[#allocation2 + $0x2b0] sm:$0xff] }
 0x10d   : > { %v6837_v35 = vadd.f32 %v1572_v49, %v1215_v32  ;;  %v1230_v26 = vadd.f32 %v5093_v43, %v6718_v37  ;;  %5394 = vmatprep.mubr.msk.f32.mxu1 %vm536_vm1, %v3319_v39  ;;  %v3712_v37 = vld [vmem:[#allocation2 + $0x2a8] sm:$0xff] }
 0x10e   : > { %v1224_v40 = vpop.f32.mrf.mxu1 }
 0x10f   : > { %v6841_v53 = vadd.f32 %v5143_v22, %v1230_v26  ;;  %v1225_v9 = vadd.f32 %v1224_v40, %v6724_v52  ;;  %v5146_v7 = vpop.f32.mrf.mxu0  ;;  %5445 = vmatmul.mubr.msk.f32.gmra.mxu0 %vm536_vm1, %v3710_v1  ;;  %v3323_v52 = vld [vmem:[#allocation2 + $0x190] sm:$0xff] }
 0x110   : > { %v5096_v60 = vpop.f32.mrf.mxu1  ;;  %5395 = vmatmul.mubr.msk.f32.gmra.mxu1 %vm536_vm1, %v3320_v15  ;;  %5447 = vmatprep.mubr.msk.f32.mxu0 %vm536_vm1, %v3711_v28  ;;  %v3324_v15 = vld [vmem:[#allocation2 + $0x198] sm:$0xff]  ;;  %v3715_v28 = vld [vmem:[#allocation2 + $0x2c0] sm:$0xff] }
 0x111   : > { %v6847_v25 = vadd.f32 %v1582_v11, %v1225_v9  ;;  %v1240_v17 = vadd.f32 %v5096_v60, %v6736_v33  ;;  %v1592_v49 = vpop.f32.mrf.mxu0  ;;  %5397 = vmatprep.mubr.msk.f32.mxu1 %vm536_vm1, %v3321_v55  ;;  %v3714_v33 = vld [vmem:[#allocation2 + $0x2b8] sm:$0xff]  ;;  %v3716_v60 = vld [vmem:[#allocation2 + $0x2c8] sm:$0xff] }
 0x112   : > { %v1234_v20 = vpop.f32.mrf.mxu1 }
 0x113   : > { %v6851_v39 = vadd.f32 %v5146_v7, %v1240_v17  ;;  %v1235_v32 = vadd.f32 %v1234_v20, %v6742_v13  ;;  %v5149_v22 = vpop.f32.mrf.mxu0  ;;  %5448 = vmatmul.mubr.msk.f32.gmra.mxu0 %vm536_vm1, %v3712_v37 }
 0x114   : > { %v5099_v43 = vpop.f32.mrf.mxu1  ;;  %5398 = vmatmul.mubr.msk.f32.gmra.mxu1 %vm536_vm1, %v3322_v24  ;;  %5450 = vmatprep.mubr.msk.f32.mxu0 %vm536_vm1, %v3713_v41 }
 0x115   : > { %v6857_v1 = vadd.f32 %v1592_v49, %v1235_v32  ;;  %v1250_v26 = vadd.f32 %v5099_v43, %v6752_v54  ;;  %v1602_v11 = vpop.f32.mrf.mxu0  ;;  %5400 = vmatprep.mubr.msk.f32.mxu1 %vm536_vm1, %v3323_v52  ;;  %v3717_v49 = vld [vmem:[#allocation2 + $0x2d0] sm:$0xff]  ;;  %v3719_v43 = vld [vmem:[#allocation2 + $0x2e0] sm:$0xff] }
 0x116   : > { %v1244_v40 = vpop.f32.mrf.mxu1 }
 0x117   : > { %v6861_v13 = vadd.f32 %v5149_v22, %v1250_v26  ;;  %v1245_v55 = vadd.f32 %v1244_v40, %v6760_v42  ;;  %v5152_v9 = vpop.f32.mrf.mxu0  ;;  %5451 = vmatmul.mubr.msk.f32.gmra.mxu0 %vm536_vm1, %v3714_v33  ;;  %v3721_v40 = vld [vmem:[#allocation2 + $0x2f0] sm:$0xff] }
 0x118   : > { %v5102_v7 = vpop.f32.mrf.mxu1  ;;  %5401 = vmatmul.mubr.msk.f32.gmra.mxu1 %vm536_vm1, %v3324_v15  ;;  %5453 = vmatprep.mubr.msk.f32.mxu0 %vm536_vm1, %v3715_v28 }
 0x119   : > { %v6867_v54 = vadd.f32 %v1602_v11, %v1245_v55  ;;  %v1260_v37 = vadd.f32 %v5102_v7, %v6768_v4  ;;  %v1612_v17 = vpop.f32.mrf.mxu0  ;;  %5403 = vmatprep.mubr.msk.f32.mxu1 %vm536_vm1, %v6518_v19  ;;  %v3718_v4 = vld [vmem:[#allocation2 + $0x2d8] sm:$0xff] }
 0x11a   : > { %v1254_v24 = vpop.f32.mrf.mxu1 }
 0x11b   : > { %v6872_v42 = vadd.f32 %v5152_v9, %v1260_v37  ;;  %v1255_v41 = vadd.f32 %v1254_v24, %v6778_v21  ;;  %v5155_v20 = vpop.f32.mrf.mxu0  ;;  %5454 = vmatmul.mubr.msk.f32.gmra.mxu0 %vm536_vm1, %v3716_v60  ;;  %v3333_v24 = vld [vmem:[#allocation2 + $0x1e0] sm:$0xff] }
 0x11c   : > { %v5105_v52 = vpop.f32.mrf.mxu1  ;;  %5404 = vmatmul.mubr.msk.f32.gmra.mxu1 %vm536_vm1, %v6526_v29  ;;  %5456 = vmatprep.mubr.msk.f32.mxu0 %vm536_vm1, %v3717_v49 }
 0x11d   : > { %v6879_v32 = vadd.f32 %v1612_v17, %v1255_v41  ;;  %v1270_v19 = vadd.f32 %v5105_v52, %v6786_v30  ;;  %v1622_v22 = vpop.f32.mrf.mxu0  ;;  %5406 = vmatprep.mubr.msk.f32.mxu1 %vm536_vm1, %v6530_v2  ;;  %v3720_v30 = vld [vmem:[#allocation2 + $0x2e8] sm:$0xff]  ;;  %v3332_v17 = vld [vmem:[#allocation2 + $0x1d8] sm:$0xff] }
 0x11e   : > { %v1264_v21 = vpop.f32.mrf.mxu1 }
 0x11f   : > { %v6884_v33 = vadd.f32 %v5155_v20, %v1270_v19  ;;  %v1265_v26 = vadd.f32 %v1264_v21, %v6795_v58  ;;  %v5158_v11 = vpop.f32.mrf.mxu0  ;;  %5457 = vmatmul.mubr.msk.f32.gmra.mxu0 %vm536_vm1, %v3718_v4 }
 0x120   : > { %v5108_v29 = vpop.f32.mrf.mxu1  ;;  %5407 = vmatmul.mubr.msk.f32.gmra.mxu1 %vm536_vm1, %v6538_v18  ;;  %5459 = vmatprep.mubr.msk.f32.mxu0 %vm536_vm1, %v3719_v43  ;;  %v3725_v43 = vld [vmem:[#allocation2 + $0x310] sm:$0xff] }
 0x121   : > { %v6891_v15 = vadd.f32 %v1622_v22, %v1265_v26  ;;  %v1280_v2 = vadd.f32 %v5108_v29, %v6803_v47  ;;  %v1632_v28 = vpop.f32.mrf.mxu0  ;;  %5409 = vmatprep.mubr.msk.f32.mxu1 %vm536_vm1, %v6542_v50  ;;  %v3722_v47 = vld [vmem:[#allocation2 + $0x2f8] sm:$0xff]  ;;  %v3334_v22 = vld [vmem:[#allocation2 + $0x1e8] sm:$0xff] }
 0x122   : > { %v1274_v58 = vpop.f32.mrf.mxu1 }
 0x123   : > { %v6896_v55 = vadd.f32 %v5158_v11, %v1280_v2  ;;  %v1275_v9 = vadd.f32 %v1274_v58, %v6811_v5  ;;  %v5161_v7 = vpop.f32.mrf.mxu0  ;;  %5460 = vmatmul.mubr.msk.f32.gmra.mxu0 %vm536_vm1, %v3720_v30  ;;  %v3723_v5 = vld [vmem:[#allocation2 + $0x300] sm:$0xff]  ;;  %v3336_v58 = vld [vmem:[#allocation2 + $0x1f8] sm:$0xff] }
 0x124   : > { %v5111_v18 = vpop.f32.mrf.mxu1  ;;  %5410 = vmatmul.mubr.msk.f32.gmra.mxu1 %vm536_vm1, %v6550_v63  ;;  %5462 = vmatprep.mubr.msk.f32.mxu0 %vm536_vm1, %v3721_v40 }
 0x125   : > { %v6903_v60 = vadd.f32 %v1632_v28, %v1275_v9  ;;  %v1290_v50 = vadd.f32 %v5111_v18, %v6690_v62  ;;  %v1642_v37 = vpop.f32.mrf.mxu0  ;;  %5412 = vmatprep.mubr.msk.f32.mxu1 %vm536_vm1, %v6554_v57  ;;  %v3724_v62 = vld [vmem:[#allocation2 + $0x308] sm:$0xff]  ;;  %v3727_v9 = vld [vmem:[#allocation2 + $0x320] sm:$0xff] }
 0x126   : > { %v1284_v49 = vpop.f32.mrf.mxu1 }
 0x127   : > { %v6908_v41 = vadd.f32 %v5161_v7, %v1290_v50  ;;  %v1285_v20 = vadd.f32 %v1284_v49, %v6694_v46  ;;  %v5164_v63 = vpop.f32.mrf.mxu0  ;;  %5463 = vmatmul.mubr.msk.f32.gmra.mxu0 %vm536_vm1, %v3722_v47  ;;  %v3335_v46 = vld [vmem:[#allocation2 + $0x1f0] sm:$0xff] }
 0x128   : > { %v5114_v52 = vpop.f32.mrf.mxu1  ;;  %5413 = vmatmul.mubr.msk.f32.gmra.mxu1 %vm536_vm1, %v3332_v17  ;;  %5465 = vmatprep.mubr.msk.f32.mxu0 %vm536_vm1, %v3723_v5 }
 0x129   : > { %v6914_v4 = vadd.f32 %v1642_v37, %v1285_v20  ;;  %v1300_v57 = vadd.f32 %v5114_v52, %v6704_v34  ;;  %v1652_v19 = vpop.f32.mrf.mxu0  ;;  %5415 = vmatprep.mubr.msk.f32.mxu1 %vm536_vm1, %v3333_v24  ;;  %v3726_v34 = vld [vmem:[#allocation2 + $0x318] sm:$0xff]  ;;  %v3338_v24 = vld [vmem:[#allocation2 + $0x208] sm:$0xff]  ;;  %v3729_v20 = vld [vmem:[#allocation2 + $0x330] sm:$0xff] }
 0x12a   : > { %v1294_v21 = vpop.f32.mrf.mxu1 }
 0x12b   : > { %v6918_v26 = vadd.f32 %v5164_v63, %v1300_v57  ;;  %v1295_v11 = vadd.f32 %v1294_v21, %v6710_v10  ;;  %v5167_v29 = vpop.f32.mrf.mxu0  ;;  %5466 = vmatmul.mubr.msk.f32.gmra.mxu0 %vm536_vm1, %v3724_v62  ;;  %v3337_v10 = vld [vmem:[#allocation2 + $0x200] sm:$0xff] }
 0x12c   : > { %v5117_v30 = vpop.f32.mrf.mxu1  ;;  %5416 = vmatmul.mubr.msk.f32.gmra.mxu1 %vm536_vm1, %v3334_v22  ;;  %5468 = vmatprep.mubr.msk.f32.mxu0 %vm536_vm1, %v3725_v43 }
 0x12d   : > { %v6924_v2 = vadd.f32 %v1652_v19, %v1295_v11  ;;  %v1310_v28 = vadd.f32 %v5117_v30, %v6722_v61  ;;  %v1662_v40 = vpop.f32.mrf.mxu0  ;;  %5418 = vmatprep.mubr.msk.f32.mxu1 %vm536_vm1, %v3335_v46  ;;  %v3728_v61 = vld [vmem:[#allocation2 + $0x328] sm:$0xff]  ;;  %v3340_v46 = vld [vmem:[#allocation2 + $0x218] sm:$0xff] }
 0x12e   : > { %v1304_v7 = vpop.f32.mrf.mxu1 }
 0x12f   : > { %v6928_v18 = vadd.f32 %v5167_v29, %v1310_v28  ;;  %v1305_v47 = vadd.f32 %v1304_v7, %v6728_v56  ;;  %v5170_v50 = vpop.f32.mrf.mxu0  ;;  %5469 = vmatmul.mubr.msk.f32.gmra.mxu0 %vm536_vm1, %v3726_v34  ;;  %v3339_v56 = vld [vmem:[#allocation2 + $0x210] sm:$0xff] }
 0x130   : > { %v5120_v37 = vpop.f32.mrf.mxu1  ;;  %5419 = vmatmul.mubr.msk.f32.gmra.mxu1 %vm536_vm1, %v3336_v58  ;;  %5471 = vmatprep.mubr.msk.f32.mxu0 %vm536_vm1, %v3727_v9  ;;  %v3733_v58 = vld [vmem:[#allocation2 + $0x350] sm:$0xff] }
 0x131   : > { %v6934_v17 = vadd.f32 %v1662_v40, %v1305_v47  ;;  %v1320_v5 = vadd.f32 %v5120_v37, %v6738_v44  ;;  %v1672_v49 = vpop.f32.mrf.mxu0  ;;  %5421 = vmatprep.mubr.msk.f32.mxu1 %vm536_vm1, %v3337_v10  ;;  %v3730_v44 = vld [vmem:[#allocation2 + $0x338] sm:$0xff] }
 0x132   : > { %v1314_v63 = vpop.f32.mrf.mxu1 }
 0x133   : > { %v6938_v52 = vadd.f32 %v5170_v50, %v1320_v5  ;;  %v1315_v62 = vadd.f32 %v1314_v63, %v6746_v16  ;;  %v5173_v57 = vpop.f32.mrf.mxu0  ;;  %5472 = vmatmul.mubr.msk.f32.gmra.mxu0 %vm536_vm1, %v3728_v61  ;;  %v3344_v61 = vld [vmem:[#allocation2 + $0x238] sm:$0xff] }
 0x134   : > { %v5123_v19 = vpop.f32.mrf.mxu1  ;;  %5422 = vmatmul.mubr.msk.f32.gmra.mxu1 %vm536_vm1, %v3338_v24  ;;  %5474 = vmatprep.mubr.msk.f32.mxu0 %vm536_vm1, %v3729_v20 }
 0x135   : > { %v6944_v22 = vadd.f32 %v1672_v49, %v1315_v62  ;;  %v1330_v43 = vadd.f32 %v5123_v19, %v6754_v27  ;;  %v1682_v21 = vpop.f32.mrf.mxu0  ;;  %5424 = vmatprep.mubr.msk.f32.mxu1 %vm536_vm1, %v3339_v56 }
 0x136   : > { %v1324_v11 = vpop.f32.mrf.mxu1 }
 0x137   : > { %v6948_v29 = vadd.f32 %v5173_v57, %v1330_v43  ;;  %v1325_v16 = vadd.f32 %v1324_v11, %v6764_v31  ;;  %v5176_v30 = vpop.f32.mrf.mxu0  ;;  %5475 = vmatmul.mubr.msk.f32.gmra.mxu0 %vm536_vm1, %v3730_v44  ;;  %v3343_v31 = vld [vmem:[#allocation2 + $0x230] sm:$0xff] }
 0x138   : > { %v5126_v34 = vpop.f32.mrf.mxu1  ;;  %5425 = vmatmul.mubr.msk.f32.gmra.mxu1 %vm536_vm1, %v3340_v46  ;;  %5477 = vmatprep.mubr.msk.f32.mxu0 %vm536_vm1, %v6784_v14 }
 0x139   : > { %v6955_v28 = vadd.f32 %v1682_v21, %v1325_v16  ;;  %v1340_v27 = vadd.f32 %v5126_v34, %v6770_v51  ;;  %v1692_v40 = vpop.f32.mrf.mxu0  ;;  %5427 = vmatprep.mubr.msk.f32.mxu1 %vm536_vm1, %v6596_v59  ;;  %v3734_v51 = vld [vmem:[#allocation2 + $0x358] sm:$0xff] }
 0x13a   : > { %v1334_v9 = vpop.f32.mrf.mxu1 }
 0x13b   : > { %v6960_v7 = vadd.f32 %v5176_v30, %v1340_v27  ;;  %v1335_v10 = vadd.f32 %v1334_v9, %v6780_v45  ;;  %v5179_v47 = vpop.f32.mrf.mxu0  ;;  %5478 = vmatmul.mubr.msk.f32.gmra.mxu0 %vm536_vm1, %v6799_v38 }
 0x13c   : > { %v5129_v14 = vpop.f32.mrf.mxu1  ;;  %5428 = vmatmul.mubr.msk.f32.gmra.mxu1 %vm536_vm1, %v6606_v12  ;;  %5480 = vmatprep.mubr.msk.f32.mxu0 %vm536_vm1, %v3733_v58 }
 0x13d   : > { %v6968_v50 = vadd.f32 %v1692_v40, %v1335_v10  ;;  %v1350_v59 = vadd.f32 %v5129_v14, %v6790_v48  ;;  %v1702_v37 = vpop.f32.mrf.mxu0  ;;  %5430 = vmatprep.mubr.msk.f32.mxu1 %vm536_vm1, %v3343_v31 }
 0x13e   : > { %v1344_v45 = vpop.f32.mrf.mxu1 }
 0x13f   : > { %v6972_v5 = vadd.f32 %v5179_v47, %v1350_v59  ;;  %v1345_v38 = vadd.f32 %v1344_v45, %v6801_v0  ;;  %v5182_v49 = vpop.f32.mrf.mxu0  ;;  %5481 = vmatmul.mubr.msk.f32.gmra.mxu0 %vm536_vm1, %v3734_v51 }
 0x140   : > { %v5132_v12 = vpop.f32.mrf.mxu1  ;;  %5431 = vmatmul.mubr.msk.f32.gmra.mxu1 %vm536_vm1, %v3344_v61 }
 0x141   : > { %v6977_v24 = vadd.f32 %v1702_v37, %v1345_v38  ;;  %v1360_v20 = vadd.f32 %v5132_v12, %v6806_v36  ;;  %v1712_v48 = vpop.f32.mrf.mxu0 }
 0x142   : > { %v1354_v63 = vpop.f32.mrf.mxu1 }
 0x143   : > { %v6980_v56 = vadd.f32 %v5182_v49, %v1360_v20  ;;  %v1355_v62 = vadd.f32 %v1354_v63, %v6814_v23  ;;  %v5237_v57 = vpop.f32.mrf.mxu0 }
 0x144   : > { %v5187_v19 = vpop.f32.mrf.mxu1 }
 0x145   : > { %v6983_v44 = vadd.f32 %v1712_v48, %v1355_v62  ;;  %v2112_v0 = vadd.f32 %v5187_v19, %v6821_v6  ;;  %v2342_v43 = vpop.f32.mrf.mxu0 }
 0x146   : > { %v1952_v21 = vpop.f32.mrf.mxu1 }
 0x147   : > { %v6986_v46 = vadd.f32 %v5237_v57, %v2112_v0  ;;  %v2111_v11 = vadd.f32 %v1952_v21, %v6827_v8  ;;  %v5240_v16 = vpop.f32.mrf.mxu0 }
 0x148   : > { %v5190_v36 = vpop.f32.mrf.mxu1 }
 0x149   : > { %v6989_v30 = vadd.f32 %v2342_v43, %v2111_v11  ;;  %v2114_v34 = vadd.f32 %v5190_v36, %v6831_v3  ;;  %v2352_v27 = vpop.f32.mrf.mxu0 }
 0x14a   : > { %v1962_v23 = vpop.f32.mrf.mxu1 }
 0x14b   : > { %v6992_v40 = vadd.f32 %v5240_v16, %v2114_v34  ;;  %v2113_v58 = vadd.f32 %v1962_v23, %v6837_v35  ;;  %v5243_v9 = vpop.f32.mrf.mxu0 }
 0x14c   : > { %v5193_v6 = vpop.f32.mrf.mxu1 }
 0x14d   : > { %v6995_v31 = vadd.f32 %v2352_v27, %v2113_v58  ;;  %v2116_v10 = vadd.f32 %v5193_v6, %v6841_v53  ;;  %v2362_v47 = vpop.f32.mrf.mxu0 }
 0x14e   : > { %v1972_v8 = vpop.f32.mrf.mxu1 }
 0x14f   : > { %v6998_v14 = vadd.f32 %v5243_v9, %v2116_v10  ;;  %v2115_v51 = vadd.f32 %v1972_v8, %v6847_v25  ;;  %v5246_v59 = vpop.f32.mrf.mxu0 }
 0x150   : > { %v5196_v3 = vpop.f32.mrf.mxu1 }
 0x151   : > { %v7001_v37 = vadd.f32 %v2362_v47, %v2115_v51  ;;  %v2118_v61 = vadd.f32 %v5196_v3, %v6851_v39  ;;  %v2372_v45 = vpop.f32.mrf.mxu0 }
 0x152   : > { %v1982_v35 = vpop.f32.mrf.mxu1 }
 0x153   : > { %v7004_v38 = vadd.f32 %v5246_v59, %v2118_v61  ;;  %v2117_v49 = vadd.f32 %v1982_v35, %v6857_v1  ;;  %v5249_v12 = vpop.f32.mrf.mxu0 }
 0x154   : > { %v5199_v53 = vpop.f32.mrf.mxu1 }
 0x155   : > { %v7007_v20 = vadd.f32 %v2372_v45, %v2117_v49  ;;  %v2120_v48 = vadd.f32 %v5199_v53, %v6861_v13  ;;  %v2382_v63 = vpop.f32.mrf.mxu0 }
 0x156   : > { %v1992_v25 = vpop.f32.mrf.mxu1 }
 0x157   : > { %v7010_v62 = vadd.f32 %v5249_v12, %v2120_v48  ;;  %v2119_v57 = vadd.f32 %v1992_v25, %v6867_v54  ;;  %v5252_v19 = vpop.f32.mrf.mxu0 }
 0x158   : > { %v5202_v39 = vpop.f32.mrf.mxu1 }
 0x159   : > { %v7013_v0 = vadd.f32 %v2382_v63, %v2119_v57  ;;  %v2122_v43 = vadd.f32 %v5202_v39, %v6872_v42  ;;  %v2392_v21 = vpop.f32.mrf.mxu0 }
 0x15a   : > { %v2002_v1 = vpop.f32.mrf.mxu1 }
 0x15b   : > { %v7016_v11 = vadd.f32 %v5252_v19, %v2122_v43  ;;  %v2121_v16 = vadd.f32 %v2002_v1, %v6879_v32  ;;  %v5255_v36 = vpop.f32.mrf.mxu0 }
 0x15c   : > { %v5205_v13 = vpop.f32.mrf.mxu1 }
 0x15d   : > { %v7019_v34 = vadd.f32 %v2392_v21, %v2121_v16  ;;  %v2124_v27 = vadd.f32 %v5205_v13, %v6884_v33  ;;  %v2402_v23 = vpop.f32.mrf.mxu0 }
 0x15e   : > { %v2012_v54 = vpop.f32.mrf.mxu1 }
 0x15f   : > { %v7022_v58 = vadd.f32 %v5255_v36, %v2124_v27  ;;  %v2123_v9 = vadd.f32 %v2012_v54, %v6891_v15  ;;  %v5258_v6 = vpop.f32.mrf.mxu0 }
 0x160   : > { %v5208_v42 = vpop.f32.mrf.mxu1 }
 0x161   : > { %v7025_v10 = vadd.f32 %v2402_v23, %v2123_v9  ;;  %v2126_v47 = vadd.f32 %v5208_v42, %v6896_v55  ;;  %v2412_v8 = vpop.f32.mrf.mxu0 }
 0x162   : > { %v2022_v32 = vpop.f32.mrf.mxu1 }
 0x163   : > { %v7028_v51 = vadd.f32 %v5258_v6, %v2126_v47  ;;  %v2125_v59 = vadd.f32 %v2022_v32, %v6903_v60  ;;  %v5261_v3 = vpop.f32.mrf.mxu0 }
 0x164   : > { %v5211_v33 = vpop.f32.mrf.mxu1 }
 0x165   : > { %v7031_v61 = vadd.f32 %v2412_v8, %v2125_v59  ;;  %v2128_v45 = vadd.f32 %v5211_v33, %v6908_v41  ;;  %v2422_v35 = vpop.f32.mrf.mxu0 }
 0x166   : > { %v2032_v15 = vpop.f32.mrf.mxu1 }
 0x167   : > { %v7034_v49 = vadd.f32 %v5261_v3, %v2128_v45  ;;  %v2127_v12 = vadd.f32 %v2032_v15, %v6914_v4  ;;  %v5264_v53 = vpop.f32.mrf.mxu0 }
 0x168   : > { %v5214_v55 = vpop.f32.mrf.mxu1 }
 0x169   : > { %v7037_v48 = vadd.f32 %v2422_v35, %v2127_v12  ;;  %v2130_v63 = vadd.f32 %v5214_v55, %v6918_v26  ;;  %v2432_v25 = vpop.f32.mrf.mxu0 }
 0x16a   : > { %v2042_v60 = vpop.f32.mrf.mxu1 }
 0x16b   : > { %v7040_v57 = vadd.f32 %v5264_v53, %v2130_v63  ;;  %v2129_v19 = vadd.f32 %v2042_v60, %v6924_v2  ;;  %v5267_v39 = vpop.f32.mrf.mxu0 }
 0x16c   : > { %v5217_v41 = vpop.f32.mrf.mxu1 }
 0x16d   : > { %7747 = vst [vmem:[#allocation3_spill] sm:$0xff] %v7040_v57  ;;  %v7043_v43 = vadd.f32 %v2432_v25, %v2129_v19  ;;  %v2132_v21 = vadd.f32 %v5217_v41, %v6928_v18  ;;  %v2442_v1 = vpop.f32.mrf.mxu0 }
 0x16e   : > { %v2052_v4 = vpop.f32.mrf.mxu1 }
 0x16f   : > { %7748 = vst [vmem:[#allocation4_spill] sm:$0xff] %v7043_v43  ;;  %v7046_v16 = vadd.f32 %v5267_v39, %v2132_v21  ;;  %v2131_v36 = vadd.f32 %v2052_v4, %v6934_v17  ;;  %v5270_v13 = vpop.f32.mrf.mxu0 }
 0x170   : > { %v5220_v26 = vpop.f32.mrf.mxu1 }
 0x171   : > { %7749 = vst [vmem:[#allocation5_spill] sm:$0xff] %v7046_v16  ;;  %v7049_v27 = vadd.f32 %v2442_v1, %v2131_v36  ;;  %v2134_v23 = vadd.f32 %v5220_v26, %v6938_v52  ;;  %v2452_v54 = vpop.f32.mrf.mxu0 }
 0x172   : > { %v2062_v2 = vpop.f32.mrf.mxu1 }
 0x173   : > { %7750 = vst [vmem:[#allocation6_spill] sm:$0xff] %v7049_v27  ;;  %v7052_v9 = vadd.f32 %v5270_v13, %v2134_v23  ;;  %v2133_v6 = vadd.f32 %v2062_v2, %v6944_v22  ;;  %v5273_v42 = vpop.f32.mrf.mxu0 }
 0x174   : > { %v5223_v18 = vpop.f32.mrf.mxu1 }
 0x175   : > { %7751 = vst [vmem:[#allocation7_spill] sm:$0xff] %v7052_v9  ;;  %v7055_v47 = vadd.f32 %v2452_v54, %v2133_v6  ;;  %v2136_v8 = vadd.f32 %v5223_v18, %v6948_v29  ;;  %v2462_v32 = vpop.f32.mrf.mxu0 }
 0x176   : > { %v2072_v17 = vpop.f32.mrf.mxu1 }
 0x177   : > { %7752 = vst [vmem:[#allocation8_spill] sm:$0xff] %v7055_v47  ;;  %v7058_v59 = vadd.f32 %v5273_v42, %v2136_v8  ;;  %v2135_v3 = vadd.f32 %v2072_v17, %v6955_v28  ;;  %v5276_v33 = vpop.f32.mrf.mxu0 }
 0x178   : > { %v5226_v52 = vpop.f32.mrf.mxu1 }
 0x179   : > { %7753 = vst [vmem:[#allocation9_spill] sm:$0xff] %v7058_v59  ;;  %v7061_v45 = vadd.f32 %v2462_v32, %v2135_v3  ;;  %v2138_v35 = vadd.f32 %v5226_v52, %v6960_v7  ;;  %v2472_v15 = vpop.f32.mrf.mxu0 }
 0x17a   : > { %v2082_v22 = vpop.f32.mrf.mxu1 }
 0x17b   : > { %7754 = vst [vmem:[#allocation10_spill] sm:$0xff] %v7061_v45  ;;  %v7064_v12 = vadd.f32 %v5276_v33, %v2138_v35  ;;  %v2137_v53 = vadd.f32 %v2082_v22, %v6968_v50  ;;  %v5279_v55 = vpop.f32.mrf.mxu0 }
 0x17c   : > { %v5229_v29 = vpop.f32.mrf.mxu1 }
 0x17d   : > { %7755 = vst [vmem:[#allocation11_spill] sm:$0xff] %v7064_v12  ;;  %v7067_v63 = vadd.f32 %v2472_v15, %v2137_v53  ;;  %v2140_v25 = vadd.f32 %v5229_v29, %v6972_v5  ;;  %v2482_v60 = vpop.f32.mrf.mxu0 }
 0x17e   : > { %v2092_v28 = vpop.f32.mrf.mxu1 }
 0x17f   : > { %7756 = vst [vmem:[#allocation12_spill] sm:$0xff] %v7067_v63  ;;  %v7070_v19 = vadd.f32 %v5279_v55, %v2140_v25  ;;  %v2139_v39 = vadd.f32 %v2092_v28, %v6977_v24  ;;  %v5282_v41 = vpop.f32.mrf.mxu0 }
 0x180   : > { %v5232_v7 = vpop.f32.mrf.mxu1 }
 0x181   : > { %7757 = vst [vmem:[#allocation13_spill] sm:$0xff] %v7070_v19  ;;  %v7073_v21 = vadd.f32 %v2482_v60, %v2139_v39  ;;  %v2142_v1 = vadd.f32 %v5232_v7, %v6980_v56  ;;  %v2492_v4 = vpop.f32.mrf.mxu0 }
 0x182   : > { %v2102_v50 = vpop.f32.mrf.mxu1 }
 0x183   : > { %7758 = vst [vmem:[#allocation14_spill] sm:$0xff] %v7073_v21  ;;  %v7076_v36 = vadd.f32 %v5282_v41, %v2142_v1  ;;  %v2141_v13 = vadd.f32 %v2102_v50, %v6983_v44  ;;  %v7079_v26 = vpop.f32.mrf.mxu0 }
 0x184   : > { %v5287_v5 = vpop.f32.mrf.mxu1 }
 0x185   : > { %7759 = vst [vmem:[#allocation15_spill] sm:$0xff] %v7076_v36  ;;  %v7081_v23 = vadd.f32 %v2492_v4, %v2141_v13  ;;  %v7083_v54 = vpop.f32.mrf.mxu0 }
 0x186   : > { %v2732_v24 = vpop.f32.mrf.mxu1 }
 0x187   : > { %7760 = vst [vmem:[#allocation16_spill] sm:$0xff] %v7081_v23  ;;  %v7085_v2 = vpop.f32.mrf.mxu0 }
 0x188   : > { %v5290_v6 = vpop.f32.mrf.mxu1 }
 0x189   : > { %v7087_v42 = vpop.f32.mrf.mxu0 }
 0x18a   : > { %v7089_v56 = vpop.f32.mrf.mxu1 }
 0x18b   : > { %v7091_v18 = vpop.f32.mrf.mxu0 }
 0x18c   : > { %v7093_v8 = vpop.f32.mrf.mxu1 }
 0x18d   : > { %v7095_v44 = vpop.f32.mrf.mxu0 }
 0x18e   : > { %v7097_v32 = vpop.f32.mrf.mxu1 }
 0x18f   : > { %v7099_v17 = vpop.f32.mrf.mxu0 }
 0x190   : > { %v7101_v3 = vpop.f32.mrf.mxu1 }
 0x191   : > { %v7103_v33 = vpop.f32.mrf.mxu0 }
 0x192   : > { %v7105_v52 = vpop.f32.mrf.mxu1 }
 0x193   : > { %v7107_v35 = vpop.f32.mrf.mxu0 }
 0x194   : > { %v7109_v15 = vpop.f32.mrf.mxu1 }
 0x195   : > { %v7111_v22 = vpop.f32.mrf.mxu0 }
 0x196   : > { %v7113_v53 = vpop.f32.mrf.mxu1 }
 0x197   : > { %v7115_v55 = vpop.f32.mrf.mxu0 }
 0x198   : > { %v7117_v29 = vpop.f32.mrf.mxu1 }
 0x199   : > { %v7119_v25 = vpop.f32.mrf.mxu0 }
 0x19a   : > { %v7121_v60 = vpop.f32.mrf.mxu1 }
 0x19b   : > { %v7123_v28 = vpop.f32.mrf.mxu0 }
 0x19c   : > { %v7125_v39 = vpop.f32.mrf.mxu1 }
 0x19d   : > { %v7127_v41 = vpop.f32.mrf.mxu0 }
 0x19e   : > { %v7129_v7 = vpop.f32.mrf.mxu1 }
 0x19f   : > { %v7131_v1 = vpop.f32.mrf.mxu0 }
 0x1a0   : > { %v7133_v4 = vpop.f32.mrf.mxu1 }
 0x1a1   : > { %v7135_v50 = vpop.f32.mrf.mxu0 }
 0x1a2   : > { %v7137_v13 = vpop.f32.mrf.mxu1 }
 0x1a3   : > { %v7139_v23 = vpop.f32.mrf.mxu0 }
 0x1a4   : > { %v7141_v36 = vpop.f32.mrf.mxu1 }
 0x1a5   : > { %v7143_v21 = vpop.f32.mrf.mxu0 }
 0x1a6   : > { %7761 = vst [vmem:[#allocation17_spill] sm:$0xff] %v7143_v21  ;;  %v7145_v19 = vpop.f32.mrf.mxu1 }
 0x1a7   : > { %v7147_v63 = vpop.f32.mrf.mxu0 }
 0x1a8   : > { %7762 = vst [vmem:[#allocation18_spill] sm:$0xff] %v7147_v63  ;;  %v7149_v12 = vpop.f32.mrf.mxu1 }
 0x1a9   : > { %7763 = vst [vmem:[#allocation19_spill] sm:$0xff] %v7149_v12  ;;  %v7151_v45 = vpop.f32.mrf.mxu0 }
 0x1aa   : > { %7764 = vst [vmem:[#allocation20_spill] sm:$0xff] %v7151_v45  ;;  %v7153_v59 = vpop.f32.mrf.mxu1 }
 0x1ab   : > { %7765 = vst [vmem:[#allocation21_spill] sm:$0xff] %v7153_v59  ;;  %v7155_v47 = vpop.f32.mrf.mxu0 }
 0x1ac   : > { %7766 = vst [vmem:[#allocation22_spill] sm:$0xff] %v7155_v47  ;;  %v7157_v9 = vpop.f32.mrf.mxu1 }
 0x1ad   : > { %7767 = vst [vmem:[#allocation23_spill] sm:$0xff] %v7157_v9  ;;  %v7159_v27 = vpop.f32.mrf.mxu0 }
 0x1ae   : > { %7768 = vst [vmem:[#allocation24_spill] sm:$0xff] %v7159_v27  ;;  %v7161_v16 = vpop.f32.mrf.mxu1 }
 0x1af   : > { %7769 = vst [vmem:[#allocation25_spill] sm:$0xff] %v7161_v16  ;;  %v7163_v43 = vpop.f32.mrf.mxu0 }
 0x1b0   : > { %7770 = vst [vmem:[#allocation26_spill] sm:$0xff] %v7163_v43  ;;  %v7165_v21 = vpop.f32.mrf.mxu1 }
 0x1b1   : > { %7771 = vst [vmem:[#allocation27_spill] sm:$0xff] %v7165_v21  ;;  %v7167_v57 = vpop.f32.mrf.mxu0 }
 0x1b2   : > { %7772 = vst [vmem:[#allocation28_spill] sm:$0xff] %v7167_v57  ;;  %v7169_v63 = vpop.f32.mrf.mxu1 }
 0x1b3   : > { %7773 = vst [vmem:[#allocation29_spill] sm:$0xff] %v7169_v63  ;;  %v7171_v12 = vpop.f32.mrf.mxu0 }
 0x1b4   : > { %7774 = vst [vmem:[#allocation30_spill] sm:$0xff] %v7171_v12  ;;  %v7173_v45 = vpop.f32.mrf.mxu1 }
 0x1b5   : > { %7775 = vst [vmem:[#allocation31_spill] sm:$0xff] %v7173_v45  ;;  %v7175_v59 = vpop.f32.mrf.mxu0 }
 0x1b6   : > { %7776 = vst [vmem:[#allocation32_spill] sm:$0xff] %v7175_v59  ;;  %v7177_v47 = vpop.f32.mrf.mxu1  ;;  %v2892_v59 = vadd.f32 %v5287_v5, %v6986_v46  ;;  %v2893_v46 = vadd.f32 %v7089_v56, %v6995_v31 }
 0x1b7   : > { %7777 = vst [vmem:[#allocation33_spill] sm:$0xff] %v7177_v47  ;;  %v7179_v9 = vpop.f32.mrf.mxu0 }
 0x1b8   : > { %7778 = vst [vmem:[#allocation34_spill] sm:$0xff] %v7179_v9  ;;  %v7181_v27 = vpop.f32.mrf.mxu1 }
 0x1b9   : > { %7779 = vst [vmem:[#allocation35_spill] sm:$0xff] %v7181_v27  ;;  %v7183_v16 = vpop.f32.mrf.mxu0  ;;  %v2891_v27 = vadd.f32 %v2732_v24, %v6989_v30  ;;  %v2896_v30 = vadd.f32 %v7093_v8, %v6998_v14  ;;  %v3283_v14 = vadd.f32 %v7087_v42, %v2893_v46 }
 0x1ba   : > { %7780 = vst [vmem:[#allocation36_spill] sm:$0xff] %v7183_v16  ;;  %v7185_v43 = vpop.f32.mrf.mxu1 }
 0x1bb   : > { %7781 = vst [vmem:[#allocation37_spill] sm:$0xff] %v7185_v43  ;;  %v7187_v21 = vpop.f32.mrf.mxu0 }
 0x1bc   : > { %7782 = vst [vmem:[#allocation38_spill] sm:$0xff] %v7187_v21  ;;  %v7189_v57 = vpop.f32.mrf.mxu1  ;;  %v3282_v21 = vadd.f32 %v7079_v26, %v2892_v59 }
 0x1bd   : > { %7783 = vst [vmem:[#allocation39_spill] sm:$0xff] %v7189_v57  ;;  %v7191_v63 = vpop.f32.mrf.mxu0  ;;  %v2894_v57 = vadd.f32 %v5290_v6, %v6992_v40 }
 0x1be   : > { %7784 = vst [vmem:[#allocation40_spill] sm:$0xff] %v7191_v63  ;;  %v7193_v12 = vpop.f32.mrf.mxu1 }
 0x1bf   : > { %7785 = vst [vmem:[#allocation41_spill] sm:$0xff] %v7193_v12  ;;  %v7196_v47 = vpop.f32.mrf.mxu0  ;;  %v3281_v12 = vadd.f32 %v7083_v54, %v2891_v27  ;;  %v3284_v59 = vadd.f32 %v7085_v2, %v2894_v57  ;;  %v3286_v57 = vadd.f32 %v7091_v18, %v2896_v30  ;;  %v2897_v18 = vadd.f32 %v7105_v52, %v7007_v20 }
 0x1c0   : > { %7786 = vst [vmem:[#allocation42_spill] sm:$0xff] %v7196_v47  ;;  %v7198_v9 = vpop.f32.mrf.mxu1 }
 0x1c1   : > { %v7201_v16 = vpop.f32.mrf.mxu0 }
 0x1c2   : > { %v7203_v43 = vpop.f32.mrf.mxu1 }
 0x1c3   : > { %v5437_v63 = vpop.f32.mrf.mxu0 }
 0x1c4   : > { %v5387_v45 = vpop.f32.mrf.mxu1 }
 0x1c5   : > { %v3672_v5 = vadd.f32 %v5387_v45, %v3282_v21  ;;  %v3902_v47 = vpop.f32.mrf.mxu0  ;;  %v2895_v45 = vadd.f32 %v7097_v32, %v7001_v37 }
 0x1c6   : > { %v3512_v40 = vpop.f32.mrf.mxu1 }
 0x1c7   : > { %v7220_v27 = vadd.f32 %v5437_v63, %v3672_v5  ;;  %v3671_v26 = vadd.f32 %v3512_v40, %v3281_v12  ;;  %v5440_v31 = vpop.f32.mrf.mxu0  ;;  %v2898_v12 = vadd.f32 %v7101_v3, %v7004_v38  ;;  %v3285_v56 = vadd.f32 %v7095_v44, %v2895_v45 }
 0x1c8   : > { %v5390_v21 = vpop.f32.mrf.mxu1  ;;  %v2900_v5 = vadd.f32 %v7109_v15, %v7010_v62  ;;  %v3287_v15 = vadd.f32 %v7103_v33, %v2897_v18 }
 0x1c9   : > { %4094 = vst.msk [vmem:[%s7217_s14 + $0x8] sm:$0xff] %vm536_vm1, %v7220_v27  ;;  %v7228_v54 = vadd.f32 %v3902_v47, %v3671_v26  ;;  %v3674_v24 = vadd.f32 %v5390_v21, %v3284_v59  ;;  %v3912_v6 = vpop.f32.mrf.mxu0  ;;  %v4126_v38 = vsel %vm536_vm1, %v7220_v27, 0.0  ;;  %v3288_v40 = vadd.f32 %v7099_v17, %v2898_v12 }
 0x1ca   : > { %v3522_v63 = vpop.f32.mrf.mxu1 }
 0x1cb   : > { %4093 = vst.msk [vmem:[%s7217_s14] sm:$0xff] %vm536_vm1, %v7228_v54  ;;  %v4125_v37 = vsel %vm536_vm1, %v7228_v54, 0.0  ;;  %v7238_v2 = vadd.f32 %v5440_v31, %v3674_v24  ;;  %v3673_v42 = vadd.f32 %v3522_v63, %v3283_v14  ;;  %v5443_v47 = vpop.f32.mrf.mxu0  ;;  %v2899_v31 = vadd.f32 %v7113_v53, %v7013_v0 }
 0x1cc   : > { %v5393_v8 = vpop.f32.mrf.mxu1  ;;  %v4127_v30 = vadd.f32 %v4126_v38, %v4125_v37  ;;  %v2902_v0 = vadd.f32 %v7117_v29, %v7016_v11  ;;  %v2904_v38 = vadd.f32 %v7125_v39, %v7022_v58 }
 0x1cd   : > { %4096 = vst.msk [vmem:[%s7217_s14 + $0x18] sm:$0xff] %vm536_vm1, %v7238_v2  ;;  %v7248_v32 = vadd.f32 %v3912_v6, %v3673_v42  ;;  %v3676_v3 = vadd.f32 %v5393_v8, %v3286_v57  ;;  %v3922_v46 = vpop.f32.mrf.mxu0  ;;  %v4130_v17 = vsel %vm536_vm1, %v7238_v2, 0.0  ;;  %v3290_v6 = vadd.f32 %v7107_v35, %v2900_v5 }
 0x1ce   : > { %v3532_v44 = vpop.f32.mrf.mxu1  ;;  %v3289_v42 = vadd.f32 %v7111_v22, %v2899_v31  ;;  %v3294_v31 = vadd.f32 %v7123_v28, %v2904_v38 }
 0x1cf   : > { %4095 = vst.msk [vmem:[%s7217_s14 + $0x10] sm:$0xff] %vm536_vm1, %v7248_v32  ;;  %v4128_v20 = vsel %vm536_vm1, %v7248_v32, 0.0  ;;  %v7258_v52 = vadd.f32 %v5443_v47, %v3676_v3  ;;  %v3675_v59 = vadd.f32 %v3532_v44, %v3285_v56  ;;  %v5446_v26 = vpop.f32.mrf.mxu0  ;;  %v2901_v56 = vadd.f32 %v7121_v60, %v7019_v34 }
 0x1d0   : > { %v4129_v45 = vadd.f32 %v4128_v20, %v4127_v30  ;;  %v5396_v62 = vpop.f32.mrf.mxu1  ;;  %v2903_v44 = vadd.f32 %v7129_v7, %v7025_v10  ;;  %v2906_v10 = vadd.f32 %v7133_v4, %v7028_v51 }
 0x1d1   : > { %4098 = vst.msk [vmem:[%s7217_s14 + $0x28] sm:$0xff] %vm536_vm1, %v7258_v52  ;;  %v7268_v21 = vadd.f32 %v3922_v46, %v3675_v59  ;;  %v3678_v14 = vadd.f32 %v5396_v62, %v3288_v40  ;;  %v3932_v24 = vpop.f32.mrf.mxu0  ;;  %v4134_v11 = vsel %vm536_vm1, %v7258_v52, 0.0  ;;  %v3292_v46 = vadd.f32 %v7115_v55, %v2902_v0 }
 0x1d2   : > { %v4131_v57 = vadd.f32 %v4130_v17, %v4129_v45  ;;  %v3542_v63 = vpop.f32.mrf.mxu1  ;;  %v3291_v39 = vadd.f32 %v7119_v25, %v2901_v56  ;;  %v2908_v0 = vadd.f32 %v7141_v36, %v7034_v49 }
 0x1d3   : > { %4097 = vst.msk [vmem:[%s7217_s14 + $0x20] sm:$0xff] %vm536_vm1, %v7268_v21  ;;  %v4132_v33 = vsel %vm536_vm1, %v7268_v21, 0.0  ;;  %v7278_v53 = vadd.f32 %v5446_v26, %v3678_v14  ;;  %v3677_v12 = vadd.f32 %v3542_v63, %v3287_v15  ;;  %v5449_v37 = vpop.f32.mrf.mxu0  ;;  %v3293_v14 = vadd.f32 %v7127_v41, %v2903_v44 }
 0x1d4   : > { %v4133_v47 = vadd.f32 %v4132_v33, %v4131_v57  ;;  %v5399_v35 = vpop.f32.mrf.mxu1 }
 0x1d5   : > { %4100 = vst.msk [vmem:[%s7217_s14 + $0x38] sm:$0xff] %vm536_vm1, %v7278_v53  ;;  %v7288_v29 = vadd.f32 %v3932_v24, %v3677_v12  ;;  %v3680_v8 = vadd.f32 %v5399_v35, %v3290_v6  ;;  %v3942_v18 = vpop.f32.mrf.mxu0  ;;  %v4138_v55 = vsel %vm536_vm1, %v7278_v53, 0.0  ;;  %v2905_v6 = vadd.f32 %v7137_v13, %v7031_v61 }
 0x1d6   : > { %v4135_v22 = vadd.f32 %v4134_v11, %v4133_v47  ;;  %v3552_v3 = vpop.f32.mrf.mxu1  ;;  %v3296_v12 = vadd.f32 %v7131_v1, %v2906_v10  ;;  %v2907_v47 = vadd.f32 %v7145_v19, %v7037_v48  ;;  %v7787_v48 = vld [vmem:[#allocation3_spill] sm:$0xff] }
 0x1d7   : > { %4099 = vst.msk [vmem:[%s7217_s14 + $0x30] sm:$0xff] %vm536_vm1, %v7288_v29  ;;  %v4136_v34 = vsel %vm536_vm1, %v7288_v29, 0.0  ;;  %v7298_v60 = vadd.f32 %v5449_v37, %v3680_v8  ;;  %v3679_v5 = vadd.f32 %v3552_v3, %v3289_v42  ;;  %v5452_v30 = vpop.f32.mrf.mxu0  ;;  %v3295_v36 = vadd.f32 %v7135_v50, %v2905_v6  ;;  %v7788_v19 = vld [vmem:[#allocation19_spill] sm:$0xff] }
 0x1d8   : > { %v4137_v40 = vadd.f32 %v4136_v34, %v4135_v22  ;;  %v5402_v58 = vpop.f32.mrf.mxu1  ;;  %v2910_v3 = vadd.f32 %v7788_v19, %v7787_v48  ;;  %v7793_v10 = vld [vmem:[#allocation23_spill] sm:$0xff] }
 0x1d9   : > { %4102 = vst.msk [vmem:[%s7217_s14 + $0x48] sm:$0xff] %vm536_vm1, %v7298_v60  ;;  %v7308_v20 = vadd.f32 %v3942_v18, %v3679_v5  ;;  %v3682_v59 = vadd.f32 %v5402_v58, %v3292_v46  ;;  %v3952_v26 = vpop.f32.mrf.mxu0  ;;  %v4142_v51 = vsel %vm536_vm1, %v7298_v60, 0.0  ;;  %v3298_v18 = vadd.f32 %v7139_v23, %v2908_v0  ;;  %v7790_v58 = vld [vmem:[#allocation4_spill] sm:$0xff]  ;;  %v7796_v0 = vld [vmem:[#allocation25_spill] sm:$0xff] }
 0x1da   : > { %v4139_v45 = vadd.f32 %v4138_v55, %v4137_v40  ;;  %v3562_v62 = vpop.f32.mrf.mxu1 }
 0x1db   : > { %4101 = vst.msk [vmem:[%s7217_s14 + $0x40] sm:$0xff] %vm536_vm1, %v7308_v20  ;;  %v4140_v25 = vsel %vm536_vm1, %v7308_v20, 0.0  ;;  %v7318_v7 = vadd.f32 %v5452_v30, %v3682_v59  ;;  %v3681_v15 = vadd.f32 %v3562_v62, %v3291_v39  ;;  %v5455_v17 = vpop.f32.mrf.mxu0  ;;  %v7789_v30 = vld [vmem:[#allocation17_spill] sm:$0xff] }
 0x1dc   : > { %v4141_v24 = vadd.f32 %v4140_v25, %v4139_v45  ;;  %v5405_v28 = vpop.f32.mrf.mxu1  ;;  %v3297_v44 = vadd.f32 %v7789_v30, %v2907_v47  ;;  %v7791_v39 = vld [vmem:[#allocation21_spill] sm:$0xff] }
 0x1dd   : > { %4104 = vst.msk [vmem:[%s7217_s14 + $0x58] sm:$0xff] %vm536_vm1, %v7318_v7  ;;  %v7328_v4 = vadd.f32 %v3952_v26, %v3681_v15  ;;  %v3684_v57 = vadd.f32 %v5405_v28, %v3294_v31  ;;  %v3962_v63 = vpop.f32.mrf.mxu0  ;;  %v4146_v1 = vsel %vm536_vm1, %v7318_v7, 0.0  ;;  %v2909_v55 = vadd.f32 %v7791_v39, %v7790_v58  ;;  %v7792_v62 = vld [vmem:[#allocation5_spill] sm:$0xff] }
 0x1de   : > { %v4143_v41 = vadd.f32 %v4142_v51, %v4141_v24  ;;  %v3572_v33 = vpop.f32.mrf.mxu1  ;;  %v2912_v25 = vadd.f32 %v7793_v10, %v7792_v62  ;;  %v7805_v62 = vld [vmem:[#allocation31_spill] sm:$0xff] }
 0x1df   : > { %4103 = vst.msk [vmem:[%s7217_s14 + $0x50] sm:$0xff] %vm536_vm1, %v7328_v4  ;;  %v4144_v61 = vsel %vm536_vm1, %v7328_v4, 0.0  ;;  %v7338_v13 = vadd.f32 %v5455_v17, %v3684_v57  ;;  %v3683_v37 = vadd.f32 %v3572_v33, %v3293_v14  ;;  %v5458_v42 = vpop.f32.mrf.mxu0  ;;  %v7794_v14 = vld [vmem:[#allocation18_spill] sm:$0xff] }
 0x1e0   : > { %v4145_v35 = vadd.f32 %v4144_v61, %v4143_v41  ;;  %v5408_v49 = vpop.f32.mrf.mxu1  ;;  %v3300_v24 = vadd.f32 %v7794_v14, %v2910_v3  ;;  %v7797_v61 = vld [vmem:[#allocation20_spill] sm:$0xff] }
 0x1e1   : > { %4106 = vst.msk [vmem:[%s7217_s14 + $0x68] sm:$0xff] %vm536_vm1, %v7338_v13  ;;  %v7348_v56 = vadd.f32 %v3962_v63, %v3683_v37  ;;  %v3686_v11 = vadd.f32 %v5408_v49, %v3296_v12  ;;  %v3972_v8 = vpop.f32.mrf.mxu0  ;;  %v4150_v59 = vsel %vm536_vm1, %v7338_v13, 0.0  ;;  %v7795_v63 = vld [vmem:[#allocation6_spill] sm:$0xff]  ;;  %v3299_v37 = vadd.f32 %v7797_v61, %v2909_v55  ;;  %v7809_v61 = vld [vmem:[#allocation28_spill] sm:$0xff] }
 0x1e2   : > { %v4147_v38 = vadd.f32 %v4146_v1, %v4145_v35  ;;  %v3582_v22 = vpop.f32.mrf.mxu1  ;;  %v2911_v41 = vadd.f32 %v7796_v0, %v7795_v63  ;;  %v7807_v63 = vld [vmem:[#allocation10_spill] sm:$0xff]  ;;  %v7808_v0 = vld [vmem:[#allocation33_spill] sm:$0xff] }
 0x1e3   : > { %4105 = vst.msk [vmem:[%s7217_s14 + $0x60] sm:$0xff] %vm536_vm1, %v7348_v56  ;;  %v4148_v50 = vsel %vm536_vm1, %v7348_v56, 0.0  ;;  %v7358_v46 = vadd.f32 %v5458_v42, %v3686_v11  ;;  %v3685_v34 = vadd.f32 %v3582_v22, %v3295_v36  ;;  %v5461_v5 = vpop.f32.mrf.mxu0  ;;  %v7798_v36 = vld [vmem:[#allocation22_spill] sm:$0xff] }
 0x1e4   : > { %v4149_v40 = vadd.f32 %v4148_v50, %v4147_v38  ;;  %v5411_v23 = vpop.f32.mrf.mxu1  ;;  %v3302_v1 = vadd.f32 %v7798_v36, %v2912_v25  ;;  %v7800_v38 = vld [vmem:[#allocation27_spill] sm:$0xff] }
 0x1e5   : > { %4108 = vst.msk [vmem:[%s7217_s14 + $0x78] sm:$0xff] %vm536_vm1, %v7358_v46  ;;  %v7368_v26 = vadd.f32 %v3972_v8, %v3685_v34  ;;  %v3688_v31 = vadd.f32 %v5411_v23, %v3298_v18  ;;  %v3982_v45 = vpop.f32.mrf.mxu0  ;;  %v4154_v42 = vsel %vm536_vm1, %v7358_v46, 0.0  ;;  %v7799_v18 = vld [vmem:[#allocation7_spill] sm:$0xff]  ;;  %v7801_v34 = vld [vmem:[#allocation24_spill] sm:$0xff]  ;;  %v7803_v23 = vld [vmem:[#allocation29_spill] sm:$0xff] }
 0x1e6   : > { %v4151_v15 = vadd.f32 %v4150_v59, %v4149_v40  ;;  %v3592_v17 = vpop.f32.mrf.mxu1  ;;  %v2914_v22 = vadd.f32 %v7800_v38, %v7799_v18  ;;  %v7802_v40 = vld [vmem:[#allocation8_spill] sm:$0xff]  ;;  %v7811_v38 = vld [vmem:[#allocation11_spill] sm:$0xff] }
 0x1e7   : > { %4107 = vst.msk [vmem:[%s7217_s14 + $0x70] sm:$0xff] %vm536_vm1, %v7368_v26  ;;  %v4152_v28 = vsel %vm536_vm1, %v7368_v26, 0.0  ;;  %v7378_v6 = vadd.f32 %v5461_v5, %v3688_v31  ;;  %v3687_v51 = vadd.f32 %v3592_v17, %v3297_v44  ;;  %v5464_v57 = vpop.f32.mrf.mxu0  ;;  %v3301_v5 = vadd.f32 %v7801_v34, %v2911_v41  ;;  %v7806_v17 = vld [vmem:[#allocation26_spill] sm:$0xff] }
 0x1e8   : > { %v4153_v33 = vadd.f32 %v4152_v28, %v4151_v15  ;;  %v5414_v12 = vpop.f32.mrf.mxu1  ;;  %v2913_v58 = vadd.f32 %v7803_v23, %v7802_v40  ;;  %v3304_v14 = vadd.f32 %v7806_v17, %v2914_v22  ;;  %v2915_v41 = vadd.f32 %v7808_v0, %v7807_v63  ;;  %v7812_v22 = vld [vmem:[#allocation35_spill] sm:$0xff] }
 0x1e9   : > { %4110 = vst.msk [vmem:[%s7217_s14 + $0x88] sm:$0xff] %vm536_vm1, %v7378_v6  ;;  %v7388_v47 = vadd.f32 %v3982_v45, %v3687_v51  ;;  %v3690_v35 = vadd.f32 %v5414_v12, %v3300_v24  ;;  %v3992_v49 = vpop.f32.mrf.mxu0  ;;  %v4158_v39 = vsel %vm536_vm1, %v7378_v6, 0.0  ;;  %v7804_v45 = vld [vmem:[#allocation9_spill] sm:$0xff] }
 0x1ea   : > { %v4155_v11 = vadd.f32 %v4154_v42, %v4153_v33  ;;  %v3602_v8 = vpop.f32.mrf.mxu1  ;;  %v2916_v10 = vadd.f32 %v7805_v62, %v7804_v45 }
 0x1eb   : > { %4109 = vst.msk [vmem:[%s7217_s14 + $0x80] sm:$0xff] %vm536_vm1, %v7388_v47  ;;  %v4156_v48 = vsel %vm536_vm1, %v7388_v47, 0.0  ;;  %v7398_v19 = vadd.f32 %v5464_v57, %v3690_v35  ;;  %v3689_v3 = vadd.f32 %v3602_v8, %v3299_v37  ;;  %v5467_v50 = vpop.f32.mrf.mxu0  ;;  %v3303_v37 = vadd.f32 %v7809_v61, %v2913_v58  ;;  %v7814_v58 = vld [vmem:[#allocation12_spill] sm:$0xff]  ;;  %v7820_v61 = vld [vmem:[#allocation41_spill] sm:$0xff] }
 0x1ec   : > { %v4157_v30 = vadd.f32 %v4156_v48, %v4155_v11  ;;  %v5417_v44 = vpop.f32.mrf.mxu1  ;;  %v2918_v48 = vadd.f32 %v7812_v22, %v7811_v38  ;;  %v7822_v22 = vld [vmem:[#allocation38_spill] sm:$0xff] }
 0x1ed   : > { %4112 = vst.msk [vmem:[%s7217_s14 + $0x98] sm:$0xff] %vm536_vm1, %v7398_v19  ;;  %v7408_v55 = vadd.f32 %v3992_v49, %v3689_v3  ;;  %v3692_v59 = vadd.f32 %v5417_v44, %v3302_v1  ;;  %v4002_v31 = vpop.f32.mrf.mxu0  ;;  %v4162_v42 = vsel %vm536_vm1, %v7398_v19, 0.0  ;;  %v7810_v1 = vld [vmem:[#allocation30_spill] sm:$0xff] }
 0x1ee   : > { %v4159_v25 = vadd.f32 %v4158_v39, %v4157_v30  ;;  %v3612_v15 = vpop.f32.mrf.mxu1  ;;  %v3306_v11 = vadd.f32 %v7810_v1, %v2916_v10  ;;  %v7813_v30 = vld [vmem:[#allocation32_spill] sm:$0xff]  ;;  %v7815_v39 = vld [vmem:[#allocation37_spill] sm:$0xff] }
 0x1ef   : > { %4111 = vst.msk [vmem:[%s7217_s14 + $0x90] sm:$0xff] %vm536_vm1, %v7408_v55  ;;  %v4160_v24 = vsel %vm536_vm1, %v7408_v55, 0.0  ;;  %v7418_v28 = vadd.f32 %v5467_v50, %v3692_v59  ;;  %v3691_v51 = vadd.f32 %v3612_v15, %v3301_v5  ;;  %v5470_v57 = vpop.f32.mrf.mxu0  ;;  %v3305_v44 = vadd.f32 %v7813_v30, %v2915_v41  ;;  %v7817_v15 = vld [vmem:[#allocation39_spill] sm:$0xff] }
 0x1f0   : > { %v4161_v33 = vadd.f32 %v4160_v24, %v4159_v25  ;;  %v5420_v12 = vpop.f32.mrf.mxu1  ;;  %v2917_v59 = vadd.f32 %v7815_v39, %v7814_v58  ;;  %v7816_v25 = vld [vmem:[#allocation13_spill] sm:$0xff]  ;;  %v7824_v39 = vld [vmem:[#allocation40_spill] sm:$0xff] }
 0x1f1   : > { %4114 = vst.msk [vmem:[%s7217_s14 + $0xa8] sm:$0xff] %vm536_vm1, %v7418_v28  ;;  %v7428_v35 = vadd.f32 %v4002_v31, %v3691_v51  ;;  %v3694_v49 = vadd.f32 %v5420_v12, %v3304_v14  ;;  %v4012_v36 = vpop.f32.mrf.mxu0  ;;  %v4166_v31 = vsel %vm536_vm1, %v7418_v28, 0.0  ;;  %v2920_v17 = vadd.f32 %v7817_v15, %v7816_v25  ;;  %v7818_v51 = vld [vmem:[#allocation34_spill] sm:$0xff] }
 0x1f2   : > { %v4163_v8 = vadd.f32 %v4162_v42, %v4161_v33  ;;  %v3622_v18 = vpop.f32.mrf.mxu1  ;;  %v7819_v12 = vld [vmem:[#allocation14_spill] sm:$0xff] }
 0x1f3   : > { %4113 = vst.msk [vmem:[%s7217_s14 + $0xa0] sm:$0xff] %vm536_vm1, %v7428_v35  ;;  %v4164_v3 = vsel %vm536_vm1, %v7428_v35, 0.0  ;;  %v7438_v50 = vadd.f32 %v5470_v57, %v3694_v49  ;;  %v3693_v34 = vadd.f32 %v3622_v18, %v3303_v37  ;;  %v5473_v5 = vpop.f32.mrf.mxu0  ;;  %v3308_v57 = vadd.f32 %v7818_v51, %v2918_v48 }
 0x1f4   : > { %v4165_v40 = vadd.f32 %v4164_v3, %v4163_v8  ;;  %v5423_v23 = vpop.f32.mrf.mxu1  ;;  %v2919_v37 = vadd.f32 %v7820_v61, %v7819_v12  ;;  %v3310_v48 = vadd.f32 %v7822_v22, %v2920_v17 }
 0x1f5   : > { %4116 = vst.msk [vmem:[%s7217_s14 + $0xb8] sm:$0xff] %vm536_vm1, %v7438_v50  ;;  %v7448_v45 = vadd.f32 %v4012_v36, %v3693_v34  ;;  %v3696_v62 = vadd.f32 %v5423_v23, %v3306_v11  ;;  %v4022_v10 = vpop.f32.mrf.mxu0  ;;  %v7821_v36 = vld [vmem:[#allocation36_spill] sm:$0xff]  ;;  %v4170_v11 = vsel %vm536_vm1, %v7438_v50, 0.0 }
 0x1f6   : > { %v4167_v14 = vadd.f32 %v4166_v31, %v4165_v40  ;;  %v3632_v24 = vpop.f32.mrf.mxu1  ;;  %v3307_v1 = vadd.f32 %v7821_v36, %v2917_v59  ;;  %v3309_v59 = vadd.f32 %v7824_v39, %v2919_v37 }
 0x1f7   : > { %4115 = vst.msk [vmem:[%s7217_s14 + $0xb0] sm:$0xff] %vm536_vm1, %v7448_v45  ;;  %v4168_v63 = vsel %vm536_vm1, %v7448_v45, 0.0  ;;  %v7458_v0 = vadd.f32 %v5473_v5, %v3696_v62  ;;  %v3695_v41 = vadd.f32 %v3632_v24, %v3305_v44  ;;  %v5476_v33 = vpop.f32.mrf.mxu0  ;;  %v7823_v5 = vld [vmem:[#allocation15_spill] sm:$0xff] }
 0x1f8   : > { %v4169_v42 = vadd.f32 %v4168_v63, %v4167_v14  ;;  %v5426_v49 = vpop.f32.mrf.mxu1  ;;  %v2922_v30 = vadd.f32 %v7198_v9, %v7823_v5 }
 0x1f9   : > { %4118 = vst.msk [vmem:[%s7217_s14 + $0xc8] sm:$0xff] %vm536_vm1, %v7458_v0  ;;  %v7468_v8 = vadd.f32 %v4022_v10, %v3695_v41  ;;  %v3698_v18 = vadd.f32 %v5426_v49, %v3308_v57  ;;  %v4032_v38 = vpop.f32.mrf.mxu0  ;;  %v7825_v10 = vld [vmem:[#allocation16_spill] sm:$0xff]  ;;  %v4174_v9 = vsel %vm536_vm1, %v7458_v0, 0.0  ;;  %v7826_v57 = vld [vmem:[#allocation42_spill] sm:$0xff] }
 0x1fa   : > { %v4171_v3 = vadd.f32 %v4170_v11, %v4169_v42  ;;  %v3642_v34 = vpop.f32.mrf.mxu1  ;;  %v2921_v25 = vadd.f32 %v7203_v43, %v7825_v10  ;;  %v3312_v63 = vadd.f32 %v7826_v57, %v2922_v30 }
 0x1fb   : > { %4117 = vst.msk [vmem:[%s7217_s14 + $0xc0] sm:$0xff] %vm536_vm1, %v7468_v8  ;;  %v4172_v44 = vsel %vm536_vm1, %v7468_v8, 0.0  ;;  %v7478_v40 = vadd.f32 %v5476_v33, %v3698_v18  ;;  %v3697_v23 = vadd.f32 %v3642_v34, %v3307_v1  ;;  %v5479_v58 = vpop.f32.mrf.mxu0 }
 0x1fc   : > { %v4173_v31 = vadd.f32 %v4172_v44, %v4171_v3  ;;  %v5429_v62 = vpop.f32.mrf.mxu1  ;;  %v3311_v42 = vadd.f32 %v7201_v16, %v2921_v25 }
 0x1fd   : > { %4120 = vst.msk [vmem:[%s7217_s14 + $0xd8] sm:$0xff] %vm536_vm1, %v7478_v40  ;;  %v7488_v15 = vadd.f32 %v4032_v38, %v3697_v23  ;;  %v3700_v17 = vadd.f32 %v5429_v62, %v3310_v48  ;;  %v4042_v14 = vpop.f32.mrf.mxu0  ;;  %v4178_v49 = vsel %vm536_vm1, %v7478_v40, 0.0 }
 0x1fe   : > { %v4175_v24 = vadd.f32 %v4174_v9, %v4173_v31  ;;  %v3652_v51 = vpop.f32.mrf.mxu1 }
 0x1ff   : > { %4119 = vst.msk [vmem:[%s7217_s14 + $0xd0] sm:$0xff] %vm536_vm1, %v7488_v15  ;;  %v4176_v43 = vsel %vm536_vm1, %v7488_v15, 0.0  ;;  %v7496_v41 = vadd.f32 %v5479_v58, %v3700_v17  ;;  %v3699_v33 = vadd.f32 %v3652_v51, %v3309_v59  ;;  %v5482_v37 = vpop.f32.mrf.mxu0 }
 0x200   : > { %v4177_v12 = vadd.f32 %v4176_v43, %v4175_v24  ;;  %v5432_v61 = vpop.f32.mrf.mxu1 }
 0x201   : > { %4122 = vst.msk [vmem:[%s7217_s14 + $0xe8] sm:$0xff] %vm536_vm1, %v7496_v41  ;;  %v7504_v36 = vadd.f32 %v4042_v14, %v3699_v33  ;;  %v3702_v1 = vadd.f32 %v5432_v61, %v3312_v63  ;;  %v4052_v3 = vpop.f32.mrf.mxu0  ;;  %v4182_v34 = vsel %vm536_vm1, %v7496_v41, 0.0 }
 0x202   : > { %v4179_v11 = vadd.f32 %v4178_v49, %v4177_v12  ;;  %v3662_v18 = vpop.f32.mrf.mxu1 }
 0x203   : > { %4121 = vst.msk [vmem:[%s7217_s14 + $0xe0] sm:$0xff] %vm536_vm1, %v7504_v36  ;;  %v4180_v38 = vsel %vm536_vm1, %v7504_v36, 0.0  ;;  %v7511_v22 = vadd.f32 %v5482_v37, %v3702_v1  ;;  %v3701_v16 = vadd.f32 %v3662_v18, %v3311_v42 }
 0x204   : > { %v4181_v48 = vadd.f32 %v4180_v38, %v4179_v11 }
 0x205   : > { %4124 = vst.msk [vmem:[%s7217_s14 + $0xf8] sm:$0xff] %vm536_vm1, %v7511_v22  ;;  %v7518_v5 = vadd.f32 %v4052_v3, %v3701_v16  ;;  %v4186_v58 = vsel %vm536_vm1, %v7511_v22, 0.0 }
 0x206   : > { %v4183_v30 = vadd.f32 %v4182_v34, %v4181_v48 }
 0x207   : > { %4123 = vst.msk [vmem:[%s7217_s14 + $0xf0] sm:$0xff] %vm536_vm1, %v7518_v5  ;;  %v4184_v44 = vsel %vm536_vm1, %v7518_v5, 0.0 }
 0x208   : > { %v4185_v23 = vadd.f32 %v4184_v44, %v4183_v30 }
 0x20a   : > { %v4187_v39 = vadd.f32 %v4186_v58, %v4185_v23 }
 0x20c   : > { %v4188_v59 = vrot.slane %v4187_v39, 4 }
 0x20e   : > { %v4189_v31 = vadd.f32 %v4188_v59, %v4187_v39 }
 0x210   : > { %v4190_v62 = vrot.slane %v4189_v31, 2 }
 0x212   : > { %v4191_v10 = vadd.f32 %v4190_v62, %v4189_v31 }
 0x214   : > { %v4192_v25 = vrot.slane %v4191_v10, 1 }
 0x216   : > { %v7527_v9 = vadd.f32 %v4192_v25, %v4191_v10 }
 0x218   : > { %v7530_v17 = vmul.f32 0.00390625, %v7527_v9 }
 0x21a   : > { %v4195_v14 = vsub.f32 %v7228_v54, %v7530_v17  ;;  %v4196_v24 = vsub.f32 %v7220_v27, %v7530_v17  ;;  %v4197_v51 = vsub.f32 %v7248_v32, %v7530_v17  ;;  %v4198_v57 = vsub.f32 %v7238_v2, %v7530_v17 }
 0x21b   : > { %v4199_v33 = vsub.f32 %v7268_v21, %v7530_v17  ;;  %v4200_v61 = vsub.f32 %v7258_v52, %v7530_v17  ;;  %v4201_v32 = vsub.f32 %v7288_v29, %v7530_v17  ;;  %v4202_v21 = vsub.f32 %v7278_v53, %v7530_v17 }
 0x21c   : > { %v4227_v63 = vmul.f32 %v4195_v14, %v4195_v14  ;;  %v4228_v43 = vmul.f32 %v4196_v24, %v4196_v24  ;;  %v4229_v12 = vmul.f32 %v4197_v51, %v4197_v51  ;;  %v4230_v37 = vmul.f32 %v4198_v57, %v4198_v57 }
 0x21d   : > { %v4231_v49 = vmul.f32 %v4199_v33, %v4199_v33  ;;  %v4232_v11 = vmul.f32 %v4200_v61, %v4200_v61  ;;  %v4203_v38 = vsub.f32 %v7308_v20, %v7530_v17  ;;  %v4233_v16 = vmul.f32 %v4201_v32, %v4201_v32 }
 0x21e   : > { %v4259_v54 = vsel %vm536_vm1, %v4227_v63, 0.0  ;;  %v4260_v27 = vsel %vm536_vm1, %v4228_v43, 0.0  ;;  %v4262_v2 = vsel %vm536_vm1, %v4229_v12, 0.0  ;;  %v4264_v18 = vsel %vm536_vm1, %v4230_v37, 0.0 }
 0x21f   : > { %v4261_v42 = vadd.f32 %v4260_v27, %v4259_v54  ;;  %v4266_v48 = vsel %vm536_vm1, %v4231_v49, 0.0  ;;  %v4204_v29 = vsub.f32 %v7298_v60, %v7530_v17  ;;  %v4234_v34 = vmul.f32 %v4202_v21, %v4202_v21 }
 0x220   : > { %v4268_v30 = vsel %vm536_vm1, %v4232_v11, 0.0  ;;  %v4205_v53 = vsub.f32 %v7328_v4, %v7530_v17  ;;  %v4235_v23 = vmul.f32 %v4203_v38, %v4203_v38  ;;  %v4270_v58 = vsel %vm536_vm1, %v4233_v16, 0.0 }
 0x221   : > { %v4263_v1 = vadd.f32 %v4262_v2, %v4261_v42  ;;  %v4206_v20 = vsub.f32 %v7318_v7, %v7530_v17  ;;  %v4236_v59 = vmul.f32 %v4204_v29, %v4204_v29  ;;  %v4272_v31 = vsel %vm536_vm1, %v4234_v34, 0.0 }
 0x222   : > { %v4207_v60 = vsub.f32 %v7348_v56, %v7530_v17  ;;  %v4237_v10 = vmul.f32 %v4205_v53, %v4205_v53  ;;  %v4274_v25 = vsel %vm536_vm1, %v4235_v23, 0.0  ;;  %v4208_v4 = vsub.f32 %v7338_v13, %v7530_v17 }
 0x223   : > { %v4265_v52 = vadd.f32 %v4264_v18, %v4263_v1  ;;  %v4238_v24 = vmul.f32 %v4206_v20, %v4206_v20  ;;  %v4276_v51 = vsel %vm536_vm1, %v4236_v59, 0.0  ;;  %v4209_v7 = vsub.f32 %v7368_v26, %v7530_v17 }
 0x224   : > { %v4239_v63 = vmul.f32 %v4207_v60, %v4207_v60  ;;  %v4278_v43 = vsel %vm536_vm1, %v4237_v10, 0.0  ;;  %v4210_v56 = vsub.f32 %v7358_v46, %v7530_v17  ;;  %v4240_v12 = vmul.f32 %v4208_v4, %v4208_v4 }
 0x225   : > { %v4267_v3 = vadd.f32 %v4266_v48, %v4265_v52  ;;  %v4280_v61 = vsel %vm536_vm1, %v4238_v24, 0.0  ;;  %v4211_v13 = vsub.f32 %v7388_v47, %v7530_v17  ;;  %v4241_v54 = vmul.f32 %v4209_v7, %v4209_v7 }
 0x226   : > { %v4282_v27 = vsel %vm536_vm1, %v4239_v63, 0.0  ;;  %v4212_v26 = vsub.f32 %v7378_v6, %v7530_v17  ;;  %v4242_v32 = vmul.f32 %v4210_v56, %v4210_v56  ;;  %v4284_v49 = vsel %vm536_vm1, %v4240_v12, 0.0 }
 0x227   : > { %v4269_v44 = vadd.f32 %v4268_v30, %v4267_v3  ;;  %v4213_v46 = vsub.f32 %v7408_v55, %v7530_v17  ;;  %v4243_v1 = vmul.f32 %v4211_v13, %v4211_v13  ;;  %v4286_v21 = vsel %vm536_vm1, %v4241_v54, 0.0 }
 0x228   : > { %v4214_v47 = vsub.f32 %v7398_v19, %v7530_v17  ;;  %v4244_v18 = vmul.f32 %v4212_v26, %v4212_v26  ;;  %v4288_v52 = vsel %vm536_vm1, %v4242_v32, 0.0  ;;  %v4215_v6 = vsub.f32 %v7428_v35, %v7530_v17 }
 0x229   : > { %v4271_v39 = vadd.f32 %v4270_v58, %v4269_v44  ;;  %v4245_v16 = vmul.f32 %v4213_v46, %v4213_v46  ;;  %v4290_v48 = vsel %vm536_vm1, %v4243_v1, 0.0  ;;  %v4216_v55 = vsub.f32 %v7418_v28, %v7530_v17 }
 0x22a   : > { %v4246_v29 = vmul.f32 %v4214_v47, %v4214_v47  ;;  %v4292_v34 = vsel %vm536_vm1, %v4244_v18, 0.0  ;;  %v4217_v19 = vsub.f32 %v7448_v45, %v7530_v17  ;;  %v4247_v44 = vmul.f32 %v4215_v6, %v4215_v6 }
 0x22b   : > { %v4273_v62 = vadd.f32 %v4272_v31, %v4271_v39  ;;  %v4294_v53 = vsel %vm536_vm1, %v4245_v16, 0.0  ;;  %v4218_v35 = vsub.f32 %v7438_v50, %v7530_v17  ;;  %v4248_v58 = vmul.f32 %v4216_v55, %v4216_v55 }
 0x22c   : > { %v4296_v39 = vsel %vm536_vm1, %v4246_v29, 0.0  ;;  %v4219_v28 = vsub.f32 %v7468_v8, %v7530_v17  ;;  %v4249_v59 = vmul.f32 %v4217_v19, %v4217_v19  ;;  %v4298_v31 = vsel %vm536_vm1, %v4247_v44, 0.0 }
 0x22d   : > { %v4275_v14 = vadd.f32 %v4274_v25, %v4273_v62  ;;  %v4220_v45 = vsub.f32 %v7458_v0, %v7530_v17  ;;  %v4250_v60 = vmul.f32 %v4218_v35, %v4218_v35  ;;  %v4300_v10 = vsel %vm536_vm1, %v4248_v58, 0.0 }
 0x22e   : > { %v4221_v50 = vsub.f32 %v7488_v15, %v7530_v17  ;;  %v4302_v4 = vsel %vm536_vm1, %v4249_v59, 0.0  ;;  %v4222_v8 = vsub.f32 %v7478_v40, %v7530_v17  ;;  %v4223_v0 = vsub.f32 %v7504_v36, %v7530_v17 }
 0x22f   : > { %v4277_v57 = vadd.f32 %v4276_v51, %v4275_v14  ;;  %v4251_v14 = vmul.f32 %v4219_v28, %v4219_v28  ;;  %v4252_v51 = vmul.f32 %v4220_v45, %v4220_v45  ;;  %v4224_v15 = vsub.f32 %v7496_v41, %v7530_v17 }
 0x230   : > { %v4253_v63 = vmul.f32 %v4221_v50, %v4221_v50  ;;  %v4254_v56 = vmul.f32 %v4222_v8, %v4222_v8  ;;  %v4225_v40 = vsub.f32 %v7518_v5, %v7530_v17  ;;  %v4226_v36 = vsub.f32 %v7511_v22, %v7530_v17 }
 0x231   : > { %v4279_v33 = vadd.f32 %v4278_v43, %v4277_v57  ;;  %v4304_v57 = vsel %vm536_vm1, %v4250_v60, 0.0  ;;  %v4306_v43 = vsel %vm536_vm1, %v4251_v14, 0.0  ;;  %v4308_v12 = vsel %vm536_vm1, %v4252_v51, 0.0 }
 0x232   : > { %v4310_v13 = vsel %vm536_vm1, %v4253_v63, 0.0  ;;  %v4257_v41 = vmul.f32 %v4225_v40, %v4225_v40 }
 0x233   : > { %v4281_v37 = vadd.f32 %v4280_v61, %v4279_v33 }
 0x234   : > { %v4318_v1 = vsel %vm536_vm1, %v4257_v41, 0.0 }
 0x235   : > { %v4283_v42 = vadd.f32 %v4282_v27, %v4281_v37  ;;  %v4255_v37 = vmul.f32 %v4223_v0, %v4223_v0  ;;  %v4256_v27 = vmul.f32 %v4224_v15, %v4224_v15 }
 0x237   : > { %v4285_v2 = vadd.f32 %v4284_v49, %v4283_v42  ;;  %v4312_v42 = vsel %vm536_vm1, %v4254_v56, 0.0  ;;  %v4314_v32 = vsel %vm536_vm1, %v4255_v37, 0.0  ;;  %v4316_v46 = vsel %vm536_vm1, %v4256_v27, 0.0 }
 0x239   : > { %v4287_v11 = vadd.f32 %v4286_v21, %v4285_v2  ;;  %v4258_v2 = vmul.f32 %v4226_v36, %v4226_v36 }
 0x23b   : > { %v4289_v38 = vadd.f32 %v4288_v52, %v4287_v11  ;;  %v4320_v11 = vsel %vm536_vm1, %v4258_v2, 0.0 }
 0x23d   : > { %v4291_v3 = vadd.f32 %v4290_v48, %v4289_v38 }
 0x23f   : > { %v4293_v30 = vadd.f32 %v4292_v34, %v4291_v3 }
 0x241   : > { %v4295_v23 = vadd.f32 %v4294_v53, %v4293_v30 }
 0x243   : > { %v4297_v20 = vadd.f32 %v4296_v39, %v4295_v23 }
 0x245   : > { %v4299_v62 = vadd.f32 %v4298_v31, %v4297_v20 }
 0x247   : > { %v4301_v25 = vadd.f32 %v4300_v10, %v4299_v62 }
 0x249   : > { %v4303_v24 = vadd.f32 %v4302_v4, %v4301_v25 }
 0x24b   : > { %v4305_v7 = vadd.f32 %v4304_v57, %v4303_v24 }
 0x24d   : > { %v4307_v33 = vadd.f32 %v4306_v43, %v4305_v7 }
 0x24f   : > { %v4309_v61 = vadd.f32 %v4308_v12, %v4307_v33 }
 0x251   : > { %v4311_v54 = vadd.f32 %v4310_v13, %v4309_v61 }
 0x253   : > { %v4313_v26 = vadd.f32 %v4312_v42, %v4311_v54 }
 0x255   : > { %v4315_v49 = vadd.f32 %v4314_v32, %v4313_v26 }
 0x257   : > { %v4317_v5 = vadd.f32 %v4316_v46, %v4315_v49 }
 0x259   : > { %v4319_v21 = vadd.f32 %v4318_v1, %v4317_v5 }
 0x25b   : > { %v4321_v47 = vadd.f32 %v4320_v11, %v4319_v21 }
 0x25d   : > { %v4322_v22 = vrot.slane %v4321_v47, 4 }
 0x25f   : > { %v4323_v17 = vadd.f32 %v4322_v22, %v4321_v47 }
 0x261   : > { %v4324_v18 = vrot.slane %v4323_v17, 2 }
 0x263   : > { %v4325_v52 = vadd.f32 %v4324_v18, %v4323_v17 }
 0x265   : > { %v4326_v38 = vrot.slane %v4325_v52, 1 }
 0x267   : > { %v4327_v6 = vadd.f32 %v4326_v38, %v4325_v52 }
 0x269   : > { %v4328_v16 = vsel %vm342_vm14, %v7527_v9, %v4327_v6 }
 0x26a   : > { %4330 = vst.msk [vmem:[%s181_s18] sm:$0x3] %vm4329_vm0, %v4328_v16 }
 0x26b PF: > { %s14_s12 = sadd.s32 1, %s5500_s12  }
 0x26c   : > { %p11_p4 = scmp.ge.s32.totalorder %s14_s12, 4  }
 0x26e   :  { %13 = sbr.rel (!%p11_p4) target bundleno = 1 (0x1), region = 80 }

</bundles_post_ra>
